<compile_context>
chip_gen: v7x
topology: tpu7x:2x2x1
jax: 0.10.0
libtpu: 0.0.40
codegen_flags: <defaults>
</compile_context>

<pallas_src>
import math
import functools

import jax
import jax.numpy as jnp
import numpy as np
from jax.experimental import pallas as pl
from jax.experimental.pallas import tpu as pltpu

D_MODEL = 32
N_HEAD = 4
N_LAYERS = 2
D_FF = 64
LN_EPS = 1e-5


# ---------------------------------------------------------------------------
# Single fused kernel: embed + N decoder layers + output projection
# ---------------------------------------------------------------------------
def fused_decoder_kernel(
        feat_ref,                                   # [B*(St+Sm), 4]  (geo | mach,re)
        emb_wt_ref, emb_b_ref,                      # [4, D], [1, D]
        sa_wqkv_ref, sa_bqkv_ref, sa_wo_ref, sa_bo_ref,       # [L,D,3D],[L,1,3D],[L,D,D],[L,1,D]
        ca_wq_ref, ca_bq_ref, ca_wkv_ref, ca_bkv_ref, ca_wo_ref, ca_bo_ref,
        ln1w_ref, ln1b_ref, ln2w_ref, ln2b_ref, ln3w_ref, ln3b_ref,   # [L,1,D] each
        ff1w_ref, ff1b_ref, ff2w_ref, ff2b_ref,     # [L,D,F],[L,1,F],[L,F,D],[L,1,D]
        projw_ref, projb_ref,                       # [D,1],[1,1]
        out_ref,                                    # [B*St, 1]
        *, batch, seq_tgt, seq_mem, nhead, nlayers):
    D = emb_wt_ref.shape[1]
    hd = D // nhead
    scale = 1.0 / math.sqrt(hd)
    rt = batch * seq_tgt                            # rows of the target stream
    f32 = jnp.float32

    # ---- fused geo + global embedding: one K=4 matmul for tgt AND memory ----
    emb = jnp.dot(feat_ref[...], emb_wt_ref[...],
                  preferred_element_type=f32) + emb_b_ref[...]        # [R, D]
    x = emb[0:rt, :]                                # [B*St, D]  target stream
    mem = emb[rt:, :]                               # [B*Sm, D]  memory stream

    def layer_norm(v, w, b):
        mu = jnp.mean(v, axis=-1, keepdims=True)
        var = jnp.mean((v - mu) * (v - mu), axis=-1, keepdims=True)
        return (v - mu) * jax.lax.rsqrt(var + LN_EPS) * w + b

    def softmax(s):
        # Scores are tiny (few keys, fp32 accumulation): skip max-subtraction,
        # and do the normalization divide on the EUP via approx reciprocal.
        p = jnp.exp(s)
        return p * pl.reciprocal(jnp.sum(p, axis=-1, keepdims=True), approx=True)

    def mha(q2, k2, v2, wo_t, bo, sq, sk):
        # q2: [B*sq, D], k2/v2: [B*sk, D]. Static unrolled loops over batch and
        # heads; per-(b,h) score / PV matmuls are 2-D (known-good lowering).
        per_batch = []
        for b in range(batch):
            qb = q2[b * sq:(b + 1) * sq, :]
            kb = k2[b * sk:(b + 1) * sk, :]
            vb = v2[b * sk:(b + 1) * sk, :]
            heads = []
            for h in range(nhead):
                sl = slice(h * hd, (h + 1) * hd)
                s = jnp.einsum('qd,kd->qk', qb[:, sl], kb[:, sl],
                               preferred_element_type=f32) * scale
                p = softmax(s)
                heads.append(jnp.dot(p, vb[:, sl], preferred_element_type=f32))
            per_batch.append(jnp.concatenate(heads, axis=-1))         # [sq, D]
        o2 = jnp.concatenate(per_batch, axis=0)                       # [B*sq, D]
        # single output projection over all batches/heads
        return jnp.dot(o2, wo_t, preferred_element_type=f32) + bo

    for l in range(nlayers):                         # static unrolled layer loop
        # --- self-attention (fused QKV projection, one MXU pass) ---
        qkv = jnp.dot(x, sa_wqkv_ref[l], preferred_element_type=f32) + sa_bqkv_ref[l]
        sa = mha(qkv[:, 0:D], qkv[:, D:2 * D], qkv[:, 2 * D:3 * D],
                 sa_wo_ref[l], sa_bo_ref[l], seq_tgt, seq_tgt)
        x = layer_norm(x + sa, ln1w_ref[l], ln1b_ref[l])
        # --- cross-attention (Q from x, fused KV from memory) ---
        q = jnp.dot(x, ca_wq_ref[l], preferred_element_type=f32) + ca_bq_ref[l]
        kv = jnp.dot(mem, ca_wkv_ref[l], preferred_element_type=f32) + ca_bkv_ref[l]
        ca = mha(q, kv[:, 0:D], kv[:, D:2 * D],
                 ca_wo_ref[l], ca_bo_ref[l], seq_tgt, seq_mem)
        x = layer_norm(x + ca, ln2w_ref[l], ln2b_ref[l])
        # --- feed-forward (ReLU) ---
        h1 = jnp.maximum(jnp.dot(x, ff1w_ref[l], preferred_element_type=f32)
                         + ff1b_ref[l], 0.0)
        ff = jnp.dot(h1, ff2w_ref[l], preferred_element_type=f32) + ff2b_ref[l]
        x = layer_norm(x + ff, ln3w_ref[l], ln3b_ref[l])

    # --- output projection Linear(D -> 1); single tiny store ---
    out_ref[...] = jnp.dot(x, projw_ref[...], preferred_element_type=f32) + projb_ref[...]


# ---------------------------------------------------------------------------
# Wrapper: host-side layout glue (reshape / transpose / stack of parameters)
# ---------------------------------------------------------------------------
def _stack(layers, fn):
    return jnp.stack([fn(lp) for lp in layers], axis=0)


def airfoil_transformer_forward(params, tgt_spline, mem_spline, mach, reynolds):
    B, St, _ = tgt_spline.shape
    Bm, Sm, _ = mem_spline.shape
    assert B == Bm
    D = params['geo_w'].shape[0]
    L = len(params['layers'])
    assert D % N_HEAD == 0

    # -- data layout glue: fold batch into rows, stack tgt+mem streams, and
    #    replicate global features per row so the kernel needs no broadcasts --
    gf = jnp.stack([mach, reynolds], axis=-1).astype(jnp.float32)      # [B, 2]
    geo_all = jnp.concatenate([tgt_spline.reshape(B * St, 2),
                               mem_spline.reshape(B * Sm, 2)], axis=0)
    gf_all = jnp.concatenate([jnp.repeat(gf, St, axis=0),
                              jnp.repeat(gf, Sm, axis=0)], axis=0)
    feat = jnp.concatenate([geo_all, gf_all], axis=1)                  # [R, 4]

    # -- parameter layout glue: fuse the two K=2 embeddings into one [4,D]
    #    matmul; pre-transpose + pre-split attention weights; stack layers --
    emb_wt = jnp.concatenate([params['geo_w'].T, params['glob_w'].T], axis=0)  # [4, D]
    emb_b = (params['geo_b'] + params['glob_b']).reshape(1, D)

    Ls = params['layers']
    args = [
        feat, emb_wt, emb_b,
        _stack(Ls, lambda p: p['sa_w'].T),                      # [L, D, 3D]
        _stack(Ls, lambda p: p['sa_b'].reshape(1, -1)),         # [L, 1, 3D]
        _stack(Ls, lambda p: p['sa_ow'].T),                     # [L, D, D]
        _stack(Ls, lambda p: p['sa_ob'].reshape(1, -1)),        # [L, 1, D]
        _stack(Ls, lambda p: p['ca_w'][:D].T),                  # [L, D, D]   (Wq)
        _stack(Ls, lambda p: p['ca_b'][:D].reshape(1, -1)),     # [L, 1, D]
        _stack(Ls, lambda p: p['ca_w'][D:].T),                  # [L, D, 2D]  (Wkv)
        _stack(Ls, lambda p: p['ca_b'][D:].reshape(1, -1)),     # [L, 1, 2D]
        _stack(Ls, lambda p: p['ca_ow'].T),                     # [L, D, D]
        _stack(Ls, lambda p: p['ca_ob'].reshape(1, -1)),        # [L, 1, D]
        _stack(Ls, lambda p: p['ln1_w'].reshape(1, -1)),
        _stack(Ls, lambda p: p['ln1_b'].reshape(1, -1)),
        _stack(Ls, lambda p: p['ln2_w'].reshape(1, -1)),
        _stack(Ls, lambda p: p['ln2_b'].reshape(1, -1)),
        _stack(Ls, lambda p: p['ln3_w'].reshape(1, -1)),
        _stack(Ls, lambda p: p['ln3_b'].reshape(1, -1)),
        _stack(Ls, lambda p: p['ff1_w'].T),                     # [L, D, F]
        _stack(Ls, lambda p: p['ff1_b'].reshape(1, -1)),        # [L, 1, F]
        _stack(Ls, lambda p: p['ff2_w'].T),                     # [L, F, D]
        _stack(Ls, lambda p: p['ff2_b'].reshape(1, -1)),        # [L, 1, D]
        params['proj_w'].T,                                     # [D, 1]
        params['proj_b'].reshape(1, 1),                         # [1, 1]
    ]

    kernel = functools.partial(fused_decoder_kernel, batch=B, seq_tgt=St,
                               seq_mem=Sm, nhead=N_HEAD, nlayers=L)
    out2 = pl.pallas_call(
        kernel,
        out_shape=jax.ShapeDtypeStruct((B * St, 1), jnp.float32),
        in_specs=[pl.BlockSpec(memory_space=pltpu.MemorySpace.VMEM) for _ in args],
        out_specs=pl.BlockSpec(memory_space=pltpu.MemorySpace.VMEM),
    )(*args)
    return out2.reshape(B, St, 1)


# ---------------------------------------------------------------------------
# Deterministic parameter init (PyTorch [out, in] convention)
# ---------------------------------------------------------------------------
def init_params(key, d_model, n_layers, d_ff):
    def lin(k, out_dim, in_dim, scale=0.05):
        return jax.random.normal(k, (out_dim, in_dim), jnp.float32) * scale

    def vec(k, n, scale=0.01):
        return jax.random.normal(k, (n,), jnp.float32) * scale

    keys = jax.random.split(key, 6 + n_layers)
    params = {
        'geo_w': lin(keys[0], d_model, 2),
        'geo_b': vec(keys[1], d_model),
        'glob_w': lin(keys[2], d_model, 2),
        'glob_b': vec(keys[3], d_model),
        'proj_w': lin(keys[4], 1, d_model),
        'proj_b': vec(keys[5], 1),
        'layers': [],
    }
    for i in range(n_layers):
        lk = jax.random.split(keys[6 + i], 12)
        params['layers'].append({
            'sa_w': lin(lk[0], 3 * d_model, d_model), 'sa_b': vec(lk[1], 3 * d_model),
            'sa_ow': lin(lk[2], d_model, d_model), 'sa_ob': vec(lk[3], d_model),
            'ca_w': lin(lk[4], 3 * d_model, d_model), 'ca_b': vec(lk[5], 3 * d_model),
            'ca_ow': lin(lk[6], d_model, d_model), 'ca_ob': vec(lk[7], d_model),
            'ln1_w': jnp.ones((d_model,), jnp.float32), 'ln1_b': jnp.zeros((d_model,), jnp.float32),
            'ln2_w': jnp.ones((d_model,), jnp.float32), 'ln2_b': jnp.zeros((d_model,), jnp.float32),
            'ln3_w': jnp.ones((d_model,), jnp.float32), 'ln3_b': jnp.zeros((d_model,), jnp.float32),
            'ff1_w': lin(lk[8], d_ff, d_model), 'ff1_b': vec(lk[9], d_ff),
            'ff2_w': lin(lk[10], d_model, d_ff), 'ff2_b': vec(lk[11], d_model),
        })
    return params


# ---------------------------------------------------------------------------
# Pure-JAX reference (mirrors PyTorch eval forward) for validation
# ---------------------------------------------------------------------------
def reference_forward(params, tgt_geo, mem_geo, mach, reynolds):
    gf = jnp.stack([mach, reynolds], axis=-1)
    glob = gf @ params['glob_w'].T + params['glob_b']
    x = tgt_geo @ params['geo_w'].T + params['geo_b'] + glob[:, None, :]
    mem = mem_geo @ params['geo_w'].T + params['geo_b'] + glob[:, None, :]

    def ln(v, w, b):
        mu = v.mean(-1, keepdims=True)
        var = ((v - mu) ** 2).mean(-1, keepdims=True)
        return (v - mu) / jnp.sqrt(var + LN_EPS) * w + b

    def mha(q_in, kv_in, in_w, in_b, ow, ob):
        D = q_in.shape[-1]
        hd = D // N_HEAD
        q = q_in @ in_w[:D].T + in_b[:D]
        k = kv_in @ in_w[D:2 * D].T + in_b[D:2 * D]
        v = kv_in @ in_w[2 * D:].T + in_b[2 * D:]
        B, Sq, _ = q.shape
        Sk = kv_in.shape[1]
        q = q.reshape(B, Sq, N_HEAD, hd).transpose(0, 2, 1, 3)
        k = k.reshape(B, Sk, N_HEAD, hd).transpose(0, 2, 1, 3)
        v = v.reshape(B, Sk, N_HEAD, hd).transpose(0, 2, 1, 3)
        s = jnp.einsum('bhqd,bhkd->bhqk', q, k) / math.sqrt(hd)
        p = jax.nn.softmax(s, axis=-1)
        o = jnp.einsum('bhqk,bhkd->bhqd', p, v)
        o = o.transpose(0, 2, 1, 3).reshape(B, Sq, D)
        return o @ ow.T + ob

    for lp in params['layers']:
        x = ln(x + mha(x, x, lp['sa_w'], lp['sa_b'], lp['sa_ow'], lp['sa_ob']),
               lp['ln1_w'], lp['ln1_b'])
        x = ln(x + mha(x, mem, lp['ca_w'], lp['ca_b'], lp['ca_ow'], lp['ca_ob']),
               lp['ln2_w'], lp['ln2_b'])
        h = jax.nn.relu(x @ lp['ff1_w'].T + lp['ff1_b'])
        x = ln(x + h @ lp['ff2_w'].T + lp['ff2_b'], lp['ln3_w'], lp['ln3_b'])
    return x @ params['proj_w'].T + params['proj_b']


if __name__ == "__main__":
    key = jax.random.PRNGKey(0)
    pkey, dkey = jax.random.split(key)
    params = init_params(pkey, D_MODEL, N_LAYERS, D_FF)

    B, S = 2, 8
    k1, k2, k3, k4 = jax.random.split(dkey, 4)
    tgt_spline = jax.random.normal(k1, (B, S, 2), jnp.float32)
    mem_spline = jax.random.normal(k2, (B, S, 2), jnp.float32)
    mach = jax.random.uniform(k3, (B,), jnp.float32, minval=0.1, maxval=0.9)
    reynolds = jax.random.uniform(k4, (B,), jnp.float32, minval=0.5, maxval=5.0)

    out = airfoil_transformer_forward(params, tgt_spline, mem_spline, mach, reynolds)
    out = jax.block_until_ready(out)
    assert out.shape == (B, S, 1)

    ref = reference_forward(params, tgt_spline, mem_spline, mach, reynolds)
    np.testing.assert_allclose(np.asarray(out), np.asarray(ref), rtol=2e-3, atol=2e-3)

    print("KERNEL_OK")
</pallas_src>

<mosaic_0001>
module attributes {stable_mosaic.version = 11 : i64} {
  func.func @fused_decoder_kernel(%arg0: memref<32x4xf32, #tpu.memory_space<vmem>>, %arg1: memref<4x32xf32, #tpu.memory_space<vmem>>, %arg2: memref<1x32xf32, #tpu.memory_space<vmem>>, %arg3: memref<2x32x96xf32, #tpu.memory_space<vmem>>, %arg4: memref<2x1x96xf32, #tpu.memory_space<vmem>>, %arg5: memref<2x32x32xf32, #tpu.memory_space<vmem>>, %arg6: memref<2x1x32xf32, #tpu.memory_space<vmem>>, %arg7: memref<2x32x32xf32, #tpu.memory_space<vmem>>, %arg8: memref<2x1x32xf32, #tpu.memory_space<vmem>>, %arg9: memref<2x32x64xf32, #tpu.memory_space<vmem>>, %arg10: memref<2x1x64xf32, #tpu.memory_space<vmem>>, %arg11: memref<2x32x32xf32, #tpu.memory_space<vmem>>, %arg12: memref<2x1x32xf32, #tpu.memory_space<vmem>>, %arg13: memref<2x1x32xf32, #tpu.memory_space<vmem>>, %arg14: memref<2x1x32xf32, #tpu.memory_space<vmem>>, %arg15: memref<2x1x32xf32, #tpu.memory_space<vmem>>, %arg16: memref<2x1x32xf32, #tpu.memory_space<vmem>>, %arg17: memref<2x1x32xf32, #tpu.memory_space<vmem>>, %arg18: memref<2x1x32xf32, #tpu.memory_space<vmem>>, %arg19: memref<2x32x64xf32, #tpu.memory_space<vmem>>, %arg20: memref<2x1x64xf32, #tpu.memory_space<vmem>>, %arg21: memref<2x64x32xf32, #tpu.memory_space<vmem>>, %arg22: memref<2x1x32xf32, #tpu.memory_space<vmem>>, %arg23: memref<32x1xf32, #tpu.memory_space<vmem>>, %arg24: memref<1x1xf32, #tpu.memory_space<vmem>>, %arg25: memref<16x1xf32, #tpu.memory_space<vmem>>) attributes {dimension_semantics = [], scalar_prefetch = 0 : i64, scratch_operands = 0 : i64, tpu.core_type = #tpu.core_type<tc>} {
    %c0 = arith.constant 0 : index
    %c0_0 = arith.constant 0 : index
    %0 = vector.load %arg0[%c0, %c0_0] : memref<32x4xf32, #tpu.memory_space<vmem>>, vector<32x4xf32>
    %c0_1 = arith.constant 0 : index
    %c0_2 = arith.constant 0 : index
    %1 = vector.load %arg1[%c0_1, %c0_2] : memref<4x32xf32, #tpu.memory_space<vmem>>, vector<4x32xf32>
    %cst = arith.constant dense<0.000000e+00> : vector<32x32xf32>
    %2 = tpu.matmul %0, %1, %cst {dimension_numbers = #tpu.dot_dimension_numbers<[1], [0], [0], [1], [0, 0, 1, 1], [], []>} : vector<32x4xf32>, vector<4x32xf32>, vector<32x32xf32> -> vector<32x32xf32>
    %c0_3 = arith.constant 0 : index
    %c0_4 = arith.constant 0 : index
    %3 = vector.load %arg2[%c0_3, %c0_4] : memref<1x32xf32, #tpu.memory_space<vmem>>, vector<1x32xf32>
    %4 = vector.broadcast %3 : vector<1x32xf32> to vector<32x32xf32>
    %5 = arith.addf %2, %4 : vector<32x32xf32>
    %6 = vector.extract_strided_slice %5 {offsets = [0, 0], sizes = [16, 32], strides = [1, 1]} : vector<32x32xf32> to vector<16x32xf32>
    %7 = vector.extract_strided_slice %5 {offsets = [16, 0], sizes = [16, 32], strides = [1, 1]} : vector<32x32xf32> to vector<16x32xf32>
    %c0_5 = arith.constant 0 : index
    %c0_6 = arith.constant 0 : index
    %c0_7 = arith.constant 0 : index
    %8 = vector.load %arg3[%c0_5, %c0_6, %c0_7] : memref<2x32x96xf32, #tpu.memory_space<vmem>>, vector<1x32x96xf32>
    %9 = vector.shape_cast %8 : vector<1x32x96xf32> to vector<32x96xf32>
    %cst_8 = arith.constant dense<0.000000e+00> : vector<16x96xf32>
    %10 = tpu.matmul %6, %9, %cst_8 {dimension_numbers = #tpu.dot_dimension_numbers<[1], [0], [0], [1], [0, 0, 1, 1], [], []>} : vector<16x32xf32>, vector<32x96xf32>, vector<16x96xf32> -> vector<16x96xf32>
    %c0_9 = arith.constant 0 : index
    %c0_10 = arith.constant 0 : index
    %c0_11 = arith.constant 0 : index
    %11 = vector.load %arg4[%c0_9, %c0_10, %c0_11] : memref<2x1x96xf32, #tpu.memory_space<vmem>>, vector<1x1x96xf32>
    %12 = vector.shape_cast %11 : vector<1x1x96xf32> to vector<1x96xf32>
    %13 = vector.broadcast %12 : vector<1x96xf32> to vector<16x96xf32>
    %14 = arith.addf %10, %13 : vector<16x96xf32>
    %15 = vector.extract_strided_slice %14 {offsets = [0, 0], sizes = [16, 32], strides = [1, 1]} : vector<16x96xf32> to vector<16x32xf32>
    %16 = vector.extract_strided_slice %14 {offsets = [0, 32], sizes = [16, 32], strides = [1, 1]} : vector<16x96xf32> to vector<16x32xf32>
    %17 = vector.extract_strided_slice %14 {offsets = [0, 64], sizes = [16, 32], strides = [1, 1]} : vector<16x96xf32> to vector<16x32xf32>
    %c0_12 = arith.constant 0 : index
    %c0_13 = arith.constant 0 : index
    %c0_14 = arith.constant 0 : index
    %18 = vector.load %arg5[%c0_12, %c0_13, %c0_14] : memref<2x32x32xf32, #tpu.memory_space<vmem>>, vector<1x32x32xf32>
    %19 = vector.shape_cast %18 : vector<1x32x32xf32> to vector<32x32xf32>
    %c0_15 = arith.constant 0 : index
    %c0_16 = arith.constant 0 : index
    %c0_17 = arith.constant 0 : index
    %20 = vector.load %arg6[%c0_15, %c0_16, %c0_17] : memref<2x1x32xf32, #tpu.memory_space<vmem>>, vector<1x1x32xf32>
    %21 = vector.shape_cast %20 : vector<1x1x32xf32> to vector<1x32xf32>
    %22 = vector.extract_strided_slice %15 {offsets = [0, 0], sizes = [8, 32], strides = [1, 1]} : vector<16x32xf32> to vector<8x32xf32>
    %23 = vector.extract_strided_slice %16 {offsets = [0, 0], sizes = [8, 32], strides = [1, 1]} : vector<16x32xf32> to vector<8x32xf32>
    %24 = vector.extract_strided_slice %17 {offsets = [0, 0], sizes = [8, 32], strides = [1, 1]} : vector<16x32xf32> to vector<8x32xf32>
    %25 = vector.extract_strided_slice %22 {offsets = [0, 0], sizes = [8, 8], strides = [1, 1]} : vector<8x32xf32> to vector<8x8xf32>
    %26 = vector.extract_strided_slice %23 {offsets = [0, 0], sizes = [8, 8], strides = [1, 1]} : vector<8x32xf32> to vector<8x8xf32>
    "tpu.trace_start"() <{level = 10 : i32, message = "qd,kd->qk"}> : () -> ()
    %cst_18 = arith.constant dense<0.000000e+00> : vector<8x8xf32>
    %27 = tpu.matmul %25, %26, %cst_18 {dimension_numbers = #tpu.dot_dimension_numbers<[1], [1], [0], [0], [0, 0, 1, 0], [], []>} : vector<8x8xf32>, vector<8x8xf32>, vector<8x8xf32> -> vector<8x8xf32>
    "tpu.trace_stop"() : () -> ()
    %cst_19 = arith.constant 0.353553385 : f32
    %28 = vector.broadcast %cst_19 : f32 to vector<8x8xf32>
    %29 = arith.mulf %27, %28 : vector<8x8xf32>
    %30 = math.exp %29 : vector<8x8xf32>
    %cst_20 = arith.constant dense<0.000000e+00> : vector<8xf32>
    %31 = vector.multi_reduction <add>, %30, %cst_20 [1] : vector<8x8xf32> to vector<8xf32>
    %32 = vector.shape_cast %31 : vector<8xf32> to vector<8x1xf32>
    %33 = tpu.reciprocal %32 {approx = true} : vector<8x1xf32> -> vector<8x1xf32>
    %34 = vector.broadcast %33 : vector<8x1xf32> to vector<8x8xf32>
    %35 = arith.mulf %30, %34 : vector<8x8xf32>
    %36 = vector.extract_strided_slice %24 {offsets = [0, 0], sizes = [8, 8], strides = [1, 1]} : vector<8x32xf32> to vector<8x8xf32>
    %cst_21 = arith.constant dense<0.000000e+00> : vector<8x8xf32>
    %37 = tpu.matmul %35, %36, %cst_21 {dimension_numbers = #tpu.dot_dimension_numbers<[1], [0], [0], [1], [0, 0, 1, 1], [], []>} : vector<8x8xf32>, vector<8x8xf32>, vector<8x8xf32> -> vector<8x8xf32>
    %38 = vector.extract_strided_slice %22 {offsets = [0, 8], sizes = [8, 8], strides = [1, 1]} : vector<8x32xf32> to vector<8x8xf32>
    %39 = vector.extract_strided_slice %23 {offsets = [0, 8], sizes = [8, 8], strides = [1, 1]} : vector<8x32xf32> to vector<8x8xf32>
    "tpu.trace_start"() <{level = 10 : i32, message = "qd,kd->qk"}> : () -> ()
    %cst_22 = arith.constant dense<0.000000e+00> : vector<8x8xf32>
    %40 = tpu.matmul %38, %39, %cst_22 {dimension_numbers = #tpu.dot_dimension_numbers<[1], [1], [0], [0], [0, 0, 1, 0], [], []>} : vector<8x8xf32>, vector<8x8xf32>, vector<8x8xf32> -> vector<8x8xf32>
    "tpu.trace_stop"() : () -> ()
    %cst_23 = arith.constant 0.353553385 : f32
    %41 = vector.broadcast %cst_23 : f32 to vector<8x8xf32>
    %42 = arith.mulf %40, %41 : vector<8x8xf32>
    %43 = math.exp %42 : vector<8x8xf32>
    %cst_24 = arith.constant dense<0.000000e+00> : vector<8xf32>
    %44 = vector.multi_reduction <add>, %43, %cst_24 [1] : vector<8x8xf32> to vector<8xf32>
    %45 = vector.shape_cast %44 : vector<8xf32> to vector<8x1xf32>
    %46 = tpu.reciprocal %45 {approx = true} : vector<8x1xf32> -> vector<8x1xf32>
    %47 = vector.broadcast %46 : vector<8x1xf32> to vector<8x8xf32>
    %48 = arith.mulf %43, %47 : vector<8x8xf32>
    %49 = vector.extract_strided_slice %24 {offsets = [0, 8], sizes = [8, 8], strides = [1, 1]} : vector<8x32xf32> to vector<8x8xf32>
    %cst_25 = arith.constant dense<0.000000e+00> : vector<8x8xf32>
    %50 = tpu.matmul %48, %49, %cst_25 {dimension_numbers = #tpu.dot_dimension_numbers<[1], [0], [0], [1], [0, 0, 1, 1], [], []>} : vector<8x8xf32>, vector<8x8xf32>, vector<8x8xf32> -> vector<8x8xf32>
    %51 = vector.extract_strided_slice %22 {offsets = [0, 16], sizes = [8, 8], strides = [1, 1]} : vector<8x32xf32> to vector<8x8xf32>
    %52 = vector.extract_strided_slice %23 {offsets = [0, 16], sizes = [8, 8], strides = [1, 1]} : vector<8x32xf32> to vector<8x8xf32>
    "tpu.trace_start"() <{level = 10 : i32, message = "qd,kd->qk"}> : () -> ()
    %cst_26 = arith.constant dense<0.000000e+00> : vector<8x8xf32>
    %53 = tpu.matmul %51, %52, %cst_26 {dimension_numbers = #tpu.dot_dimension_numbers<[1], [1], [0], [0], [0, 0, 1, 0], [], []>} : vector<8x8xf32>, vector<8x8xf32>, vector<8x8xf32> -> vector<8x8xf32>
    "tpu.trace_stop"() : () -> ()
    %cst_27 = arith.constant 0.353553385 : f32
    %54 = vector.broadcast %cst_27 : f32 to vector<8x8xf32>
    %55 = arith.mulf %53, %54 : vector<8x8xf32>
    %56 = math.exp %55 : vector<8x8xf32>
    %cst_28 = arith.constant dense<0.000000e+00> : vector<8xf32>
    %57 = vector.multi_reduction <add>, %56, %cst_28 [1] : vector<8x8xf32> to vector<8xf32>
    %58 = vector.shape_cast %57 : vector<8xf32> to vector<8x1xf32>
    %59 = tpu.reciprocal %58 {approx = true} : vector<8x1xf32> -> vector<8x1xf32>
    %60 = vector.broadcast %59 : vector<8x1xf32> to vector<8x8xf32>
    %61 = arith.mulf %56, %60 : vector<8x8xf32>
    %62 = vector.extract_strided_slice %24 {offsets = [0, 16], sizes = [8, 8], strides = [1, 1]} : vector<8x32xf32> to vector<8x8xf32>
    %cst_29 = arith.constant dense<0.000000e+00> : vector<8x8xf32>
    %63 = tpu.matmul %61, %62, %cst_29 {dimension_numbers = #tpu.dot_dimension_numbers<[1], [0], [0], [1], [0, 0, 1, 1], [], []>} : vector<8x8xf32>, vector<8x8xf32>, vector<8x8xf32> -> vector<8x8xf32>
    %64 = vector.extract_strided_slice %22 {offsets = [0, 24], sizes = [8, 8], strides = [1, 1]} : vector<8x32xf32> to vector<8x8xf32>
    %65 = vector.extract_strided_slice %23 {offsets = [0, 24], sizes = [8, 8], strides = [1, 1]} : vector<8x32xf32> to vector<8x8xf32>
    "tpu.trace_start"() <{level = 10 : i32, message = "qd,kd->qk"}> : () -> ()
    %cst_30 = arith.constant dense<0.000000e+00> : vector<8x8xf32>
    %66 = tpu.matmul %64, %65, %cst_30 {dimension_numbers = #tpu.dot_dimension_numbers<[1], [1], [0], [0], [0, 0, 1, 0], [], []>} : vector<8x8xf32>, vector<8x8xf32>, vector<8x8xf32> -> vector<8x8xf32>
    "tpu.trace_stop"() : () -> ()
    %cst_31 = arith.constant 0.353553385 : f32
    %67 = vector.broadcast %cst_31 : f32 to vector<8x8xf32>
    %68 = arith.mulf %66, %67 : vector<8x8xf32>
    %69 = math.exp %68 : vector<8x8xf32>
    %cst_32 = arith.constant dense<0.000000e+00> : vector<8xf32>
    %70 = vector.multi_reduction <add>, %69, %cst_32 [1] : vector<8x8xf32> to vector<8xf32>
    %71 = vector.shape_cast %70 : vector<8xf32> to vector<8x1xf32>
    %72 = tpu.reciprocal %71 {approx = true} : vector<8x1xf32> -> vector<8x1xf32>
    %73 = vector.broadcast %72 : vector<8x1xf32> to vector<8x8xf32>
    %74 = arith.mulf %69, %73 : vector<8x8xf32>
    %75 = vector.extract_strided_slice %24 {offsets = [0, 24], sizes = [8, 8], strides = [1, 1]} : vector<8x32xf32> to vector<8x8xf32>
    %cst_33 = arith.constant dense<0.000000e+00> : vector<8x8xf32>
    %76 = tpu.matmul %74, %75, %cst_33 {dimension_numbers = #tpu.dot_dimension_numbers<[1], [0], [0], [1], [0, 0, 1, 1], [], []>} : vector<8x8xf32>, vector<8x8xf32>, vector<8x8xf32> -> vector<8x8xf32>
    %77 = tpu.concatenate %37, %50, %63, %76 in 1 : vector<8x8xf32>, vector<8x8xf32>, vector<8x8xf32>, vector<8x8xf32> -> vector<8x32xf32>
    %78 = vector.extract_strided_slice %15 {offsets = [8, 0], sizes = [8, 32], strides = [1, 1]} : vector<16x32xf32> to vector<8x32xf32>
    %79 = vector.extract_strided_slice %16 {offsets = [8, 0], sizes = [8, 32], strides = [1, 1]} : vector<16x32xf32> to vector<8x32xf32>
    %80 = vector.extract_strided_slice %17 {offsets = [8, 0], sizes = [8, 32], strides = [1, 1]} : vector<16x32xf32> to vector<8x32xf32>
    %81 = vector.extract_strided_slice %78 {offsets = [0, 0], sizes = [8, 8], strides = [1, 1]} : vector<8x32xf32> to vector<8x8xf32>
    %82 = vector.extract_strided_slice %79 {offsets = [0, 0], sizes = [8, 8], strides = [1, 1]} : vector<8x32xf32> to vector<8x8xf32>
    "tpu.trace_start"() <{level = 10 : i32, message = "qd,kd->qk"}> : () -> ()
    %cst_34 = arith.constant dense<0.000000e+00> : vector<8x8xf32>
    %83 = tpu.matmul %81, %82, %cst_34 {dimension_numbers = #tpu.dot_dimension_numbers<[1], [1], [0], [0], [0, 0, 1, 0], [], []>} : vector<8x8xf32>, vector<8x8xf32>, vector<8x8xf32> -> vector<8x8xf32>
    "tpu.trace_stop"() : () -> ()
    %cst_35 = arith.constant 0.353553385 : f32
    %84 = vector.broadcast %cst_35 : f32 to vector<8x8xf32>
    %85 = arith.mulf %83, %84 : vector<8x8xf32>
    %86 = math.exp %85 : vector<8x8xf32>
    %cst_36 = arith.constant dense<0.000000e+00> : vector<8xf32>
    %87 = vector.multi_reduction <add>, %86, %cst_36 [1] : vector<8x8xf32> to vector<8xf32>
    %88 = vector.shape_cast %87 : vector<8xf32> to vector<8x1xf32>
    %89 = tpu.reciprocal %88 {approx = true} : vector<8x1xf32> -> vector<8x1xf32>
    %90 = vector.broadcast %89 : vector<8x1xf32> to vector<8x8xf32>
    %91 = arith.mulf %86, %90 : vector<8x8xf32>
    %92 = vector.extract_strided_slice %80 {offsets = [0, 0], sizes = [8, 8], strides = [1, 1]} : vector<8x32xf32> to vector<8x8xf32>
    %cst_37 = arith.constant dense<0.000000e+00> : vector<8x8xf32>
    %93 = tpu.matmul %91, %92, %cst_37 {dimension_numbers = #tpu.dot_dimension_numbers<[1], [0], [0], [1], [0, 0, 1, 1], [], []>} : vector<8x8xf32>, vector<8x8xf32>, vector<8x8xf32> -> vector<8x8xf32>
    %94 = vector.extract_strided_slice %78 {offsets = [0, 8], sizes = [8, 8], strides = [1, 1]} : vector<8x32xf32> to vector<8x8xf32>
    %95 = vector.extract_strided_slice %79 {offsets = [0, 8], sizes = [8, 8], strides = [1, 1]} : vector<8x32xf32> to vector<8x8xf32>
    "tpu.trace_start"() <{level = 10 : i32, message = "qd,kd->qk"}> : () -> ()
    %cst_38 = arith.constant dense<0.000000e+00> : vector<8x8xf32>
    %96 = tpu.matmul %94, %95, %cst_38 {dimension_numbers = #tpu.dot_dimension_numbers<[1], [1], [0], [0], [0, 0, 1, 0], [], []>} : vector<8x8xf32>, vector<8x8xf32>, vector<8x8xf32> -> vector<8x8xf32>
    "tpu.trace_stop"() : () -> ()
    %cst_39 = arith.constant 0.353553385 : f32
    %97 = vector.broadcast %cst_39 : f32 to vector<8x8xf32>
    %98 = arith.mulf %96, %97 : vector<8x8xf32>
    %99 = math.exp %98 : vector<8x8xf32>
    %cst_40 = arith.constant dense<0.000000e+00> : vector<8xf32>
    %100 = vector.multi_reduction <add>, %99, %cst_40 [1] : vector<8x8xf32> to vector<8xf32>
    %101 = vector.shape_cast %100 : vector<8xf32> to vector<8x1xf32>
    %102 = tpu.reciprocal %101 {approx = true} : vector<8x1xf32> -> vector<8x1xf32>
    %103 = vector.broadcast %102 : vector<8x1xf32> to vector<8x8xf32>
    %104 = arith.mulf %99, %103 : vector<8x8xf32>
    %105 = vector.extract_strided_slice %80 {offsets = [0, 8], sizes = [8, 8], strides = [1, 1]} : vector<8x32xf32> to vector<8x8xf32>
    %cst_41 = arith.constant dense<0.000000e+00> : vector<8x8xf32>
    %106 = tpu.matmul %104, %105, %cst_41 {dimension_numbers = #tpu.dot_dimension_numbers<[1], [0], [0], [1], [0, 0, 1, 1], [], []>} : vector<8x8xf32>, vector<8x8xf32>, vector<8x8xf32> -> vector<8x8xf32>
    %107 = vector.extract_strided_slice %78 {offsets = [0, 16], sizes = [8, 8], strides = [1, 1]} : vector<8x32xf32> to vector<8x8xf32>
    %108 = vector.extract_strided_slice %79 {offsets = [0, 16], sizes = [8, 8], strides = [1, 1]} : vector<8x32xf32> to vector<8x8xf32>
    "tpu.trace_start"() <{level = 10 : i32, message = "qd,kd->qk"}> : () -> ()
    %cst_42 = arith.constant dense<0.000000e+00> : vector<8x8xf32>
    %109 = tpu.matmul %107, %108, %cst_42 {dimension_numbers = #tpu.dot_dimension_numbers<[1], [1], [0], [0], [0, 0, 1, 0], [], []>} : vector<8x8xf32>, vector<8x8xf32>, vector<8x8xf32> -> vector<8x8xf32>
    "tpu.trace_stop"() : () -> ()
    %cst_43 = arith.constant 0.353553385 : f32
    %110 = vector.broadcast %cst_43 : f32 to vector<8x8xf32>
    %111 = arith.mulf %109, %110 : vector<8x8xf32>
    %112 = math.exp %111 : vector<8x8xf32>
    %cst_44 = arith.constant dense<0.000000e+00> : vector<8xf32>
    %113 = vector.multi_reduction <add>, %112, %cst_44 [1] : vector<8x8xf32> to vector<8xf32>
    %114 = vector.shape_cast %113 : vector<8xf32> to vector<8x1xf32>
    %115 = tpu.reciprocal %114 {approx = true} : vector<8x1xf32> -> vector<8x1xf32>
    %116 = vector.broadcast %115 : vector<8x1xf32> to vector<8x8xf32>
    %117 = arith.mulf %112, %116 : vector<8x8xf32>
    %118 = vector.extract_strided_slice %80 {offsets = [0, 16], sizes = [8, 8], strides = [1, 1]} : vector<8x32xf32> to vector<8x8xf32>
    %cst_45 = arith.constant dense<0.000000e+00> : vector<8x8xf32>
    %119 = tpu.matmul %117, %118, %cst_45 {dimension_numbers = #tpu.dot_dimension_numbers<[1], [0], [0], [1], [0, 0, 1, 1], [], []>} : vector<8x8xf32>, vector<8x8xf32>, vector<8x8xf32> -> vector<8x8xf32>
    %120 = vector.extract_strided_slice %78 {offsets = [0, 24], sizes = [8, 8], strides = [1, 1]} : vector<8x32xf32> to vector<8x8xf32>
    %121 = vector.extract_strided_slice %79 {offsets = [0, 24], sizes = [8, 8], strides = [1, 1]} : vector<8x32xf32> to vector<8x8xf32>
    "tpu.trace_start"() <{level = 10 : i32, message = "qd,kd->qk"}> : () -> ()
    %cst_46 = arith.constant dense<0.000000e+00> : vector<8x8xf32>
    %122 = tpu.matmul %120, %121, %cst_46 {dimension_numbers = #tpu.dot_dimension_numbers<[1], [1], [0], [0], [0, 0, 1, 0], [], []>} : vector<8x8xf32>, vector<8x8xf32>, vector<8x8xf32> -> vector<8x8xf32>
    "tpu.trace_stop"() : () -> ()
    %cst_47 = arith.constant 0.353553385 : f32
    %123 = vector.broadcast %cst_47 : f32 to vector<8x8xf32>
    %124 = arith.mulf %122, %123 : vector<8x8xf32>
    %125 = math.exp %124 : vector<8x8xf32>
    %cst_48 = arith.constant dense<0.000000e+00> : vector<8xf32>
    %126 = vector.multi_reduction <add>, %125, %cst_48 [1] : vector<8x8xf32> to vector<8xf32>
    %127 = vector.shape_cast %126 : vector<8xf32> to vector<8x1xf32>
    %128 = tpu.reciprocal %127 {approx = true} : vector<8x1xf32> -> vector<8x1xf32>
    %129 = vector.broadcast %128 : vector<8x1xf32> to vector<8x8xf32>
    %130 = arith.mulf %125, %129 : vector<8x8xf32>
    %131 = vector.extract_strided_slice %80 {offsets = [0, 24], sizes = [8, 8], strides = [1, 1]} : vector<8x32xf32> to vector<8x8xf32>
    %cst_49 = arith.constant dense<0.000000e+00> : vector<8x8xf32>
    %132 = tpu.matmul %130, %131, %cst_49 {dimension_numbers = #tpu.dot_dimension_numbers<[1], [0], [0], [1], [0, 0, 1, 1], [], []>} : vector<8x8xf32>, vector<8x8xf32>, vector<8x8xf32> -> vector<8x8xf32>
    %133 = tpu.concatenate %93, %106, %119, %132 in 1 : vector<8x8xf32>, vector<8x8xf32>, vector<8x8xf32>, vector<8x8xf32> -> vector<8x32xf32>
    %134 = tpu.concatenate %77, %133 in 0 : vector<8x32xf32>, vector<8x32xf32> -> vector<16x32xf32>
    %cst_50 = arith.constant dense<0.000000e+00> : vector<16x32xf32>
    %135 = tpu.matmul %134, %19, %cst_50 {dimension_numbers = #tpu.dot_dimension_numbers<[1], [0], [0], [1], [0, 0, 1, 1], [], []>} : vector<16x32xf32>, vector<32x32xf32>, vector<16x32xf32> -> vector<16x32xf32>
    %136 = vector.broadcast %21 : vector<1x32xf32> to vector<16x32xf32>
    %137 = arith.addf %135, %136 : vector<16x32xf32>
    %138 = arith.addf %6, %137 : vector<16x32xf32>
    %c0_51 = arith.constant 0 : index
    %c0_52 = arith.constant 0 : index
    %c0_53 = arith.constant 0 : index
    %139 = vector.load %arg13[%c0_51, %c0_52, %c0_53] : memref<2x1x32xf32, #tpu.memory_space<vmem>>, vector<1x1x32xf32>
    %140 = vector.shape_cast %139 : vector<1x1x32xf32> to vector<1x32xf32>
    %c0_54 = arith.constant 0 : index
    %c0_55 = arith.constant 0 : index
    %c0_56 = arith.constant 0 : index
    %141 = vector.load %arg14[%c0_54, %c0_55, %c0_56] : memref<2x1x32xf32, #tpu.memory_space<vmem>>, vector<1x1x32xf32>
    %142 = vector.shape_cast %141 : vector<1x1x32xf32> to vector<1x32xf32>
    %cst_57 = arith.constant dense<0.000000e+00> : vector<16xf32>
    %143 = vector.multi_reduction <add>, %138, %cst_57 [1] : vector<16x32xf32> to vector<16xf32>
    %144 = vector.shape_cast %143 : vector<16xf32> to vector<16x1xf32>
    %cst_58 = arith.constant 3.200000e+01 : f32
    %145 = vector.broadcast %cst_58 : f32 to vector<16x1xf32>
    %146 = arith.divf %144, %145 : vector<16x1xf32>
    %147 = vector.broadcast %146 : vector<16x1xf32> to vector<16x32xf32>
    %148 = arith.subf %138, %147 : vector<16x32xf32>
    %149 = vector.broadcast %146 : vector<16x1xf32> to vector<16x32xf32>
    %150 = arith.subf %138, %149 : vector<16x32xf32>
    %151 = arith.mulf %148, %150 : vector<16x32xf32>
    %cst_59 = arith.constant dense<0.000000e+00> : vector<16xf32>
    %152 = vector.multi_reduction <add>, %151, %cst_59 [1] : vector<16x32xf32> to vector<16xf32>
    %153 = vector.shape_cast %152 : vector<16xf32> to vector<16x1xf32>
    %cst_60 = arith.constant 3.200000e+01 : f32
    %154 = vector.broadcast %cst_60 : f32 to vector<16x1xf32>
    %155 = arith.divf %153, %154 : vector<16x1xf32>
    %156 = vector.broadcast %146 : vector<16x1xf32> to vector<16x32xf32>
    %157 = arith.subf %138, %156 : vector<16x32xf32>
    %cst_61 = arith.constant 9.99999974E-6 : f32
    %158 = vector.broadcast %cst_61 : f32 to vector<16x1xf32>
    %159 = arith.addf %155, %158 : vector<16x1xf32>
    %160 = math.rsqrt %159 : vector<16x1xf32>
    %161 = vector.broadcast %160 : vector<16x1xf32> to vector<16x32xf32>
    %162 = arith.mulf %157, %161 : vector<16x32xf32>
    %163 = vector.broadcast %140 : vector<1x32xf32> to vector<16x32xf32>
    %164 = arith.mulf %162, %163 : vector<16x32xf32>
    %165 = vector.broadcast %142 : vector<1x32xf32> to vector<16x32xf32>
    %166 = arith.addf %164, %165 : vector<16x32xf32>
    %c0_62 = arith.constant 0 : index
    %c0_63 = arith.constant 0 : index
    %c0_64 = arith.constant 0 : index
    %167 = vector.load %arg7[%c0_62, %c0_63, %c0_64] : memref<2x32x32xf32, #tpu.memory_space<vmem>>, vector<1x32x32xf32>
    %168 = vector.shape_cast %167 : vector<1x32x32xf32> to vector<32x32xf32>
    %cst_65 = arith.constant dense<0.000000e+00> : vector<16x32xf32>
    %169 = tpu.matmul %166, %168, %cst_65 {dimension_numbers = #tpu.dot_dimension_numbers<[1], [0], [0], [1], [0, 0, 1, 1], [], []>} : vector<16x32xf32>, vector<32x32xf32>, vector<16x32xf32> -> vector<16x32xf32>
    %c0_66 = arith.constant 0 : index
    %c0_67 = arith.constant 0 : index
    %c0_68 = arith.constant 0 : index
    %170 = vector.load %arg8[%c0_66, %c0_67, %c0_68] : memref<2x1x32xf32, #tpu.memory_space<vmem>>, vector<1x1x32xf32>
    %171 = vector.shape_cast %170 : vector<1x1x32xf32> to vector<1x32xf32>
    %172 = vector.broadcast %171 : vector<1x32xf32> to vector<16x32xf32>
    %173 = arith.addf %169, %172 : vector<16x32xf32>
    %c0_69 = arith.constant 0 : index
    %c0_70 = arith.constant 0 : index
    %c0_71 = arith.constant 0 : index
    %174 = vector.load %arg9[%c0_69, %c0_70, %c0_71] : memref<2x32x64xf32, #tpu.memory_space<vmem>>, vector<1x32x64xf32>
    %175 = vector.shape_cast %174 : vector<1x32x64xf32> to vector<32x64xf32>
    %cst_72 = arith.constant dense<0.000000e+00> : vector<16x64xf32>
    %176 = tpu.matmul %7, %175, %cst_72 {dimension_numbers = #tpu.dot_dimension_numbers<[1], [0], [0], [1], [0, 0, 1, 1], [], []>} : vector<16x32xf32>, vector<32x64xf32>, vector<16x64xf32> -> vector<16x64xf32>
    %c0_73 = arith.constant 0 : index
    %c0_74 = arith.constant 0 : index
    %c0_75 = arith.constant 0 : index
    %177 = vector.load %arg10[%c0_73, %c0_74, %c0_75] : memref<2x1x64xf32, #tpu.memory_space<vmem>>, vector<1x1x64xf32>
    %178 = vector.shape_cast %177 : vector<1x1x64xf32> to vector<1x64xf32>
    %179 = vector.broadcast %178 : vector<1x64xf32> to vector<16x64xf32>
    %180 = arith.addf %176, %179 : vector<16x64xf32>
    %181 = vector.extract_strided_slice %180 {offsets = [0, 0], sizes = [16, 32], strides = [1, 1]} : vector<16x64xf32> to vector<16x32xf32>
    %182 = vector.extract_strided_slice %180 {offsets = [0, 32], sizes = [16, 32], strides = [1, 1]} : vector<16x64xf32> to vector<16x32xf32>
    %c0_76 = arith.constant 0 : index
    %c0_77 = arith.constant 0 : index
    %c0_78 = arith.constant 0 : index
    %183 = vector.load %arg11[%c0_76, %c0_77, %c0_78] : memref<2x32x32xf32, #tpu.memory_space<vmem>>, vector<1x32x32xf32>
    %184 = vector.shape_cast %183 : vector<1x32x32xf32> to vector<32x32xf32>
    %c0_79 = arith.constant 0 : index
    %c0_80 = arith.constant 0 : index
    %c0_81 = arith.constant 0 : index
    %185 = vector.load %arg12[%c0_79, %c0_80, %c0_81] : memref<2x1x32xf32, #tpu.memory_space<vmem>>, vector<1x1x32xf32>
    %186 = vector.shape_cast %185 : vector<1x1x32xf32> to vector<1x32xf32>
    %187 = vector.extract_strided_slice %173 {offsets = [0, 0], sizes = [8, 32], strides = [1, 1]} : vector<16x32xf32> to vector<8x32xf32>
    %188 = vector.extract_strided_slice %181 {offsets = [0, 0], sizes = [8, 32], strides = [1, 1]} : vector<16x32xf32> to vector<8x32xf32>
    %189 = vector.extract_strided_slice %182 {offsets = [0, 0], sizes = [8, 32], strides = [1, 1]} : vector<16x32xf32> to vector<8x32xf32>
    %190 = vector.extract_strided_slice %187 {offsets = [0, 0], sizes = [8, 8], strides = [1, 1]} : vector<8x32xf32> to vector<8x8xf32>
    %191 = vector.extract_strided_slice %188 {offsets = [0, 0], sizes = [8, 8], strides = [1, 1]} : vector<8x32xf32> to vector<8x8xf32>
    "tpu.trace_start"() <{level = 10 : i32, message = "qd,kd->qk"}> : () -> ()
    %cst_82 = arith.constant dense<0.000000e+00> : vector<8x8xf32>
    %192 = tpu.matmul %190, %191, %cst_82 {dimension_numbers = #tpu.dot_dimension_numbers<[1], [1], [0], [0], [0, 0, 1, 0], [], []>} : vector<8x8xf32>, vector<8x8xf32>, vector<8x8xf32> -> vector<8x8xf32>
    "tpu.trace_stop"() : () -> ()
    %cst_83 = arith.constant 0.353553385 : f32
    %193 = vector.broadcast %cst_83 : f32 to vector<8x8xf32>
    %194 = arith.mulf %192, %193 : vector<8x8xf32>
    %195 = math.exp %194 : vector<8x8xf32>
    %cst_84 = arith.constant dense<0.000000e+00> : vector<8xf32>
    %196 = vector.multi_reduction <add>, %195, %cst_84 [1] : vector<8x8xf32> to vector<8xf32>
    %197 = vector.shape_cast %196 : vector<8xf32> to vector<8x1xf32>
    %198 = tpu.reciprocal %197 {approx = true} : vector<8x1xf32> -> vector<8x1xf32>
    %199 = vector.broadcast %198 : vector<8x1xf32> to vector<8x8xf32>
    %200 = arith.mulf %195, %199 : vector<8x8xf32>
    %201 = vector.extract_strided_slice %189 {offsets = [0, 0], sizes = [8, 8], strides = [1, 1]} : vector<8x32xf32> to vector<8x8xf32>
    %cst_85 = arith.constant dense<0.000000e+00> : vector<8x8xf32>
    %202 = tpu.matmul %200, %201, %cst_85 {dimension_numbers = #tpu.dot_dimension_numbers<[1], [0], [0], [1], [0, 0, 1, 1], [], []>} : vector<8x8xf32>, vector<8x8xf32>, vector<8x8xf32> -> vector<8x8xf32>
    %203 = vector.extract_strided_slice %187 {offsets = [0, 8], sizes = [8, 8], strides = [1, 1]} : vector<8x32xf32> to vector<8x8xf32>
    %204 = vector.extract_strided_slice %188 {offsets = [0, 8], sizes = [8, 8], strides = [1, 1]} : vector<8x32xf32> to vector<8x8xf32>
    "tpu.trace_start"() <{level = 10 : i32, message = "qd,kd->qk"}> : () -> ()
    %cst_86 = arith.constant dense<0.000000e+00> : vector<8x8xf32>
    %205 = tpu.matmul %203, %204, %cst_86 {dimension_numbers = #tpu.dot_dimension_numbers<[1], [1], [0], [0], [0, 0, 1, 0], [], []>} : vector<8x8xf32>, vector<8x8xf32>, vector<8x8xf32> -> vector<8x8xf32>
    "tpu.trace_stop"() : () -> ()
    %cst_87 = arith.constant 0.353553385 : f32
    %206 = vector.broadcast %cst_87 : f32 to vector<8x8xf32>
    %207 = arith.mulf %205, %206 : vector<8x8xf32>
    %208 = math.exp %207 : vector<8x8xf32>
    %cst_88 = arith.constant dense<0.000000e+00> : vector<8xf32>
    %209 = vector.multi_reduction <add>, %208, %cst_88 [1] : vector<8x8xf32> to vector<8xf32>
    %210 = vector.shape_cast %209 : vector<8xf32> to vector<8x1xf32>
    %211 = tpu.reciprocal %210 {approx = true} : vector<8x1xf32> -> vector<8x1xf32>
    %212 = vector.broadcast %211 : vector<8x1xf32> to vector<8x8xf32>
    %213 = arith.mulf %208, %212 : vector<8x8xf32>
    %214 = vector.extract_strided_slice %189 {offsets = [0, 8], sizes = [8, 8], strides = [1, 1]} : vector<8x32xf32> to vector<8x8xf32>
    %cst_89 = arith.constant dense<0.000000e+00> : vector<8x8xf32>
    %215 = tpu.matmul %213, %214, %cst_89 {dimension_numbers = #tpu.dot_dimension_numbers<[1], [0], [0], [1], [0, 0, 1, 1], [], []>} : vector<8x8xf32>, vector<8x8xf32>, vector<8x8xf32> -> vector<8x8xf32>
    %216 = vector.extract_strided_slice %187 {offsets = [0, 16], sizes = [8, 8], strides = [1, 1]} : vector<8x32xf32> to vector<8x8xf32>
    %217 = vector.extract_strided_slice %188 {offsets = [0, 16], sizes = [8, 8], strides = [1, 1]} : vector<8x32xf32> to vector<8x8xf32>
    "tpu.trace_start"() <{level = 10 : i32, message = "qd,kd->qk"}> : () -> ()
    %cst_90 = arith.constant dense<0.000000e+00> : vector<8x8xf32>
    %218 = tpu.matmul %216, %217, %cst_90 {dimension_numbers = #tpu.dot_dimension_numbers<[1], [1], [0], [0], [0, 0, 1, 0], [], []>} : vector<8x8xf32>, vector<8x8xf32>, vector<8x8xf32> -> vector<8x8xf32>
    "tpu.trace_stop"() : () -> ()
    %cst_91 = arith.constant 0.353553385 : f32
    %219 = vector.broadcast %cst_91 : f32 to vector<8x8xf32>
    %220 = arith.mulf %218, %219 : vector<8x8xf32>
    %221 = math.exp %220 : vector<8x8xf32>
    %cst_92 = arith.constant dense<0.000000e+00> : vector<8xf32>
    %222 = vector.multi_reduction <add>, %221, %cst_92 [1] : vector<8x8xf32> to vector<8xf32>
    %223 = vector.shape_cast %222 : vector<8xf32> to vector<8x1xf32>
    %224 = tpu.reciprocal %223 {approx = true} : vector<8x1xf32> -> vector<8x1xf32>
    %225 = vector.broadcast %224 : vector<8x1xf32> to vector<8x8xf32>
    %226 = arith.mulf %221, %225 : vector<8x8xf32>
    %227 = vector.extract_strided_slice %189 {offsets = [0, 16], sizes = [8, 8], strides = [1, 1]} : vector<8x32xf32> to vector<8x8xf32>
    %cst_93 = arith.constant dense<0.000000e+00> : vector<8x8xf32>
    %228 = tpu.matmul %226, %227, %cst_93 {dimension_numbers = #tpu.dot_dimension_numbers<[1], [0], [0], [1], [0, 0, 1, 1], [], []>} : vector<8x8xf32>, vector<8x8xf32>, vector<8x8xf32> -> vector<8x8xf32>
    %229 = vector.extract_strided_slice %187 {offsets = [0, 24], sizes = [8, 8], strides = [1, 1]} : vector<8x32xf32> to vector<8x8xf32>
    %230 = vector.extract_strided_slice %188 {offsets = [0, 24], sizes = [8, 8], strides = [1, 1]} : vector<8x32xf32> to vector<8x8xf32>
    "tpu.trace_start"() <{level = 10 : i32, message = "qd,kd->qk"}> : () -> ()
    %cst_94 = arith.constant dense<0.000000e+00> : vector<8x8xf32>
    %231 = tpu.matmul %229, %230, %cst_94 {dimension_numbers = #tpu.dot_dimension_numbers<[1], [1], [0], [0], [0, 0, 1, 0], [], []>} : vector<8x8xf32>, vector<8x8xf32>, vector<8x8xf32> -> vector<8x8xf32>
    "tpu.trace_stop"() : () -> ()
    %cst_95 = arith.constant 0.353553385 : f32
    %232 = vector.broadcast %cst_95 : f32 to vector<8x8xf32>
    %233 = arith.mulf %231, %232 : vector<8x8xf32>
    %234 = math.exp %233 : vector<8x8xf32>
    %cst_96 = arith.constant dense<0.000000e+00> : vector<8xf32>
    %235 = vector.multi_reduction <add>, %234, %cst_96 [1] : vector<8x8xf32> to vector<8xf32>
    %236 = vector.shape_cast %235 : vector<8xf32> to vector<8x1xf32>
    %237 = tpu.reciprocal %236 {approx = true} : vector<8x1xf32> -> vector<8x1xf32>
    %238 = vector.broadcast %237 : vector<8x1xf32> to vector<8x8xf32>
    %239 = arith.mulf %234, %238 : vector<8x8xf32>
    %240 = vector.extract_strided_slice %189 {offsets = [0, 24], sizes = [8, 8], strides = [1, 1]} : vector<8x32xf32> to vector<8x8xf32>
    %cst_97 = arith.constant dense<0.000000e+00> : vector<8x8xf32>
    %241 = tpu.matmul %239, %240, %cst_97 {dimension_numbers = #tpu.dot_dimension_numbers<[1], [0], [0], [1], [0, 0, 1, 1], [], []>} : vector<8x8xf32>, vector<8x8xf32>, vector<8x8xf32> -> vector<8x8xf32>
    %242 = tpu.concatenate %202, %215, %228, %241 in 1 : vector<8x8xf32>, vector<8x8xf32>, vector<8x8xf32>, vector<8x8xf32> -> vector<8x32xf32>
    %243 = vector.extract_strided_slice %173 {offsets = [8, 0], sizes = [8, 32], strides = [1, 1]} : vector<16x32xf32> to vector<8x32xf32>
    %244 = vector.extract_strided_slice %181 {offsets = [8, 0], sizes = [8, 32], strides = [1, 1]} : vector<16x32xf32> to vector<8x32xf32>
    %245 = vector.extract_strided_slice %182 {offsets = [8, 0], sizes = [8, 32], strides = [1, 1]} : vector<16x32xf32> to vector<8x32xf32>
    %246 = vector.extract_strided_slice %243 {offsets = [0, 0], sizes = [8, 8], strides = [1, 1]} : vector<8x32xf32> to vector<8x8xf32>
    %247 = vector.extract_strided_slice %244 {offsets = [0, 0], sizes = [8, 8], strides = [1, 1]} : vector<8x32xf32> to vector<8x8xf32>
    "tpu.trace_start"() <{level = 10 : i32, message = "qd,kd->qk"}> : () -> ()
    %cst_98 = arith.constant dense<0.000000e+00> : vector<8x8xf32>
    %248 = tpu.matmul %246, %247, %cst_98 {dimension_numbers = #tpu.dot_dimension_numbers<[1], [1], [0], [0], [0, 0, 1, 0], [], []>} : vector<8x8xf32>, vector<8x8xf32>, vector<8x8xf32> -> vector<8x8xf32>
    "tpu.trace_stop"() : () -> ()
    %cst_99 = arith.constant 0.353553385 : f32
    %249 = vector.broadcast %cst_99 : f32 to vector<8x8xf32>
    %250 = arith.mulf %248, %249 : vector<8x8xf32>
    %251 = math.exp %250 : vector<8x8xf32>
    %cst_100 = arith.constant dense<0.000000e+00> : vector<8xf32>
    %252 = vector.multi_reduction <add>, %251, %cst_100 [1] : vector<8x8xf32> to vector<8xf32>
    %253 = vector.shape_cast %252 : vector<8xf32> to vector<8x1xf32>
    %254 = tpu.reciprocal %253 {approx = true} : vector<8x1xf32> -> vector<8x1xf32>
    %255 = vector.broadcast %254 : vector<8x1xf32> to vector<8x8xf32>
    %256 = arith.mulf %251, %255 : vector<8x8xf32>
    %257 = vector.extract_strided_slice %245 {offsets = [0, 0], sizes = [8, 8], strides = [1, 1]} : vector<8x32xf32> to vector<8x8xf32>
    %cst_101 = arith.constant dense<0.000000e+00> : vector<8x8xf32>
    %258 = tpu.matmul %256, %257, %cst_101 {dimension_numbers = #tpu.dot_dimension_numbers<[1], [0], [0], [1], [0, 0, 1, 1], [], []>} : vector<8x8xf32>, vector<8x8xf32>, vector<8x8xf32> -> vector<8x8xf32>
    %259 = vector.extract_strided_slice %243 {offsets = [0, 8], sizes = [8, 8], strides = [1, 1]} : vector<8x32xf32> to vector<8x8xf32>
    %260 = vector.extract_strided_slice %244 {offsets = [0, 8], sizes = [8, 8], strides = [1, 1]} : vector<8x32xf32> to vector<8x8xf32>
    "tpu.trace_start"() <{level = 10 : i32, message = "qd,kd->qk"}> : () -> ()
    %cst_102 = arith.constant dense<0.000000e+00> : vector<8x8xf32>
    %261 = tpu.matmul %259, %260, %cst_102 {dimension_numbers = #tpu.dot_dimension_numbers<[1], [1], [0], [0], [0, 0, 1, 0], [], []>} : vector<8x8xf32>, vector<8x8xf32>, vector<8x8xf32> -> vector<8x8xf32>
    "tpu.trace_stop"() : () -> ()
    %cst_103 = arith.constant 0.353553385 : f32
    %262 = vector.broadcast %cst_103 : f32 to vector<8x8xf32>
    %263 = arith.mulf %261, %262 : vector<8x8xf32>
    %264 = math.exp %263 : vector<8x8xf32>
    %cst_104 = arith.constant dense<0.000000e+00> : vector<8xf32>
    %265 = vector.multi_reduction <add>, %264, %cst_104 [1] : vector<8x8xf32> to vector<8xf32>
    %266 = vector.shape_cast %265 : vector<8xf32> to vector<8x1xf32>
    %267 = tpu.reciprocal %266 {approx = true} : vector<8x1xf32> -> vector<8x1xf32>
    %268 = vector.broadcast %267 : vector<8x1xf32> to vector<8x8xf32>
    %269 = arith.mulf %264, %268 : vector<8x8xf32>
    %270 = vector.extract_strided_slice %245 {offsets = [0, 8], sizes = [8, 8], strides = [1, 1]} : vector<8x32xf32> to vector<8x8xf32>
    %cst_105 = arith.constant dense<0.000000e+00> : vector<8x8xf32>
    %271 = tpu.matmul %269, %270, %cst_105 {dimension_numbers = #tpu.dot_dimension_numbers<[1], [0], [0], [1], [0, 0, 1, 1], [], []>} : vector<8x8xf32>, vector<8x8xf32>, vector<8x8xf32> -> vector<8x8xf32>
    %272 = vector.extract_strided_slice %243 {offsets = [0, 16], sizes = [8, 8], strides = [1, 1]} : vector<8x32xf32> to vector<8x8xf32>
    %273 = vector.extract_strided_slice %244 {offsets = [0, 16], sizes = [8, 8], strides = [1, 1]} : vector<8x32xf32> to vector<8x8xf32>
    "tpu.trace_start"() <{level = 10 : i32, message = "qd,kd->qk"}> : () -> ()
    %cst_106 = arith.constant dense<0.000000e+00> : vector<8x8xf32>
    %274 = tpu.matmul %272, %273, %cst_106 {dimension_numbers = #tpu.dot_dimension_numbers<[1], [1], [0], [0], [0, 0, 1, 0], [], []>} : vector<8x8xf32>, vector<8x8xf32>, vector<8x8xf32> -> vector<8x8xf32>
    "tpu.trace_stop"() : () -> ()
    %cst_107 = arith.constant 0.353553385 : f32
    %275 = vector.broadcast %cst_107 : f32 to vector<8x8xf32>
    %276 = arith.mulf %274, %275 : vector<8x8xf32>
    %277 = math.exp %276 : vector<8x8xf32>
    %cst_108 = arith.constant dense<0.000000e+00> : vector<8xf32>
    %278 = vector.multi_reduction <add>, %277, %cst_108 [1] : vector<8x8xf32> to vector<8xf32>
    %279 = vector.shape_cast %278 : vector<8xf32> to vector<8x1xf32>
    %280 = tpu.reciprocal %279 {approx = true} : vector<8x1xf32> -> vector<8x1xf32>
    %281 = vector.broadcast %280 : vector<8x1xf32> to vector<8x8xf32>
    %282 = arith.mulf %277, %281 : vector<8x8xf32>
    %283 = vector.extract_strided_slice %245 {offsets = [0, 16], sizes = [8, 8], strides = [1, 1]} : vector<8x32xf32> to vector<8x8xf32>
    %cst_109 = arith.constant dense<0.000000e+00> : vector<8x8xf32>
    %284 = tpu.matmul %282, %283, %cst_109 {dimension_numbers = #tpu.dot_dimension_numbers<[1], [0], [0], [1], [0, 0, 1, 1], [], []>} : vector<8x8xf32>, vector<8x8xf32>, vector<8x8xf32> -> vector<8x8xf32>
    %285 = vector.extract_strided_slice %243 {offsets = [0, 24], sizes = [8, 8], strides = [1, 1]} : vector<8x32xf32> to vector<8x8xf32>
    %286 = vector.extract_strided_slice %244 {offsets = [0, 24], sizes = [8, 8], strides = [1, 1]} : vector<8x32xf32> to vector<8x8xf32>
    "tpu.trace_start"() <{level = 10 : i32, message = "qd,kd->qk"}> : () -> ()
    %cst_110 = arith.constant dense<0.000000e+00> : vector<8x8xf32>
    %287 = tpu.matmul %285, %286, %cst_110 {dimension_numbers = #tpu.dot_dimension_numbers<[1], [1], [0], [0], [0, 0, 1, 0], [], []>} : vector<8x8xf32>, vector<8x8xf32>, vector<8x8xf32> -> vector<8x8xf32>
    "tpu.trace_stop"() : () -> ()
    %cst_111 = arith.constant 0.353553385 : f32
    %288 = vector.broadcast %cst_111 : f32 to vector<8x8xf32>
    %289 = arith.mulf %287, %288 : vector<8x8xf32>
    %290 = math.exp %289 : vector<8x8xf32>
    %cst_112 = arith.constant dense<0.000000e+00> : vector<8xf32>
    %291 = vector.multi_reduction <add>, %290, %cst_112 [1] : vector<8x8xf32> to vector<8xf32>
    %292 = vector.shape_cast %291 : vector<8xf32> to vector<8x1xf32>
    %293 = tpu.reciprocal %292 {approx = true} : vector<8x1xf32> -> vector<8x1xf32>
    %294 = vector.broadcast %293 : vector<8x1xf32> to vector<8x8xf32>
    %295 = arith.mulf %290, %294 : vector<8x8xf32>
    %296 = vector.extract_strided_slice %245 {offsets = [0, 24], sizes = [8, 8], strides = [1, 1]} : vector<8x32xf32> to vector<8x8xf32>
    %cst_113 = arith.constant dense<0.000000e+00> : vector<8x8xf32>
    %297 = tpu.matmul %295, %296, %cst_113 {dimension_numbers = #tpu.dot_dimension_numbers<[1], [0], [0], [1], [0, 0, 1, 1], [], []>} : vector<8x8xf32>, vector<8x8xf32>, vector<8x8xf32> -> vector<8x8xf32>
    %298 = tpu.concatenate %258, %271, %284, %297 in 1 : vector<8x8xf32>, vector<8x8xf32>, vector<8x8xf32>, vector<8x8xf32> -> vector<8x32xf32>
    %299 = tpu.concatenate %242, %298 in 0 : vector<8x32xf32>, vector<8x32xf32> -> vector<16x32xf32>
    %cst_114 = arith.constant dense<0.000000e+00> : vector<16x32xf32>
    %300 = tpu.matmul %299, %184, %cst_114 {dimension_numbers = #tpu.dot_dimension_numbers<[1], [0], [0], [1], [0, 0, 1, 1], [], []>} : vector<16x32xf32>, vector<32x32xf32>, vector<16x32xf32> -> vector<16x32xf32>
    %301 = vector.broadcast %186 : vector<1x32xf32> to vector<16x32xf32>
    %302 = arith.addf %300, %301 : vector<16x32xf32>
    %303 = arith.addf %166, %302 : vector<16x32xf32>
    %c0_115 = arith.constant 0 : index
    %c0_116 = arith.constant 0 : index
    %c0_117 = arith.constant 0 : index
    %304 = vector.load %arg15[%c0_115, %c0_116, %c0_117] : memref<2x1x32xf32, #tpu.memory_space<vmem>>, vector<1x1x32xf32>
    %305 = vector.shape_cast %304 : vector<1x1x32xf32> to vector<1x32xf32>
    %c0_118 = arith.constant 0 : index
    %c0_119 = arith.constant 0 : index
    %c0_120 = arith.constant 0 : index
    %306 = vector.load %arg16[%c0_118, %c0_119, %c0_120] : memref<2x1x32xf32, #tpu.memory_space<vmem>>, vector<1x1x32xf32>
    %307 = vector.shape_cast %306 : vector<1x1x32xf32> to vector<1x32xf32>
    %cst_121 = arith.constant dense<0.000000e+00> : vector<16xf32>
    %308 = vector.multi_reduction <add>, %303, %cst_121 [1] : vector<16x32xf32> to vector<16xf32>
    %309 = vector.shape_cast %308 : vector<16xf32> to vector<16x1xf32>
    %cst_122 = arith.constant 3.200000e+01 : f32
    %310 = vector.broadcast %cst_122 : f32 to vector<16x1xf32>
    %311 = arith.divf %309, %310 : vector<16x1xf32>
    %312 = vector.broadcast %311 : vector<16x1xf32> to vector<16x32xf32>
    %313 = arith.subf %303, %312 : vector<16x32xf32>
    %314 = vector.broadcast %311 : vector<16x1xf32> to vector<16x32xf32>
    %315 = arith.subf %303, %314 : vector<16x32xf32>
    %316 = arith.mulf %313, %315 : vector<16x32xf32>
    %cst_123 = arith.constant dense<0.000000e+00> : vector<16xf32>
    %317 = vector.multi_reduction <add>, %316, %cst_123 [1] : vector<16x32xf32> to vector<16xf32>
    %318 = vector.shape_cast %317 : vector<16xf32> to vector<16x1xf32>
    %cst_124 = arith.constant 3.200000e+01 : f32
    %319 = vector.broadcast %cst_124 : f32 to vector<16x1xf32>
    %320 = arith.divf %318, %319 : vector<16x1xf32>
    %321 = vector.broadcast %311 : vector<16x1xf32> to vector<16x32xf32>
    %322 = arith.subf %303, %321 : vector<16x32xf32>
    %cst_125 = arith.constant 9.99999974E-6 : f32
    %323 = vector.broadcast %cst_125 : f32 to vector<16x1xf32>
    %324 = arith.addf %320, %323 : vector<16x1xf32>
    %325 = math.rsqrt %324 : vector<16x1xf32>
    %326 = vector.broadcast %325 : vector<16x1xf32> to vector<16x32xf32>
    %327 = arith.mulf %322, %326 : vector<16x32xf32>
    %328 = vector.broadcast %305 : vector<1x32xf32> to vector<16x32xf32>
    %329 = arith.mulf %327, %328 : vector<16x32xf32>
    %330 = vector.broadcast %307 : vector<1x32xf32> to vector<16x32xf32>
    %331 = arith.addf %329, %330 : vector<16x32xf32>
    %c0_126 = arith.constant 0 : index
    %c0_127 = arith.constant 0 : index
    %c0_128 = arith.constant 0 : index
    %332 = vector.load %arg19[%c0_126, %c0_127, %c0_128] : memref<2x32x64xf32, #tpu.memory_space<vmem>>, vector<1x32x64xf32>
    %333 = vector.shape_cast %332 : vector<1x32x64xf32> to vector<32x64xf32>
    %cst_129 = arith.constant dense<0.000000e+00> : vector<16x64xf32>
    %334 = tpu.matmul %331, %333, %cst_129 {dimension_numbers = #tpu.dot_dimension_numbers<[1], [0], [0], [1], [0, 0, 1, 1], [], []>} : vector<16x32xf32>, vector<32x64xf32>, vector<16x64xf32> -> vector<16x64xf32>
    %c0_130 = arith.constant 0 : index
    %c0_131 = arith.constant 0 : index
    %c0_132 = arith.constant 0 : index
    %335 = vector.load %arg20[%c0_130, %c0_131, %c0_132] : memref<2x1x64xf32, #tpu.memory_space<vmem>>, vector<1x1x64xf32>
    %336 = vector.shape_cast %335 : vector<1x1x64xf32> to vector<1x64xf32>
    %337 = vector.broadcast %336 : vector<1x64xf32> to vector<16x64xf32>
    %338 = arith.addf %334, %337 : vector<16x64xf32>
    %cst_133 = arith.constant 0.000000e+00 : f32
    %339 = vector.broadcast %cst_133 : f32 to vector<16x64xf32>
    %340 = arith.maximumf %338, %339 : vector<16x64xf32>
    %c0_134 = arith.constant 0 : index
    %c0_135 = arith.constant 0 : index
    %c0_136 = arith.constant 0 : index
    %341 = vector.load %arg21[%c0_134, %c0_135, %c0_136] : memref<2x64x32xf32, #tpu.memory_space<vmem>>, vector<1x64x32xf32>
    %342 = vector.shape_cast %341 : vector<1x64x32xf32> to vector<64x32xf32>
    %cst_137 = arith.constant dense<0.000000e+00> : vector<16x32xf32>
    %343 = tpu.matmul %340, %342, %cst_137 {dimension_numbers = #tpu.dot_dimension_numbers<[1], [0], [0], [1], [0, 0, 1, 1], [], []>} : vector<16x64xf32>, vector<64x32xf32>, vector<16x32xf32> -> vector<16x32xf32>
    %c0_138 = arith.constant 0 : index
    %c0_139 = arith.constant 0 : index
    %c0_140 = arith.constant 0 : index
    %344 = vector.load %arg22[%c0_138, %c0_139, %c0_140] : memref<2x1x32xf32, #tpu.memory_space<vmem>>, vector<1x1x32xf32>
    %345 = vector.shape_cast %344 : vector<1x1x32xf32> to vector<1x32xf32>
    %346 = vector.broadcast %345 : vector<1x32xf32> to vector<16x32xf32>
    %347 = arith.addf %343, %346 : vector<16x32xf32>
    %348 = arith.addf %331, %347 : vector<16x32xf32>
    %c0_141 = arith.constant 0 : index
    %c0_142 = arith.constant 0 : index
    %c0_143 = arith.constant 0 : index
    %349 = vector.load %arg17[%c0_141, %c0_142, %c0_143] : memref<2x1x32xf32, #tpu.memory_space<vmem>>, vector<1x1x32xf32>
    %350 = vector.shape_cast %349 : vector<1x1x32xf32> to vector<1x32xf32>
    %c0_144 = arith.constant 0 : index
    %c0_145 = arith.constant 0 : index
    %c0_146 = arith.constant 0 : index
    %351 = vector.load %arg18[%c0_144, %c0_145, %c0_146] : memref<2x1x32xf32, #tpu.memory_space<vmem>>, vector<1x1x32xf32>
    %352 = vector.shape_cast %351 : vector<1x1x32xf32> to vector<1x32xf32>
    %cst_147 = arith.constant dense<0.000000e+00> : vector<16xf32>
    %353 = vector.multi_reduction <add>, %348, %cst_147 [1] : vector<16x32xf32> to vector<16xf32>
    %354 = vector.shape_cast %353 : vector<16xf32> to vector<16x1xf32>
    %cst_148 = arith.constant 3.200000e+01 : f32
    %355 = vector.broadcast %cst_148 : f32 to vector<16x1xf32>
    %356 = arith.divf %354, %355 : vector<16x1xf32>
    %357 = vector.broadcast %356 : vector<16x1xf32> to vector<16x32xf32>
    %358 = arith.subf %348, %357 : vector<16x32xf32>
    %359 = vector.broadcast %356 : vector<16x1xf32> to vector<16x32xf32>
    %360 = arith.subf %348, %359 : vector<16x32xf32>
    %361 = arith.mulf %358, %360 : vector<16x32xf32>
    %cst_149 = arith.constant dense<0.000000e+00> : vector<16xf32>
    %362 = vector.multi_reduction <add>, %361, %cst_149 [1] : vector<16x32xf32> to vector<16xf32>
    %363 = vector.shape_cast %362 : vector<16xf32> to vector<16x1xf32>
    %cst_150 = arith.constant 3.200000e+01 : f32
    %364 = vector.broadcast %cst_150 : f32 to vector<16x1xf32>
    %365 = arith.divf %363, %364 : vector<16x1xf32>
    %366 = vector.broadcast %356 : vector<16x1xf32> to vector<16x32xf32>
    %367 = arith.subf %348, %366 : vector<16x32xf32>
    %cst_151 = arith.constant 9.99999974E-6 : f32
    %368 = vector.broadcast %cst_151 : f32 to vector<16x1xf32>
    %369 = arith.addf %365, %368 : vector<16x1xf32>
    %370 = math.rsqrt %369 : vector<16x1xf32>
    %371 = vector.broadcast %370 : vector<16x1xf32> to vector<16x32xf32>
    %372 = arith.mulf %367, %371 : vector<16x32xf32>
    %373 = vector.broadcast %350 : vector<1x32xf32> to vector<16x32xf32>
    %374 = arith.mulf %372, %373 : vector<16x32xf32>
    %375 = vector.broadcast %352 : vector<1x32xf32> to vector<16x32xf32>
    %376 = arith.addf %374, %375 : vector<16x32xf32>
    %c1 = arith.constant 1 : index
    %c0_152 = arith.constant 0 : index
    %c0_153 = arith.constant 0 : index
    %377 = vector.load %arg3[%c1, %c0_152, %c0_153] : memref<2x32x96xf32, #tpu.memory_space<vmem>>, vector<1x32x96xf32>
    %378 = vector.shape_cast %377 : vector<1x32x96xf32> to vector<32x96xf32>
    %cst_154 = arith.constant dense<0.000000e+00> : vector<16x96xf32>
    %379 = tpu.matmul %376, %378, %cst_154 {dimension_numbers = #tpu.dot_dimension_numbers<[1], [0], [0], [1], [0, 0, 1, 1], [], []>} : vector<16x32xf32>, vector<32x96xf32>, vector<16x96xf32> -> vector<16x96xf32>
    %c1_155 = arith.constant 1 : index
    %c0_156 = arith.constant 0 : index
    %c0_157 = arith.constant 0 : index
    %380 = vector.load %arg4[%c1_155, %c0_156, %c0_157] : memref<2x1x96xf32, #tpu.memory_space<vmem>>, vector<1x1x96xf32>
    %381 = vector.shape_cast %380 : vector<1x1x96xf32> to vector<1x96xf32>
    %382 = vector.broadcast %381 : vector<1x96xf32> to vector<16x96xf32>
    %383 = arith.addf %379, %382 : vector<16x96xf32>
    %384 = vector.extract_strided_slice %383 {offsets = [0, 0], sizes = [16, 32], strides = [1, 1]} : vector<16x96xf32> to vector<16x32xf32>
    %385 = vector.extract_strided_slice %383 {offsets = [0, 32], sizes = [16, 32], strides = [1, 1]} : vector<16x96xf32> to vector<16x32xf32>
    %386 = vector.extract_strided_slice %383 {offsets = [0, 64], sizes = [16, 32], strides = [1, 1]} : vector<16x96xf32> to vector<16x32xf32>
    %c1_158 = arith.constant 1 : index
    %c0_159 = arith.constant 0 : index
    %c0_160 = arith.constant 0 : index
    %387 = vector.load %arg5[%c1_158, %c0_159, %c0_160] : memref<2x32x32xf32, #tpu.memory_space<vmem>>, vector<1x32x32xf32>
    %388 = vector.shape_cast %387 : vector<1x32x32xf32> to vector<32x32xf32>
    %c1_161 = arith.constant 1 : index
    %c0_162 = arith.constant 0 : index
    %c0_163 = arith.constant 0 : index
    %389 = vector.load %arg6[%c1_161, %c0_162, %c0_163] : memref<2x1x32xf32, #tpu.memory_space<vmem>>, vector<1x1x32xf32>
    %390 = vector.shape_cast %389 : vector<1x1x32xf32> to vector<1x32xf32>
    %391 = vector.extract_strided_slice %384 {offsets = [0, 0], sizes = [8, 32], strides = [1, 1]} : vector<16x32xf32> to vector<8x32xf32>
    %392 = vector.extract_strided_slice %385 {offsets = [0, 0], sizes = [8, 32], strides = [1, 1]} : vector<16x32xf32> to vector<8x32xf32>
    %393 = vector.extract_strided_slice %386 {offsets = [0, 0], sizes = [8, 32], strides = [1, 1]} : vector<16x32xf32> to vector<8x32xf32>
    %394 = vector.extract_strided_slice %391 {offsets = [0, 0], sizes = [8, 8], strides = [1, 1]} : vector<8x32xf32> to vector<8x8xf32>
    %395 = vector.extract_strided_slice %392 {offsets = [0, 0], sizes = [8, 8], strides = [1, 1]} : vector<8x32xf32> to vector<8x8xf32>
    "tpu.trace_start"() <{level = 10 : i32, message = "qd,kd->qk"}> : () -> ()
    %cst_164 = arith.constant dense<0.000000e+00> : vector<8x8xf32>
    %396 = tpu.matmul %394, %395, %cst_164 {dimension_numbers = #tpu.dot_dimension_numbers<[1], [1], [0], [0], [0, 0, 1, 0], [], []>} : vector<8x8xf32>, vector<8x8xf32>, vector<8x8xf32> -> vector<8x8xf32>
    "tpu.trace_stop"() : () -> ()
    %cst_165 = arith.constant 0.353553385 : f32
    %397 = vector.broadcast %cst_165 : f32 to vector<8x8xf32>
    %398 = arith.mulf %396, %397 : vector<8x8xf32>
    %399 = math.exp %398 : vector<8x8xf32>
    %cst_166 = arith.constant dense<0.000000e+00> : vector<8xf32>
    %400 = vector.multi_reduction <add>, %399, %cst_166 [1] : vector<8x8xf32> to vector<8xf32>
    %401 = vector.shape_cast %400 : vector<8xf32> to vector<8x1xf32>
    %402 = tpu.reciprocal %401 {approx = true} : vector<8x1xf32> -> vector<8x1xf32>
    %403 = vector.broadcast %402 : vector<8x1xf32> to vector<8x8xf32>
    %404 = arith.mulf %399, %403 : vector<8x8xf32>
    %405 = vector.extract_strided_slice %393 {offsets = [0, 0], sizes = [8, 8], strides = [1, 1]} : vector<8x32xf32> to vector<8x8xf32>
    %cst_167 = arith.constant dense<0.000000e+00> : vector<8x8xf32>
    %406 = tpu.matmul %404, %405, %cst_167 {dimension_numbers = #tpu.dot_dimension_numbers<[1], [0], [0], [1], [0, 0, 1, 1], [], []>} : vector<8x8xf32>, vector<8x8xf32>, vector<8x8xf32> -> vector<8x8xf32>
    %407 = vector.extract_strided_slice %391 {offsets = [0, 8], sizes = [8, 8], strides = [1, 1]} : vector<8x32xf32> to vector<8x8xf32>
    %408 = vector.extract_strided_slice %392 {offsets = [0, 8], sizes = [8, 8], strides = [1, 1]} : vector<8x32xf32> to vector<8x8xf32>
    "tpu.trace_start"() <{level = 10 : i32, message = "qd,kd->qk"}> : () -> ()
    %cst_168 = arith.constant dense<0.000000e+00> : vector<8x8xf32>
    %409 = tpu.matmul %407, %408, %cst_168 {dimension_numbers = #tpu.dot_dimension_numbers<[1], [1], [0], [0], [0, 0, 1, 0], [], []>} : vector<8x8xf32>, vector<8x8xf32>, vector<8x8xf32> -> vector<8x8xf32>
    "tpu.trace_stop"() : () -> ()
    %cst_169 = arith.constant 0.353553385 : f32
    %410 = vector.broadcast %cst_169 : f32 to vector<8x8xf32>
    %411 = arith.mulf %409, %410 : vector<8x8xf32>
    %412 = math.exp %411 : vector<8x8xf32>
    %cst_170 = arith.constant dense<0.000000e+00> : vector<8xf32>
    %413 = vector.multi_reduction <add>, %412, %cst_170 [1] : vector<8x8xf32> to vector<8xf32>
    %414 = vector.shape_cast %413 : vector<8xf32> to vector<8x1xf32>
    %415 = tpu.reciprocal %414 {approx = true} : vector<8x1xf32> -> vector<8x1xf32>
    %416 = vector.broadcast %415 : vector<8x1xf32> to vector<8x8xf32>
    %417 = arith.mulf %412, %416 : vector<8x8xf32>
    %418 = vector.extract_strided_slice %393 {offsets = [0, 8], sizes = [8, 8], strides = [1, 1]} : vector<8x32xf32> to vector<8x8xf32>
    %cst_171 = arith.constant dense<0.000000e+00> : vector<8x8xf32>
    %419 = tpu.matmul %417, %418, %cst_171 {dimension_numbers = #tpu.dot_dimension_numbers<[1], [0], [0], [1], [0, 0, 1, 1], [], []>} : vector<8x8xf32>, vector<8x8xf32>, vector<8x8xf32> -> vector<8x8xf32>
    %420 = vector.extract_strided_slice %391 {offsets = [0, 16], sizes = [8, 8], strides = [1, 1]} : vector<8x32xf32> to vector<8x8xf32>
    %421 = vector.extract_strided_slice %392 {offsets = [0, 16], sizes = [8, 8], strides = [1, 1]} : vector<8x32xf32> to vector<8x8xf32>
    "tpu.trace_start"() <{level = 10 : i32, message = "qd,kd->qk"}> : () -> ()
    %cst_172 = arith.constant dense<0.000000e+00> : vector<8x8xf32>
    %422 = tpu.matmul %420, %421, %cst_172 {dimension_numbers = #tpu.dot_dimension_numbers<[1], [1], [0], [0], [0, 0, 1, 0], [], []>} : vector<8x8xf32>, vector<8x8xf32>, vector<8x8xf32> -> vector<8x8xf32>
    "tpu.trace_stop"() : () -> ()
    %cst_173 = arith.constant 0.353553385 : f32
    %423 = vector.broadcast %cst_173 : f32 to vector<8x8xf32>
    %424 = arith.mulf %422, %423 : vector<8x8xf32>
    %425 = math.exp %424 : vector<8x8xf32>
    %cst_174 = arith.constant dense<0.000000e+00> : vector<8xf32>
    %426 = vector.multi_reduction <add>, %425, %cst_174 [1] : vector<8x8xf32> to vector<8xf32>
    %427 = vector.shape_cast %426 : vector<8xf32> to vector<8x1xf32>
    %428 = tpu.reciprocal %427 {approx = true} : vector<8x1xf32> -> vector<8x1xf32>
    %429 = vector.broadcast %428 : vector<8x1xf32> to vector<8x8xf32>
    %430 = arith.mulf %425, %429 : vector<8x8xf32>
    %431 = vector.extract_strided_slice %393 {offsets = [0, 16], sizes = [8, 8], strides = [1, 1]} : vector<8x32xf32> to vector<8x8xf32>
    %cst_175 = arith.constant dense<0.000000e+00> : vector<8x8xf32>
    %432 = tpu.matmul %430, %431, %cst_175 {dimension_numbers = #tpu.dot_dimension_numbers<[1], [0], [0], [1], [0, 0, 1, 1], [], []>} : vector<8x8xf32>, vector<8x8xf32>, vector<8x8xf32> -> vector<8x8xf32>
    %433 = vector.extract_strided_slice %391 {offsets = [0, 24], sizes = [8, 8], strides = [1, 1]} : vector<8x32xf32> to vector<8x8xf32>
    %434 = vector.extract_strided_slice %392 {offsets = [0, 24], sizes = [8, 8], strides = [1, 1]} : vector<8x32xf32> to vector<8x8xf32>
    "tpu.trace_start"() <{level = 10 : i32, message = "qd,kd->qk"}> : () -> ()
    %cst_176 = arith.constant dense<0.000000e+00> : vector<8x8xf32>
    %435 = tpu.matmul %433, %434, %cst_176 {dimension_numbers = #tpu.dot_dimension_numbers<[1], [1], [0], [0], [0, 0, 1, 0], [], []>} : vector<8x8xf32>, vector<8x8xf32>, vector<8x8xf32> -> vector<8x8xf32>
    "tpu.trace_stop"() : () -> ()
    %cst_177 = arith.constant 0.353553385 : f32
    %436 = vector.broadcast %cst_177 : f32 to vector<8x8xf32>
    %437 = arith.mulf %435, %436 : vector<8x8xf32>
    %438 = math.exp %437 : vector<8x8xf32>
    %cst_178 = arith.constant dense<0.000000e+00> : vector<8xf32>
    %439 = vector.multi_reduction <add>, %438, %cst_178 [1] : vector<8x8xf32> to vector<8xf32>
    %440 = vector.shape_cast %439 : vector<8xf32> to vector<8x1xf32>
    %441 = tpu.reciprocal %440 {approx = true} : vector<8x1xf32> -> vector<8x1xf32>
    %442 = vector.broadcast %441 : vector<8x1xf32> to vector<8x8xf32>
    %443 = arith.mulf %438, %442 : vector<8x8xf32>
    %444 = vector.extract_strided_slice %393 {offsets = [0, 24], sizes = [8, 8], strides = [1, 1]} : vector<8x32xf32> to vector<8x8xf32>
    %cst_179 = arith.constant dense<0.000000e+00> : vector<8x8xf32>
    %445 = tpu.matmul %443, %444, %cst_179 {dimension_numbers = #tpu.dot_dimension_numbers<[1], [0], [0], [1], [0, 0, 1, 1], [], []>} : vector<8x8xf32>, vector<8x8xf32>, vector<8x8xf32> -> vector<8x8xf32>
    %446 = tpu.concatenate %406, %419, %432, %445 in 1 : vector<8x8xf32>, vector<8x8xf32>, vector<8x8xf32>, vector<8x8xf32> -> vector<8x32xf32>
    %447 = vector.extract_strided_slice %384 {offsets = [8, 0], sizes = [8, 32], strides = [1, 1]} : vector<16x32xf32> to vector<8x32xf32>
    %448 = vector.extract_strided_slice %385 {offsets = [8, 0], sizes = [8, 32], strides = [1, 1]} : vector<16x32xf32> to vector<8x32xf32>
    %449 = vector.extract_strided_slice %386 {offsets = [8, 0], sizes = [8, 32], strides = [1, 1]} : vector<16x32xf32> to vector<8x32xf32>
    %450 = vector.extract_strided_slice %447 {offsets = [0, 0], sizes = [8, 8], strides = [1, 1]} : vector<8x32xf32> to vector<8x8xf32>
    %451 = vector.extract_strided_slice %448 {offsets = [0, 0], sizes = [8, 8], strides = [1, 1]} : vector<8x32xf32> to vector<8x8xf32>
    "tpu.trace_start"() <{level = 10 : i32, message = "qd,kd->qk"}> : () -> ()
    %cst_180 = arith.constant dense<0.000000e+00> : vector<8x8xf32>
    %452 = tpu.matmul %450, %451, %cst_180 {dimension_numbers = #tpu.dot_dimension_numbers<[1], [1], [0], [0], [0, 0, 1, 0], [], []>} : vector<8x8xf32>, vector<8x8xf32>, vector<8x8xf32> -> vector<8x8xf32>
    "tpu.trace_stop"() : () -> ()
    %cst_181 = arith.constant 0.353553385 : f32
    %453 = vector.broadcast %cst_181 : f32 to vector<8x8xf32>
    %454 = arith.mulf %452, %453 : vector<8x8xf32>
    %455 = math.exp %454 : vector<8x8xf32>
    %cst_182 = arith.constant dense<0.000000e+00> : vector<8xf32>
    %456 = vector.multi_reduction <add>, %455, %cst_182 [1] : vector<8x8xf32> to vector<8xf32>
    %457 = vector.shape_cast %456 : vector<8xf32> to vector<8x1xf32>
    %458 = tpu.reciprocal %457 {approx = true} : vector<8x1xf32> -> vector<8x1xf32>
    %459 = vector.broadcast %458 : vector<8x1xf32> to vector<8x8xf32>
    %460 = arith.mulf %455, %459 : vector<8x8xf32>
    %461 = vector.extract_strided_slice %449 {offsets = [0, 0], sizes = [8, 8], strides = [1, 1]} : vector<8x32xf32> to vector<8x8xf32>
    %cst_183 = arith.constant dense<0.000000e+00> : vector<8x8xf32>
    %462 = tpu.matmul %460, %461, %cst_183 {dimension_numbers = #tpu.dot_dimension_numbers<[1], [0], [0], [1], [0, 0, 1, 1], [], []>} : vector<8x8xf32>, vector<8x8xf32>, vector<8x8xf32> -> vector<8x8xf32>
    %463 = vector.extract_strided_slice %447 {offsets = [0, 8], sizes = [8, 8], strides = [1, 1]} : vector<8x32xf32> to vector<8x8xf32>
    %464 = vector.extract_strided_slice %448 {offsets = [0, 8], sizes = [8, 8], strides = [1, 1]} : vector<8x32xf32> to vector<8x8xf32>
    "tpu.trace_start"() <{level = 10 : i32, message = "qd,kd->qk"}> : () -> ()
    %cst_184 = arith.constant dense<0.000000e+00> : vector<8x8xf32>
    %465 = tpu.matmul %463, %464, %cst_184 {dimension_numbers = #tpu.dot_dimension_numbers<[1], [1], [0], [0], [0, 0, 1, 0], [], []>} : vector<8x8xf32>, vector<8x8xf32>, vector<8x8xf32> -> vector<8x8xf32>
    "tpu.trace_stop"() : () -> ()
    %cst_185 = arith.constant 0.353553385 : f32
    %466 = vector.broadcast %cst_185 : f32 to vector<8x8xf32>
    %467 = arith.mulf %465, %466 : vector<8x8xf32>
    %468 = math.exp %467 : vector<8x8xf32>
    %cst_186 = arith.constant dense<0.000000e+00> : vector<8xf32>
    %469 = vector.multi_reduction <add>, %468, %cst_186 [1] : vector<8x8xf32> to vector<8xf32>
    %470 = vector.shape_cast %469 : vector<8xf32> to vector<8x1xf32>
    %471 = tpu.reciprocal %470 {approx = true} : vector<8x1xf32> -> vector<8x1xf32>
    %472 = vector.broadcast %471 : vector<8x1xf32> to vector<8x8xf32>
    %473 = arith.mulf %468, %472 : vector<8x8xf32>
    %474 = vector.extract_strided_slice %449 {offsets = [0, 8], sizes = [8, 8], strides = [1, 1]} : vector<8x32xf32> to vector<8x8xf32>
    %cst_187 = arith.constant dense<0.000000e+00> : vector<8x8xf32>
    %475 = tpu.matmul %473, %474, %cst_187 {dimension_numbers = #tpu.dot_dimension_numbers<[1], [0], [0], [1], [0, 0, 1, 1], [], []>} : vector<8x8xf32>, vector<8x8xf32>, vector<8x8xf32> -> vector<8x8xf32>
    %476 = vector.extract_strided_slice %447 {offsets = [0, 16], sizes = [8, 8], strides = [1, 1]} : vector<8x32xf32> to vector<8x8xf32>
    %477 = vector.extract_strided_slice %448 {offsets = [0, 16], sizes = [8, 8], strides = [1, 1]} : vector<8x32xf32> to vector<8x8xf32>
    "tpu.trace_start"() <{level = 10 : i32, message = "qd,kd->qk"}> : () -> ()
    %cst_188 = arith.constant dense<0.000000e+00> : vector<8x8xf32>
    %478 = tpu.matmul %476, %477, %cst_188 {dimension_numbers = #tpu.dot_dimension_numbers<[1], [1], [0], [0], [0, 0, 1, 0], [], []>} : vector<8x8xf32>, vector<8x8xf32>, vector<8x8xf32> -> vector<8x8xf32>
    "tpu.trace_stop"() : () -> ()
    %cst_189 = arith.constant 0.353553385 : f32
    %479 = vector.broadcast %cst_189 : f32 to vector<8x8xf32>
    %480 = arith.mulf %478, %479 : vector<8x8xf32>
    %481 = math.exp %480 : vector<8x8xf32>
    %cst_190 = arith.constant dense<0.000000e+00> : vector<8xf32>
    %482 = vector.multi_reduction <add>, %481, %cst_190 [1] : vector<8x8xf32> to vector<8xf32>
    %483 = vector.shape_cast %482 : vector<8xf32> to vector<8x1xf32>
    %484 = tpu.reciprocal %483 {approx = true} : vector<8x1xf32> -> vector<8x1xf32>
    %485 = vector.broadcast %484 : vector<8x1xf32> to vector<8x8xf32>
    %486 = arith.mulf %481, %485 : vector<8x8xf32>
    %487 = vector.extract_strided_slice %449 {offsets = [0, 16], sizes = [8, 8], strides = [1, 1]} : vector<8x32xf32> to vector<8x8xf32>
    %cst_191 = arith.constant dense<0.000000e+00> : vector<8x8xf32>
    %488 = tpu.matmul %486, %487, %cst_191 {dimension_numbers = #tpu.dot_dimension_numbers<[1], [0], [0], [1], [0, 0, 1, 1], [], []>} : vector<8x8xf32>, vector<8x8xf32>, vector<8x8xf32> -> vector<8x8xf32>
    %489 = vector.extract_strided_slice %447 {offsets = [0, 24], sizes = [8, 8], strides = [1, 1]} : vector<8x32xf32> to vector<8x8xf32>
    %490 = vector.extract_strided_slice %448 {offsets = [0, 24], sizes = [8, 8], strides = [1, 1]} : vector<8x32xf32> to vector<8x8xf32>
    "tpu.trace_start"() <{level = 10 : i32, message = "qd,kd->qk"}> : () -> ()
    %cst_192 = arith.constant dense<0.000000e+00> : vector<8x8xf32>
    %491 = tpu.matmul %489, %490, %cst_192 {dimension_numbers = #tpu.dot_dimension_numbers<[1], [1], [0], [0], [0, 0, 1, 0], [], []>} : vector<8x8xf32>, vector<8x8xf32>, vector<8x8xf32> -> vector<8x8xf32>
    "tpu.trace_stop"() : () -> ()
    %cst_193 = arith.constant 0.353553385 : f32
    %492 = vector.broadcast %cst_193 : f32 to vector<8x8xf32>
    %493 = arith.mulf %491, %492 : vector<8x8xf32>
    %494 = math.exp %493 : vector<8x8xf32>
    %cst_194 = arith.constant dense<0.000000e+00> : vector<8xf32>
    %495 = vector.multi_reduction <add>, %494, %cst_194 [1] : vector<8x8xf32> to vector<8xf32>
    %496 = vector.shape_cast %495 : vector<8xf32> to vector<8x1xf32>
    %497 = tpu.reciprocal %496 {approx = true} : vector<8x1xf32> -> vector<8x1xf32>
    %498 = vector.broadcast %497 : vector<8x1xf32> to vector<8x8xf32>
    %499 = arith.mulf %494, %498 : vector<8x8xf32>
    %500 = vector.extract_strided_slice %449 {offsets = [0, 24], sizes = [8, 8], strides = [1, 1]} : vector<8x32xf32> to vector<8x8xf32>
    %cst_195 = arith.constant dense<0.000000e+00> : vector<8x8xf32>
    %501 = tpu.matmul %499, %500, %cst_195 {dimension_numbers = #tpu.dot_dimension_numbers<[1], [0], [0], [1], [0, 0, 1, 1], [], []>} : vector<8x8xf32>, vector<8x8xf32>, vector<8x8xf32> -> vector<8x8xf32>
    %502 = tpu.concatenate %462, %475, %488, %501 in 1 : vector<8x8xf32>, vector<8x8xf32>, vector<8x8xf32>, vector<8x8xf32> -> vector<8x32xf32>
    %503 = tpu.concatenate %446, %502 in 0 : vector<8x32xf32>, vector<8x32xf32> -> vector<16x32xf32>
    %cst_196 = arith.constant dense<0.000000e+00> : vector<16x32xf32>
    %504 = tpu.matmul %503, %388, %cst_196 {dimension_numbers = #tpu.dot_dimension_numbers<[1], [0], [0], [1], [0, 0, 1, 1], [], []>} : vector<16x32xf32>, vector<32x32xf32>, vector<16x32xf32> -> vector<16x32xf32>
    %505 = vector.broadcast %390 : vector<1x32xf32> to vector<16x32xf32>
    %506 = arith.addf %504, %505 : vector<16x32xf32>
    %507 = arith.addf %376, %506 : vector<16x32xf32>
    %c1_197 = arith.constant 1 : index
    %c0_198 = arith.constant 0 : index
    %c0_199 = arith.constant 0 : index
    %508 = vector.load %arg13[%c1_197, %c0_198, %c0_199] : memref<2x1x32xf32, #tpu.memory_space<vmem>>, vector<1x1x32xf32>
    %509 = vector.shape_cast %508 : vector<1x1x32xf32> to vector<1x32xf32>
    %c1_200 = arith.constant 1 : index
    %c0_201 = arith.constant 0 : index
    %c0_202 = arith.constant 0 : index
    %510 = vector.load %arg14[%c1_200, %c0_201, %c0_202] : memref<2x1x32xf32, #tpu.memory_space<vmem>>, vector<1x1x32xf32>
    %511 = vector.shape_cast %510 : vector<1x1x32xf32> to vector<1x32xf32>
    %cst_203 = arith.constant dense<0.000000e+00> : vector<16xf32>
    %512 = vector.multi_reduction <add>, %507, %cst_203 [1] : vector<16x32xf32> to vector<16xf32>
    %513 = vector.shape_cast %512 : vector<16xf32> to vector<16x1xf32>
    %cst_204 = arith.constant 3.200000e+01 : f32
    %514 = vector.broadcast %cst_204 : f32 to vector<16x1xf32>
    %515 = arith.divf %513, %514 : vector<16x1xf32>
    %516 = vector.broadcast %515 : vector<16x1xf32> to vector<16x32xf32>
    %517 = arith.subf %507, %516 : vector<16x32xf32>
    %518 = vector.broadcast %515 : vector<16x1xf32> to vector<16x32xf32>
    %519 = arith.subf %507, %518 : vector<16x32xf32>
    %520 = arith.mulf %517, %519 : vector<16x32xf32>
    %cst_205 = arith.constant dense<0.000000e+00> : vector<16xf32>
    %521 = vector.multi_reduction <add>, %520, %cst_205 [1] : vector<16x32xf32> to vector<16xf32>
    %522 = vector.shape_cast %521 : vector<16xf32> to vector<16x1xf32>
    %cst_206 = arith.constant 3.200000e+01 : f32
    %523 = vector.broadcast %cst_206 : f32 to vector<16x1xf32>
    %524 = arith.divf %522, %523 : vector<16x1xf32>
    %525 = vector.broadcast %515 : vector<16x1xf32> to vector<16x32xf32>
    %526 = arith.subf %507, %525 : vector<16x32xf32>
    %cst_207 = arith.constant 9.99999974E-6 : f32
    %527 = vector.broadcast %cst_207 : f32 to vector<16x1xf32>
    %528 = arith.addf %524, %527 : vector<16x1xf32>
    %529 = math.rsqrt %528 : vector<16x1xf32>
    %530 = vector.broadcast %529 : vector<16x1xf32> to vector<16x32xf32>
    %531 = arith.mulf %526, %530 : vector<16x32xf32>
    %532 = vector.broadcast %509 : vector<1x32xf32> to vector<16x32xf32>
    %533 = arith.mulf %531, %532 : vector<16x32xf32>
    %534 = vector.broadcast %511 : vector<1x32xf32> to vector<16x32xf32>
    %535 = arith.addf %533, %534 : vector<16x32xf32>
    %c1_208 = arith.constant 1 : index
    %c0_209 = arith.constant 0 : index
    %c0_210 = arith.constant 0 : index
    %536 = vector.load %arg7[%c1_208, %c0_209, %c0_210] : memref<2x32x32xf32, #tpu.memory_space<vmem>>, vector<1x32x32xf32>
    %537 = vector.shape_cast %536 : vector<1x32x32xf32> to vector<32x32xf32>
    %cst_211 = arith.constant dense<0.000000e+00> : vector<16x32xf32>
    %538 = tpu.matmul %535, %537, %cst_211 {dimension_numbers = #tpu.dot_dimension_numbers<[1], [0], [0], [1], [0, 0, 1, 1], [], []>} : vector<16x32xf32>, vector<32x32xf32>, vector<16x32xf32> -> vector<16x32xf32>
    %c1_212 = arith.constant 1 : index
    %c0_213 = arith.constant 0 : index
    %c0_214 = arith.constant 0 : index
    %539 = vector.load %arg8[%c1_212, %c0_213, %c0_214] : memref<2x1x32xf32, #tpu.memory_space<vmem>>, vector<1x1x32xf32>
    %540 = vector.shape_cast %539 : vector<1x1x32xf32> to vector<1x32xf32>
    %541 = vector.broadcast %540 : vector<1x32xf32> to vector<16x32xf32>
    %542 = arith.addf %538, %541 : vector<16x32xf32>
    %c1_215 = arith.constant 1 : index
    %c0_216 = arith.constant 0 : index
    %c0_217 = arith.constant 0 : index
    %543 = vector.load %arg9[%c1_215, %c0_216, %c0_217] : memref<2x32x64xf32, #tpu.memory_space<vmem>>, vector<1x32x64xf32>
    %544 = vector.shape_cast %543 : vector<1x32x64xf32> to vector<32x64xf32>
    %cst_218 = arith.constant dense<0.000000e+00> : vector<16x64xf32>
    %545 = tpu.matmul %7, %544, %cst_218 {dimension_numbers = #tpu.dot_dimension_numbers<[1], [0], [0], [1], [0, 0, 1, 1], [], []>} : vector<16x32xf32>, vector<32x64xf32>, vector<16x64xf32> -> vector<16x64xf32>
    %c1_219 = arith.constant 1 : index
    %c0_220 = arith.constant 0 : index
    %c0_221 = arith.constant 0 : index
    %546 = vector.load %arg10[%c1_219, %c0_220, %c0_221] : memref<2x1x64xf32, #tpu.memory_space<vmem>>, vector<1x1x64xf32>
    %547 = vector.shape_cast %546 : vector<1x1x64xf32> to vector<1x64xf32>
    %548 = vector.broadcast %547 : vector<1x64xf32> to vector<16x64xf32>
    %549 = arith.addf %545, %548 : vector<16x64xf32>
    %550 = vector.extract_strided_slice %549 {offsets = [0, 0], sizes = [16, 32], strides = [1, 1]} : vector<16x64xf32> to vector<16x32xf32>
    %551 = vector.extract_strided_slice %549 {offsets = [0, 32], sizes = [16, 32], strides = [1, 1]} : vector<16x64xf32> to vector<16x32xf32>
    %c1_222 = arith.constant 1 : index
    %c0_223 = arith.constant 0 : index
    %c0_224 = arith.constant 0 : index
    %552 = vector.load %arg11[%c1_222, %c0_223, %c0_224] : memref<2x32x32xf32, #tpu.memory_space<vmem>>, vector<1x32x32xf32>
    %553 = vector.shape_cast %552 : vector<1x32x32xf32> to vector<32x32xf32>
    %c1_225 = arith.constant 1 : index
    %c0_226 = arith.constant 0 : index
    %c0_227 = arith.constant 0 : index
    %554 = vector.load %arg12[%c1_225, %c0_226, %c0_227] : memref<2x1x32xf32, #tpu.memory_space<vmem>>, vector<1x1x32xf32>
    %555 = vector.shape_cast %554 : vector<1x1x32xf32> to vector<1x32xf32>
    %556 = vector.extract_strided_slice %542 {offsets = [0, 0], sizes = [8, 32], strides = [1, 1]} : vector<16x32xf32> to vector<8x32xf32>
    %557 = vector.extract_strided_slice %550 {offsets = [0, 0], sizes = [8, 32], strides = [1, 1]} : vector<16x32xf32> to vector<8x32xf32>
    %558 = vector.extract_strided_slice %551 {offsets = [0, 0], sizes = [8, 32], strides = [1, 1]} : vector<16x32xf32> to vector<8x32xf32>
    %559 = vector.extract_strided_slice %556 {offsets = [0, 0], sizes = [8, 8], strides = [1, 1]} : vector<8x32xf32> to vector<8x8xf32>
    %560 = vector.extract_strided_slice %557 {offsets = [0, 0], sizes = [8, 8], strides = [1, 1]} : vector<8x32xf32> to vector<8x8xf32>
    "tpu.trace_start"() <{level = 10 : i32, message = "qd,kd->qk"}> : () -> ()
    %cst_228 = arith.constant dense<0.000000e+00> : vector<8x8xf32>
    %561 = tpu.matmul %559, %560, %cst_228 {dimension_numbers = #tpu.dot_dimension_numbers<[1], [1], [0], [0], [0, 0, 1, 0], [], []>} : vector<8x8xf32>, vector<8x8xf32>, vector<8x8xf32> -> vector<8x8xf32>
    "tpu.trace_stop"() : () -> ()
    %cst_229 = arith.constant 0.353553385 : f32
    %562 = vector.broadcast %cst_229 : f32 to vector<8x8xf32>
    %563 = arith.mulf %561, %562 : vector<8x8xf32>
    %564 = math.exp %563 : vector<8x8xf32>
    %cst_230 = arith.constant dense<0.000000e+00> : vector<8xf32>
    %565 = vector.multi_reduction <add>, %564, %cst_230 [1] : vector<8x8xf32> to vector<8xf32>
    %566 = vector.shape_cast %565 : vector<8xf32> to vector<8x1xf32>
    %567 = tpu.reciprocal %566 {approx = true} : vector<8x1xf32> -> vector<8x1xf32>
    %568 = vector.broadcast %567 : vector<8x1xf32> to vector<8x8xf32>
    %569 = arith.mulf %564, %568 : vector<8x8xf32>
    %570 = vector.extract_strided_slice %558 {offsets = [0, 0], sizes = [8, 8], strides = [1, 1]} : vector<8x32xf32> to vector<8x8xf32>
    %cst_231 = arith.constant dense<0.000000e+00> : vector<8x8xf32>
    %571 = tpu.matmul %569, %570, %cst_231 {dimension_numbers = #tpu.dot_dimension_numbers<[1], [0], [0], [1], [0, 0, 1, 1], [], []>} : vector<8x8xf32>, vector<8x8xf32>, vector<8x8xf32> -> vector<8x8xf32>
    %572 = vector.extract_strided_slice %556 {offsets = [0, 8], sizes = [8, 8], strides = [1, 1]} : vector<8x32xf32> to vector<8x8xf32>
    %573 = vector.extract_strided_slice %557 {offsets = [0, 8], sizes = [8, 8], strides = [1, 1]} : vector<8x32xf32> to vector<8x8xf32>
    "tpu.trace_start"() <{level = 10 : i32, message = "qd,kd->qk"}> : () -> ()
    %cst_232 = arith.constant dense<0.000000e+00> : vector<8x8xf32>
    %574 = tpu.matmul %572, %573, %cst_232 {dimension_numbers = #tpu.dot_dimension_numbers<[1], [1], [0], [0], [0, 0, 1, 0], [], []>} : vector<8x8xf32>, vector<8x8xf32>, vector<8x8xf32> -> vector<8x8xf32>
    "tpu.trace_stop"() : () -> ()
    %cst_233 = arith.constant 0.353553385 : f32
    %575 = vector.broadcast %cst_233 : f32 to vector<8x8xf32>
    %576 = arith.mulf %574, %575 : vector<8x8xf32>
    %577 = math.exp %576 : vector<8x8xf32>
    %cst_234 = arith.constant dense<0.000000e+00> : vector<8xf32>
    %578 = vector.multi_reduction <add>, %577, %cst_234 [1] : vector<8x8xf32> to vector<8xf32>
    %579 = vector.shape_cast %578 : vector<8xf32> to vector<8x1xf32>
    %580 = tpu.reciprocal %579 {approx = true} : vector<8x1xf32> -> vector<8x1xf32>
    %581 = vector.broadcast %580 : vector<8x1xf32> to vector<8x8xf32>
    %582 = arith.mulf %577, %581 : vector<8x8xf32>
    %583 = vector.extract_strided_slice %558 {offsets = [0, 8], sizes = [8, 8], strides = [1, 1]} : vector<8x32xf32> to vector<8x8xf32>
    %cst_235 = arith.constant dense<0.000000e+00> : vector<8x8xf32>
    %584 = tpu.matmul %582, %583, %cst_235 {dimension_numbers = #tpu.dot_dimension_numbers<[1], [0], [0], [1], [0, 0, 1, 1], [], []>} : vector<8x8xf32>, vector<8x8xf32>, vector<8x8xf32> -> vector<8x8xf32>
    %585 = vector.extract_strided_slice %556 {offsets = [0, 16], sizes = [8, 8], strides = [1, 1]} : vector<8x32xf32> to vector<8x8xf32>
    %586 = vector.extract_strided_slice %557 {offsets = [0, 16], sizes = [8, 8], strides = [1, 1]} : vector<8x32xf32> to vector<8x8xf32>
    "tpu.trace_start"() <{level = 10 : i32, message = "qd,kd->qk"}> : () -> ()
    %cst_236 = arith.constant dense<0.000000e+00> : vector<8x8xf32>
    %587 = tpu.matmul %585, %586, %cst_236 {dimension_numbers = #tpu.dot_dimension_numbers<[1], [1], [0], [0], [0, 0, 1, 0], [], []>} : vector<8x8xf32>, vector<8x8xf32>, vector<8x8xf32> -> vector<8x8xf32>
    "tpu.trace_stop"() : () -> ()
    %cst_237 = arith.constant 0.353553385 : f32
    %588 = vector.broadcast %cst_237 : f32 to vector<8x8xf32>
    %589 = arith.mulf %587, %588 : vector<8x8xf32>
    %590 = math.exp %589 : vector<8x8xf32>
    %cst_238 = arith.constant dense<0.000000e+00> : vector<8xf32>
    %591 = vector.multi_reduction <add>, %590, %cst_238 [1] : vector<8x8xf32> to vector<8xf32>
    %592 = vector.shape_cast %591 : vector<8xf32> to vector<8x1xf32>
    %593 = tpu.reciprocal %592 {approx = true} : vector<8x1xf32> -> vector<8x1xf32>
    %594 = vector.broadcast %593 : vector<8x1xf32> to vector<8x8xf32>
    %595 = arith.mulf %590, %594 : vector<8x8xf32>
    %596 = vector.extract_strided_slice %558 {offsets = [0, 16], sizes = [8, 8], strides = [1, 1]} : vector<8x32xf32> to vector<8x8xf32>
    %cst_239 = arith.constant dense<0.000000e+00> : vector<8x8xf32>
    %597 = tpu.matmul %595, %596, %cst_239 {dimension_numbers = #tpu.dot_dimension_numbers<[1], [0], [0], [1], [0, 0, 1, 1], [], []>} : vector<8x8xf32>, vector<8x8xf32>, vector<8x8xf32> -> vector<8x8xf32>
    %598 = vector.extract_strided_slice %556 {offsets = [0, 24], sizes = [8, 8], strides = [1, 1]} : vector<8x32xf32> to vector<8x8xf32>
    %599 = vector.extract_strided_slice %557 {offsets = [0, 24], sizes = [8, 8], strides = [1, 1]} : vector<8x32xf32> to vector<8x8xf32>
    "tpu.trace_start"() <{level = 10 : i32, message = "qd,kd->qk"}> : () -> ()
    %cst_240 = arith.constant dense<0.000000e+00> : vector<8x8xf32>
    %600 = tpu.matmul %598, %599, %cst_240 {dimension_numbers = #tpu.dot_dimension_numbers<[1], [1], [0], [0], [0, 0, 1, 0], [], []>} : vector<8x8xf32>, vector<8x8xf32>, vector<8x8xf32> -> vector<8x8xf32>
    "tpu.trace_stop"() : () -> ()
    %cst_241 = arith.constant 0.353553385 : f32
    %601 = vector.broadcast %cst_241 : f32 to vector<8x8xf32>
    %602 = arith.mulf %600, %601 : vector<8x8xf32>
    %603 = math.exp %602 : vector<8x8xf32>
    %cst_242 = arith.constant dense<0.000000e+00> : vector<8xf32>
    %604 = vector.multi_reduction <add>, %603, %cst_242 [1] : vector<8x8xf32> to vector<8xf32>
    %605 = vector.shape_cast %604 : vector<8xf32> to vector<8x1xf32>
    %606 = tpu.reciprocal %605 {approx = true} : vector<8x1xf32> -> vector<8x1xf32>
    %607 = vector.broadcast %606 : vector<8x1xf32> to vector<8x8xf32>
    %608 = arith.mulf %603, %607 : vector<8x8xf32>
    %609 = vector.extract_strided_slice %558 {offsets = [0, 24], sizes = [8, 8], strides = [1, 1]} : vector<8x32xf32> to vector<8x8xf32>
    %cst_243 = arith.constant dense<0.000000e+00> : vector<8x8xf32>
    %610 = tpu.matmul %608, %609, %cst_243 {dimension_numbers = #tpu.dot_dimension_numbers<[1], [0], [0], [1], [0, 0, 1, 1], [], []>} : vector<8x8xf32>, vector<8x8xf32>, vector<8x8xf32> -> vector<8x8xf32>
    %611 = tpu.concatenate %571, %584, %597, %610 in 1 : vector<8x8xf32>, vector<8x8xf32>, vector<8x8xf32>, vector<8x8xf32> -> vector<8x32xf32>
    %612 = vector.extract_strided_slice %542 {offsets = [8, 0], sizes = [8, 32], strides = [1, 1]} : vector<16x32xf32> to vector<8x32xf32>
    %613 = vector.extract_strided_slice %550 {offsets = [8, 0], sizes = [8, 32], strides = [1, 1]} : vector<16x32xf32> to vector<8x32xf32>
    %614 = vector.extract_strided_slice %551 {offsets = [8, 0], sizes = [8, 32], strides = [1, 1]} : vector<16x32xf32> to vector<8x32xf32>
    %615 = vector.extract_strided_slice %612 {offsets = [0, 0], sizes = [8, 8], strides = [1, 1]} : vector<8x32xf32> to vector<8x8xf32>
    %616 = vector.extract_strided_slice %613 {offsets = [0, 0], sizes = [8, 8], strides = [1, 1]} : vector<8x32xf32> to vector<8x8xf32>
    "tpu.trace_start"() <{level = 10 : i32, message = "qd,kd->qk"}> : () -> ()
    %cst_244 = arith.constant dense<0.000000e+00> : vector<8x8xf32>
    %617 = tpu.matmul %615, %616, %cst_244 {dimension_numbers = #tpu.dot_dimension_numbers<[1], [1], [0], [0], [0, 0, 1, 0], [], []>} : vector<8x8xf32>, vector<8x8xf32>, vector<8x8xf32> -> vector<8x8xf32>
    "tpu.trace_stop"() : () -> ()
    %cst_245 = arith.constant 0.353553385 : f32
    %618 = vector.broadcast %cst_245 : f32 to vector<8x8xf32>
    %619 = arith.mulf %617, %618 : vector<8x8xf32>
    %620 = math.exp %619 : vector<8x8xf32>
    %cst_246 = arith.constant dense<0.000000e+00> : vector<8xf32>
    %621 = vector.multi_reduction <add>, %620, %cst_246 [1] : vector<8x8xf32> to vector<8xf32>
    %622 = vector.shape_cast %621 : vector<8xf32> to vector<8x1xf32>
    %623 = tpu.reciprocal %622 {approx = true} : vector<8x1xf32> -> vector<8x1xf32>
    %624 = vector.broadcast %623 : vector<8x1xf32> to vector<8x8xf32>
    %625 = arith.mulf %620, %624 : vector<8x8xf32>
    %626 = vector.extract_strided_slice %614 {offsets = [0, 0], sizes = [8, 8], strides = [1, 1]} : vector<8x32xf32> to vector<8x8xf32>
    %cst_247 = arith.constant dense<0.000000e+00> : vector<8x8xf32>
    %627 = tpu.matmul %625, %626, %cst_247 {dimension_numbers = #tpu.dot_dimension_numbers<[1], [0], [0], [1], [0, 0, 1, 1], [], []>} : vector<8x8xf32>, vector<8x8xf32>, vector<8x8xf32> -> vector<8x8xf32>
    %628 = vector.extract_strided_slice %612 {offsets = [0, 8], sizes = [8, 8], strides = [1, 1]} : vector<8x32xf32> to vector<8x8xf32>
    %629 = vector.extract_strided_slice %613 {offsets = [0, 8], sizes = [8, 8], strides = [1, 1]} : vector<8x32xf32> to vector<8x8xf32>
    "tpu.trace_start"() <{level = 10 : i32, message = "qd,kd->qk"}> : () -> ()
    %cst_248 = arith.constant dense<0.000000e+00> : vector<8x8xf32>
    %630 = tpu.matmul %628, %629, %cst_248 {dimension_numbers = #tpu.dot_dimension_numbers<[1], [1], [0], [0], [0, 0, 1, 0], [], []>} : vector<8x8xf32>, vector<8x8xf32>, vector<8x8xf32> -> vector<8x8xf32>
    "tpu.trace_stop"() : () -> ()
    %cst_249 = arith.constant 0.353553385 : f32
    %631 = vector.broadcast %cst_249 : f32 to vector<8x8xf32>
    %632 = arith.mulf %630, %631 : vector<8x8xf32>
    %633 = math.exp %632 : vector<8x8xf32>
    %cst_250 = arith.constant dense<0.000000e+00> : vector<8xf32>
    %634 = vector.multi_reduction <add>, %633, %cst_250 [1] : vector<8x8xf32> to vector<8xf32>
    %635 = vector.shape_cast %634 : vector<8xf32> to vector<8x1xf32>
    %636 = tpu.reciprocal %635 {approx = true} : vector<8x1xf32> -> vector<8x1xf32>
    %637 = vector.broadcast %636 : vector<8x1xf32> to vector<8x8xf32>
    %638 = arith.mulf %633, %637 : vector<8x8xf32>
    %639 = vector.extract_strided_slice %614 {offsets = [0, 8], sizes = [8, 8], strides = [1, 1]} : vector<8x32xf32> to vector<8x8xf32>
    %cst_251 = arith.constant dense<0.000000e+00> : vector<8x8xf32>
    %640 = tpu.matmul %638, %639, %cst_251 {dimension_numbers = #tpu.dot_dimension_numbers<[1], [0], [0], [1], [0, 0, 1, 1], [], []>} : vector<8x8xf32>, vector<8x8xf32>, vector<8x8xf32> -> vector<8x8xf32>
    %641 = vector.extract_strided_slice %612 {offsets = [0, 16], sizes = [8, 8], strides = [1, 1]} : vector<8x32xf32> to vector<8x8xf32>
    %642 = vector.extract_strided_slice %613 {offsets = [0, 16], sizes = [8, 8], strides = [1, 1]} : vector<8x32xf32> to vector<8x8xf32>
    "tpu.trace_start"() <{level = 10 : i32, message = "qd,kd->qk"}> : () -> ()
    %cst_252 = arith.constant dense<0.000000e+00> : vector<8x8xf32>
    %643 = tpu.matmul %641, %642, %cst_252 {dimension_numbers = #tpu.dot_dimension_numbers<[1], [1], [0], [0], [0, 0, 1, 0], [], []>} : vector<8x8xf32>, vector<8x8xf32>, vector<8x8xf32> -> vector<8x8xf32>
    "tpu.trace_stop"() : () -> ()
    %cst_253 = arith.constant 0.353553385 : f32
    %644 = vector.broadcast %cst_253 : f32 to vector<8x8xf32>
    %645 = arith.mulf %643, %644 : vector<8x8xf32>
    %646 = math.exp %645 : vector<8x8xf32>
    %cst_254 = arith.constant dense<0.000000e+00> : vector<8xf32>
    %647 = vector.multi_reduction <add>, %646, %cst_254 [1] : vector<8x8xf32> to vector<8xf32>
    %648 = vector.shape_cast %647 : vector<8xf32> to vector<8x1xf32>
    %649 = tpu.reciprocal %648 {approx = true} : vector<8x1xf32> -> vector<8x1xf32>
    %650 = vector.broadcast %649 : vector<8x1xf32> to vector<8x8xf32>
    %651 = arith.mulf %646, %650 : vector<8x8xf32>
    %652 = vector.extract_strided_slice %614 {offsets = [0, 16], sizes = [8, 8], strides = [1, 1]} : vector<8x32xf32> to vector<8x8xf32>
    %cst_255 = arith.constant dense<0.000000e+00> : vector<8x8xf32>
    %653 = tpu.matmul %651, %652, %cst_255 {dimension_numbers = #tpu.dot_dimension_numbers<[1], [0], [0], [1], [0, 0, 1, 1], [], []>} : vector<8x8xf32>, vector<8x8xf32>, vector<8x8xf32> -> vector<8x8xf32>
    %654 = vector.extract_strided_slice %612 {offsets = [0, 24], sizes = [8, 8], strides = [1, 1]} : vector<8x32xf32> to vector<8x8xf32>
    %655 = vector.extract_strided_slice %613 {offsets = [0, 24], sizes = [8, 8], strides = [1, 1]} : vector<8x32xf32> to vector<8x8xf32>
    "tpu.trace_start"() <{level = 10 : i32, message = "qd,kd->qk"}> : () -> ()
    %cst_256 = arith.constant dense<0.000000e+00> : vector<8x8xf32>
    %656 = tpu.matmul %654, %655, %cst_256 {dimension_numbers = #tpu.dot_dimension_numbers<[1], [1], [0], [0], [0, 0, 1, 0], [], []>} : vector<8x8xf32>, vector<8x8xf32>, vector<8x8xf32> -> vector<8x8xf32>
    "tpu.trace_stop"() : () -> ()
    %cst_257 = arith.constant 0.353553385 : f32
    %657 = vector.broadcast %cst_257 : f32 to vector<8x8xf32>
    %658 = arith.mulf %656, %657 : vector<8x8xf32>
    %659 = math.exp %658 : vector<8x8xf32>
    %cst_258 = arith.constant dense<0.000000e+00> : vector<8xf32>
    %660 = vector.multi_reduction <add>, %659, %cst_258 [1] : vector<8x8xf32> to vector<8xf32>
    %661 = vector.shape_cast %660 : vector<8xf32> to vector<8x1xf32>
    %662 = tpu.reciprocal %661 {approx = true} : vector<8x1xf32> -> vector<8x1xf32>
    %663 = vector.broadcast %662 : vector<8x1xf32> to vector<8x8xf32>
    %664 = arith.mulf %659, %663 : vector<8x8xf32>
    %665 = vector.extract_strided_slice %614 {offsets = [0, 24], sizes = [8, 8], strides = [1, 1]} : vector<8x32xf32> to vector<8x8xf32>
    %cst_259 = arith.constant dense<0.000000e+00> : vector<8x8xf32>
    %666 = tpu.matmul %664, %665, %cst_259 {dimension_numbers = #tpu.dot_dimension_numbers<[1], [0], [0], [1], [0, 0, 1, 1], [], []>} : vector<8x8xf32>, vector<8x8xf32>, vector<8x8xf32> -> vector<8x8xf32>
    %667 = tpu.concatenate %627, %640, %653, %666 in 1 : vector<8x8xf32>, vector<8x8xf32>, vector<8x8xf32>, vector<8x8xf32> -> vector<8x32xf32>
    %668 = tpu.concatenate %611, %667 in 0 : vector<8x32xf32>, vector<8x32xf32> -> vector<16x32xf32>
    %cst_260 = arith.constant dense<0.000000e+00> : vector<16x32xf32>
    %669 = tpu.matmul %668, %553, %cst_260 {dimension_numbers = #tpu.dot_dimension_numbers<[1], [0], [0], [1], [0, 0, 1, 1], [], []>} : vector<16x32xf32>, vector<32x32xf32>, vector<16x32xf32> -> vector<16x32xf32>
    %670 = vector.broadcast %555 : vector<1x32xf32> to vector<16x32xf32>
    %671 = arith.addf %669, %670 : vector<16x32xf32>
    %672 = arith.addf %535, %671 : vector<16x32xf32>
    %c1_261 = arith.constant 1 : index
    %c0_262 = arith.constant 0 : index
    %c0_263 = arith.constant 0 : index
    %673 = vector.load %arg15[%c1_261, %c0_262, %c0_263] : memref<2x1x32xf32, #tpu.memory_space<vmem>>, vector<1x1x32xf32>
    %674 = vector.shape_cast %673 : vector<1x1x32xf32> to vector<1x32xf32>
    %c1_264 = arith.constant 1 : index
    %c0_265 = arith.constant 0 : index
    %c0_266 = arith.constant 0 : index
    %675 = vector.load %arg16[%c1_264, %c0_265, %c0_266] : memref<2x1x32xf32, #tpu.memory_space<vmem>>, vector<1x1x32xf32>
    %676 = vector.shape_cast %675 : vector<1x1x32xf32> to vector<1x32xf32>
    %cst_267 = arith.constant dense<0.000000e+00> : vector<16xf32>
    %677 = vector.multi_reduction <add>, %672, %cst_267 [1] : vector<16x32xf32> to vector<16xf32>
    %678 = vector.shape_cast %677 : vector<16xf32> to vector<16x1xf32>
    %cst_268 = arith.constant 3.200000e+01 : f32
    %679 = vector.broadcast %cst_268 : f32 to vector<16x1xf32>
    %680 = arith.divf %678, %679 : vector<16x1xf32>
    %681 = vector.broadcast %680 : vector<16x1xf32> to vector<16x32xf32>
    %682 = arith.subf %672, %681 : vector<16x32xf32>
    %683 = vector.broadcast %680 : vector<16x1xf32> to vector<16x32xf32>
    %684 = arith.subf %672, %683 : vector<16x32xf32>
    %685 = arith.mulf %682, %684 : vector<16x32xf32>
    %cst_269 = arith.constant dense<0.000000e+00> : vector<16xf32>
    %686 = vector.multi_reduction <add>, %685, %cst_269 [1] : vector<16x32xf32> to vector<16xf32>
    %687 = vector.shape_cast %686 : vector<16xf32> to vector<16x1xf32>
    %cst_270 = arith.constant 3.200000e+01 : f32
    %688 = vector.broadcast %cst_270 : f32 to vector<16x1xf32>
    %689 = arith.divf %687, %688 : vector<16x1xf32>
    %690 = vector.broadcast %680 : vector<16x1xf32> to vector<16x32xf32>
    %691 = arith.subf %672, %690 : vector<16x32xf32>
    %cst_271 = arith.constant 9.99999974E-6 : f32
    %692 = vector.broadcast %cst_271 : f32 to vector<16x1xf32>
    %693 = arith.addf %689, %692 : vector<16x1xf32>
    %694 = math.rsqrt %693 : vector<16x1xf32>
    %695 = vector.broadcast %694 : vector<16x1xf32> to vector<16x32xf32>
    %696 = arith.mulf %691, %695 : vector<16x32xf32>
    %697 = vector.broadcast %674 : vector<1x32xf32> to vector<16x32xf32>
    %698 = arith.mulf %696, %697 : vector<16x32xf32>
    %699 = vector.broadcast %676 : vector<1x32xf32> to vector<16x32xf32>
    %700 = arith.addf %698, %699 : vector<16x32xf32>
    %c1_272 = arith.constant 1 : index
    %c0_273 = arith.constant 0 : index
    %c0_274 = arith.constant 0 : index
    %701 = vector.load %arg19[%c1_272, %c0_273, %c0_274] : memref<2x32x64xf32, #tpu.memory_space<vmem>>, vector<1x32x64xf32>
    %702 = vector.shape_cast %701 : vector<1x32x64xf32> to vector<32x64xf32>
    %cst_275 = arith.constant dense<0.000000e+00> : vector<16x64xf32>
    %703 = tpu.matmul %700, %702, %cst_275 {dimension_numbers = #tpu.dot_dimension_numbers<[1], [0], [0], [1], [0, 0, 1, 1], [], []>} : vector<16x32xf32>, vector<32x64xf32>, vector<16x64xf32> -> vector<16x64xf32>
    %c1_276 = arith.constant 1 : index
    %c0_277 = arith.constant 0 : index
    %c0_278 = arith.constant 0 : index
    %704 = vector.load %arg20[%c1_276, %c0_277, %c0_278] : memref<2x1x64xf32, #tpu.memory_space<vmem>>, vector<1x1x64xf32>
    %705 = vector.shape_cast %704 : vector<1x1x64xf32> to vector<1x64xf32>
    %706 = vector.broadcast %705 : vector<1x64xf32> to vector<16x64xf32>
    %707 = arith.addf %703, %706 : vector<16x64xf32>
    %cst_279 = arith.constant 0.000000e+00 : f32
    %708 = vector.broadcast %cst_279 : f32 to vector<16x64xf32>
    %709 = arith.maximumf %707, %708 : vector<16x64xf32>
    %c1_280 = arith.constant 1 : index
    %c0_281 = arith.constant 0 : index
    %c0_282 = arith.constant 0 : index
    %710 = vector.load %arg21[%c1_280, %c0_281, %c0_282] : memref<2x64x32xf32, #tpu.memory_space<vmem>>, vector<1x64x32xf32>
    %711 = vector.shape_cast %710 : vector<1x64x32xf32> to vector<64x32xf32>
    %cst_283 = arith.constant dense<0.000000e+00> : vector<16x32xf32>
    %712 = tpu.matmul %709, %711, %cst_283 {dimension_numbers = #tpu.dot_dimension_numbers<[1], [0], [0], [1], [0, 0, 1, 1], [], []>} : vector<16x64xf32>, vector<64x32xf32>, vector<16x32xf32> -> vector<16x32xf32>
    %c1_284 = arith.constant 1 : index
    %c0_285 = arith.constant 0 : index
    %c0_286 = arith.constant 0 : index
    %713 = vector.load %arg22[%c1_284, %c0_285, %c0_286] : memref<2x1x32xf32, #tpu.memory_space<vmem>>, vector<1x1x32xf32>
    %714 = vector.shape_cast %713 : vector<1x1x32xf32> to vector<1x32xf32>
    %715 = vector.broadcast %714 : vector<1x32xf32> to vector<16x32xf32>
    %716 = arith.addf %712, %715 : vector<16x32xf32>
    %717 = arith.addf %700, %716 : vector<16x32xf32>
    %c1_287 = arith.constant 1 : index
    %c0_288 = arith.constant 0 : index
    %c0_289 = arith.constant 0 : index
    %718 = vector.load %arg17[%c1_287, %c0_288, %c0_289] : memref<2x1x32xf32, #tpu.memory_space<vmem>>, vector<1x1x32xf32>
    %719 = vector.shape_cast %718 : vector<1x1x32xf32> to vector<1x32xf32>
    %c1_290 = arith.constant 1 : index
    %c0_291 = arith.constant 0 : index
    %c0_292 = arith.constant 0 : index
    %720 = vector.load %arg18[%c1_290, %c0_291, %c0_292] : memref<2x1x32xf32, #tpu.memory_space<vmem>>, vector<1x1x32xf32>
    %721 = vector.shape_cast %720 : vector<1x1x32xf32> to vector<1x32xf32>
    %cst_293 = arith.constant dense<0.000000e+00> : vector<16xf32>
    %722 = vector.multi_reduction <add>, %717, %cst_293 [1] : vector<16x32xf32> to vector<16xf32>
    %723 = vector.shape_cast %722 : vector<16xf32> to vector<16x1xf32>
    %cst_294 = arith.constant 3.200000e+01 : f32
    %724 = vector.broadcast %cst_294 : f32 to vector<16x1xf32>
    %725 = arith.divf %723, %724 : vector<16x1xf32>
    %726 = vector.broadcast %725 : vector<16x1xf32> to vector<16x32xf32>
    %727 = arith.subf %717, %726 : vector<16x32xf32>
    %728 = vector.broadcast %725 : vector<16x1xf32> to vector<16x32xf32>
    %729 = arith.subf %717, %728 : vector<16x32xf32>
    %730 = arith.mulf %727, %729 : vector<16x32xf32>
    %cst_295 = arith.constant dense<0.000000e+00> : vector<16xf32>
    %731 = vector.multi_reduction <add>, %730, %cst_295 [1] : vector<16x32xf32> to vector<16xf32>
    %732 = vector.shape_cast %731 : vector<16xf32> to vector<16x1xf32>
    %cst_296 = arith.constant 3.200000e+01 : f32
    %733 = vector.broadcast %cst_296 : f32 to vector<16x1xf32>
    %734 = arith.divf %732, %733 : vector<16x1xf32>
    %735 = vector.broadcast %725 : vector<16x1xf32> to vector<16x32xf32>
    %736 = arith.subf %717, %735 : vector<16x32xf32>
    %cst_297 = arith.constant 9.99999974E-6 : f32
    %737 = vector.broadcast %cst_297 : f32 to vector<16x1xf32>
    %738 = arith.addf %734, %737 : vector<16x1xf32>
    %739 = math.rsqrt %738 : vector<16x1xf32>
    %740 = vector.broadcast %739 : vector<16x1xf32> to vector<16x32xf32>
    %741 = arith.mulf %736, %740 : vector<16x32xf32>
    %742 = vector.broadcast %719 : vector<1x32xf32> to vector<16x32xf32>
    %743 = arith.mulf %741, %742 : vector<16x32xf32>
    %744 = vector.broadcast %721 : vector<1x32xf32> to vector<16x32xf32>
    %745 = arith.addf %743, %744 : vector<16x32xf32>
    %c0_298 = arith.constant 0 : index
    %c0_299 = arith.constant 0 : index
    %746 = vector.load %arg23[%c0_298, %c0_299] : memref<32x1xf32, #tpu.memory_space<vmem>>, vector<32x1xf32>
    %cst_300 = arith.constant dense<0.000000e+00> : vector<16x1xf32>
    %747 = tpu.matmul %745, %746, %cst_300 {dimension_numbers = #tpu.dot_dimension_numbers<[1], [0], [0], [1], [0, 0, 1, 1], [], []>} : vector<16x32xf32>, vector<32x1xf32>, vector<16x1xf32> -> vector<16x1xf32>
    %c0_301 = arith.constant 0 : index
    %c0_302 = arith.constant 0 : index
    %748 = vector.load %arg24[%c0_301, %c0_302] : memref<1x1xf32, #tpu.memory_space<vmem>>, vector<1x1xf32>
    %749 = vector.broadcast %748 : vector<1x1xf32> to vector<16x1xf32>
    %750 = arith.addf %747, %749 : vector<16x1xf32>
    %c0_303 = arith.constant 0 : index
    %c0_304 = arith.constant 0 : index
    %751 = vector.load %arg25[%c0_303, %c0_304] : memref<16x1xf32, #tpu.memory_space<vmem>>, vector<16x1xf32>
    tpu.vector_store %arg25[%c0_303, %c0_304], %750 {strides = array<i32>} : memref<16x1xf32, #tpu.memory_space<vmem>>, vector<16x1xf32>,
    return
  }
}

</mosaic_0001>

<bundles_post_ra>
// kernel: tpu_custom_call.1
= control target key start
LH: loop header
LB: loop body
LE: loop exit
PB: predicated region body
PF: predicated region fallthrough
CT: control target
= control target key end

     0   :  { %s10032_s0 = inlined_call_operand.vmem [shape: f32[32,4], index: 0, kind: input, shape index: {}]   ;;  %s10033_s1 = inlined_call_operand.hbm [shape: f32[4,32], index: 1, kind: input, shape index: {}]   ;;  %s10034_s2 = inlined_call_operand.vmem [shape: f32[1,32], index: 2, kind: input, shape index: {}]   ;;  %s10035_s3 = inlined_call_operand.vmem [shape: f32[2,32,96], index: 3, kind: input, shape index: {}]   ;;  %s10036_s4 = inlined_call_operand.hbm [shape: f32[2,1,96], index: 4, kind: input, shape index: {}]   ;;  %s10037_s5 = inlined_call_operand.vmem [shape: f32[2,32,32], index: 5, kind: input, shape index: {}]   ;;  %s10038_s6 = inlined_call_operand.hbm [shape: f32[2,1,32], index: 6, kind: input, shape index: {}]   ;;  %s10039_s7 = inlined_call_operand.vmem [shape: f32[2,32,32], index: 7, kind: input, shape index: {}]   ;;  %s10040_s8 = inlined_call_operand.hbm [shape: f32[2,1,32], index: 8, kind: input, shape index: {}]   ;;  %s10041_s9 = inlined_call_operand.vmem [shape: f32[2,32,64], index: 9, kind: input, shape index: {}]   ;;  %s10042_s10 = inlined_call_operand.hbm [shape: f32[2,1,64], index: 10, kind: input, shape index: {}]   ;;  %s10043_s11 = inlined_call_operand.hbm [shape: f32[2,32,32], index: 11, kind: input, shape index: {}]   ;;  %s10044_s12 = inlined_call_operand.hbm [shape: f32[2,1,32], index: 12, kind: input, shape index: {}]   ;;  %s10045_s13 = inlined_call_operand.hbm [shape: f32[2,1,32], index: 13, kind: input, shape index: {}]   ;;  %s10046_s14 = inlined_call_operand.hbm [shape: f32[2,1,32], index: 14, kind: input, shape index: {}]   ;;  %s10047_s15 = inlined_call_operand.hbm [shape: f32[2,1,32], index: 15, kind: input, shape index: {}]   ;;  %s10048_s16 = inlined_call_operand.vmem [shape: f32[2,1,32], index: 16, kind: input, shape index: {}]   ;;  %s10049_s17 = inlined_call_operand.vmem [shape: f32[2,1,32], index: 17, kind: input, shape index: {}]   ;;  %s10050_s18 = inlined_call_operand.vmem [shape: f32[2,1,32], index: 18, kind: input, shape index: {}]   ;;  %s10051_s19 = inlined_call_operand.hbm [shape: f32[2,32,64], index: 19, kind: input, shape index: {}]   ;;  %s10052_s20 = inlined_call_operand.vmem [shape: f32[2,1,64], index: 20, kind: input, shape index: {}]   ;;  %s10053_s21 = inlined_call_operand.vmem [shape: f32[2,64,32], index: 21, kind: input, shape index: {}]   ;;  %s10054_s22 = inlined_call_operand.vmem [shape: f32[2,1,32], index: 22, kind: input, shape index: {}]   ;;  %s10055_s23 = inlined_call_operand.vmem [shape: f32[32,1], index: 23, kind: input, shape index: {}]   ;;  %s10056_s24 = inlined_call_operand.<no memory space> [shape: f32[1,1], index: 24, kind: input, shape index: {}]   ;;  %s10057_s25 = inlined_call_operand.vmem [shape: f32[16,1], index: 25, kind: output, shape index: {}]  }
   0x1   :  { %10075 = sst [smem:[#allocation26_spill]] %s10032_s0  ;;  %v30_v0 = vstv %s10056_s24 }
   0x2   :  { %10076 = sst [smem:[#allocation27_spill]] %s10033_s1  ;;  %31 = vst [vmem:[#allocation2] sm:$0x1] %v30_v0 }
   0x3   :  { %10077 = sst [smem:[#allocation28_spill]] %s10034_s2 }
   0x4   :  { %10078 = sst [smem:[#allocation29_spill]] %s10035_s3 }
   0x5   :  { %10079 = sst [smem:[#allocation30_spill]] %s10036_s4 }
   0x6   :  { %10080 = sst [smem:[#allocation31_spill]] %s10037_s5 }
   0x7   :  { %10081 = sst [smem:[#allocation32_spill]] %s10038_s6 }
   0x8   :  { %10082 = sst [smem:[#allocation33_spill]] %s10039_s7 }
   0x9   :  { %10083 = sst [smem:[#allocation34_spill]] %s10040_s8 }
   0xa   :  { %10084 = sst [smem:[#allocation35_spill]] %s10041_s9 }
   0xb   :  { %10085 = sst [smem:[#allocation36_spill]] %s10055_s23 }
   0xc   :  { %10086 = sst [smem:[#allocation37_spill]] %s10057_s25 }
   0xd   :  { %32 = vsyncpa [#allocation4], 0 }
   0xe   :  { %33 = vsyncpa [#allocation6], 0 }
   0xf   :  { %34 = vsyncpa [#allocation9], 0 }
  0x10   :  { %35 = vsyncpa [#allocation12], 0 }
  0x11   :  { %36 = vsyncpa [#allocation15], 0 }
  0x12   :  { %37 = vsyncpa [#allocation18], 0  ;;  %s8835_s6 = smov [#allocation5]   ;;  %s10087_s26 = sld [smem:[#allocation30_spill]] }
  0x13   :  { %s59_s30 = sshll.u32 %s8835_s6, 4  ;;  %s60_s30 = int_to_ptr.vmem [resolvable:$true] %s59_s30 }
  0x18   :  { %s8581_s1 = scalar_lea.hbm %s10087_s26, 32 }
  0x19   :  { %p8582_p0 = scmp.ne.s32.totalorder %s10087_s26, %s8581_s1  ;;  %p8585_p1 = scmp.lt.u32.totalorder %s8581_s1, %s10087_s26 }
  0x1b   :  { %p8587_p2 = pnand %p8585_p1, %p8582_p0 }
  0x1d   :  { %8590 = shalt.err (!%p8587_p2)
}
  0x1e   :  { %s8591_s28 = scalar_lea.vmem %s60_s30, 32  ;;  %p8596_p4 = scmp.lt.s32.totalorder %s60_s30, %s60_s30 }
  0x1f   :  { %p8592_p3 = scmp.ne.s32.totalorder %s60_s30, %s8591_s28  ;;  %p8597_p5 = scmp.lt.s32.totalorder %s8591_s28, %s8591_s28 }
  0x21   :  { %p8598_p6 = por %p8597_p5, %p8596_p4 }
  0x23   :  { %p8599_p7 = pnand %p8598_p6, %p8592_p3 }
  0x25   :  { %8602 = shalt.err (!%p8599_p7)
}
  0x26   :  { %s10073_s9 = smov 16   ;;  %s8837_s5 = smov 1  }
  0x27   :  { %65 = dma.hbm_to_vmem [thread:$0]  %s10087_s26, 32, %s60_s30, [#allocation6], %s10073_s9, %s10073_s9, %s8837_s5  }
  0x28   :  { %s8838_s2 = smov [#allocation8]   ;;  %s8839_s7 = smov [#allocation11]  }
  0x29   :  { %s87_s6 = sshll.u32 %s8838_s2, 4  ;;  %s113_s3 = sshll.u32 %s8839_s7, 4  ;;  %s88_s6 = int_to_ptr.vmem [resolvable:$true] %s87_s6  ;;  %s114_s3 = int_to_ptr.vmem [resolvable:$true] %s113_s3 }
  0x2a   :  { %s10088_s27 = sld [smem:[#allocation34_spill]] }
  0x30   :  { %s8603_s4 = scalar_lea.hbm %s10088_s27, 32 }
  0x31   :  { %p8604_p8 = scmp.ne.s32.totalorder %s10088_s27, %s8603_s4  ;;  %p8607_p9 = scmp.lt.u32.totalorder %s8603_s4, %s10088_s27 }
  0x33   :  { %p8609_p10 = pnand %p8607_p9, %p8604_p8 }
  0x35   :  { %8612 = shalt.err (!%p8609_p10)
}
  0x36   :  { %s8613_s30 = scalar_lea.vmem %s88_s6, 32  ;;  %p8618_p12 = scmp.lt.s32.totalorder %s88_s6, %s88_s6 }
  0x37   :  { %p8614_p11 = scmp.ne.s32.totalorder %s88_s6, %s8613_s30  ;;  %p8619_p13 = scmp.lt.s32.totalorder %s8613_s30, %s8613_s30 }
  0x39   :  { %p8620_p0 = por %p8619_p13, %p8618_p12 }
  0x3b   :  { %p8621_p1 = pnand %p8620_p0, %p8614_p11 }
  0x3d   :  { %8624 = shalt.err (!%p8621_p1)
}
  0x3e   :  { %93 = dma.hbm_to_vmem [thread:$0]  %s10088_s27, 32, %s88_s6, [#allocation9], %s10073_s9, %s10073_s9, %s8837_s5  }
  0x3f   :  { %s8625_s25 = scalar_lea.hbm %s10043_s11, 1024 }
  0x40   :  { %p8626_p2 = scmp.ne.s32.totalorder %s10043_s11, %s8625_s25  ;;  %p8629_p3 = scmp.lt.u32.totalorder %s8625_s25, %s10043_s11 }
  0x42   :  { %p8631_p4 = pnand %p8629_p3, %p8626_p2 }
  0x44   :  { %8634 = shalt.err (!%p8631_p4)
}
  0x45   :  { %s8635_s4 = scalar_lea.vmem %s114_s3, 1024  ;;  %p8640_p6 = scmp.lt.s32.totalorder %s114_s3, %s114_s3 }
  0x46   :  { %p8636_p5 = scmp.ne.s32.totalorder %s114_s3, %s8635_s4  ;;  %p8641_p7 = scmp.lt.s32.totalorder %s8635_s4, %s8635_s4 }
  0x48   :  { %p8642_p8 = por %p8641_p7, %p8640_p6 }
  0x4a   :  { %p8643_p9 = pnand %p8642_p8, %p8636_p5 }
  0x4c   :  { %8646 = shalt.err (!%p8643_p9)
}
  0x4d   :  { %s8840_s6 = smov 128   ;;  %s8841_s27 = smov 8  }
  0x4e   :  { %119 = dma.hbm_to_vmem [thread:$0]  %s10043_s11, 1024, %s114_s3, [#allocation12], %s8840_s6, %s8840_s6, %s8841_s27  }
  0x4f   :  { %s8842_s30 = smov [#allocation14]   ;;  %s8843_s0 = smov [#allocation17]  }
  0x50   :  { %s137_s26 = sshll.u32 %s8842_s30, 4  ;;  %s161_s29 = sshll.u32 %s8843_s0, 4  ;;  %s138_s26 = int_to_ptr.vmem [resolvable:$true] %s137_s26  ;;  %s162_s29 = int_to_ptr.vmem [resolvable:$true] %s161_s29 }
  0x51   :  { %s8647_s2 = scalar_lea.hbm %s10045_s13, 32 }
  0x52   :  { %p8648_p10 = scmp.ne.s32.totalorder %s10045_s13, %s8647_s2  ;;  %p8651_p11 = scmp.lt.u32.totalorder %s8647_s2, %s10045_s13 }
  0x54   :  { %p8653_p12 = pnand %p8651_p11, %p8648_p10 }
  0x56   :  { %8656 = shalt.err (!%p8653_p12)
}
  0x57   :  { %s8657_s11 = scalar_lea.vmem %s138_s26, 32  ;;  %p8662_p0 = scmp.lt.s32.totalorder %s138_s26, %s138_s26 }
  0x58   :  { %p8658_p13 = scmp.ne.s32.totalorder %s138_s26, %s8657_s11  ;;  %p8663_p1 = scmp.lt.s32.totalorder %s8657_s11, %s8657_s11 }
  0x5a   :  { %p8664_p2 = por %p8663_p1, %p8662_p0 }
  0x5c   :  { %p8665_p3 = pnand %p8664_p2, %p8658_p13 }
  0x5e   :  { %8668 = shalt.err (!%p8665_p3)
}
  0x5f   :  { %143 = dma.hbm_to_vmem [thread:$0]  %s10045_s13, 32, %s138_s26, [#allocation15], %s10073_s9, %s10073_s9, %s8837_s5  }
  0x60   :  { %s8669_s0 = scalar_lea.hbm %s10047_s15, 32 }
  0x61   :  { %p8670_p4 = scmp.ne.s32.totalorder %s10047_s15, %s8669_s0  ;;  %p8673_p5 = scmp.lt.u32.totalorder %s8669_s0, %s10047_s15 }
  0x63   :  { %p8675_p6 = pnand %p8673_p5, %p8670_p4 }
  0x65   :  { %8678 = shalt.err (!%p8675_p6)
}
  0x66   :  { %s8679_s1 = scalar_lea.vmem %s162_s29, 32  ;;  %p8684_p8 = scmp.lt.s32.totalorder %s162_s29, %s162_s29 }
  0x67   :  { %p8680_p7 = scmp.ne.s32.totalorder %s162_s29, %s8679_s1  ;;  %p8685_p9 = scmp.lt.s32.totalorder %s8679_s1, %s8679_s1 }
  0x69   :  { %p8686_p10 = por %p8685_p9, %p8684_p8 }
  0x6b   :  { %p8687_p11 = pnand %p8686_p10, %p8680_p7 }
  0x6d   :  { %8690 = shalt.err (!%p8687_p11)
}
  0x6e   :  { %167 = dma.hbm_to_vmem [thread:$0]  %s10047_s15, 32, %s162_s29, [#allocation18], %s10073_s9, %s10073_s9, %s8837_s5  }
  0x6f   :  { %s8844_s8 = smov [#allocation3]   ;;  %s8845_s11 = smov [#allocation7]  }
  0x70   :  { %s46_s4 = sshll.u32 %s8844_s8, 4  ;;  %s73_s3 = sshll.u32 %s8845_s11, 4  ;;  %s47_s4 = int_to_ptr.vmem [resolvable:$true] %s46_s4  ;;  %s74_s3 = int_to_ptr.vmem [resolvable:$true] %s73_s3 }
  0x71   :  { %s10089_s30 = sld [smem:[#allocation27_spill]] }
  0x77   :  { %s8691_s0 = scalar_lea.hbm %s10089_s30, 64 }
  0x78   :  { %p8692_p12 = scmp.ne.s32.totalorder %s10089_s30, %s8691_s0  ;;  %p8695_p13 = scmp.lt.u32.totalorder %s8691_s0, %s10089_s30 }
  0x7a   :  { %p8697_p0 = pnand %p8695_p13, %p8692_p12 }
  0x7c   :  { %8700 = shalt.err (!%p8697_p0)
}
  0x7d   :  { %s8701_s15 = scalar_lea.vmem %s47_s4, 64  ;;  %p8706_p2 = scmp.lt.s32.totalorder %s47_s4, %s47_s4 }
  0x7e   :  { %p8702_p1 = scmp.ne.s32.totalorder %s47_s4, %s8701_s15  ;;  %p8707_p3 = scmp.lt.s32.totalorder %s8701_s15, %s8701_s15 }
  0x80   :  { %p8708_p4 = por %p8707_p3, %p8706_p2 }
  0x82   :  { %p8709_p5 = pnand %p8708_p4, %p8702_p1 }
  0x84   :  { %8712 = shalt.err (!%p8709_p5)
}
  0x85   :  { %49 = dma.hbm_to_vmem [thread:$0]  %s10089_s30, 64, %s47_s4, [#allocation4]  }
  0x86   :  { %s10090_s8 = sld [smem:[#allocation32_spill]] }
  0x8c   :  { %s8713_s11 = scalar_lea.hbm %s10090_s8, 32 }
  0x8d   :  { %p8714_p6 = scmp.ne.s32.totalorder %s10090_s8, %s8713_s11  ;;  %p8717_p7 = scmp.lt.u32.totalorder %s8713_s11, %s10090_s8 }
  0x8f   :  { %p8719_p8 = pnand %p8717_p7, %p8714_p6 }
  0x91   :  { %8722 = shalt.err (!%p8719_p8)
}
  0x92   :  { %s8723_s25 = scalar_lea.vmem %s74_s3, 32  ;;  %p8728_p10 = scmp.lt.s32.totalorder %s74_s3, %s74_s3 }
  0x93   :  { %p8724_p9 = scmp.ne.s32.totalorder %s74_s3, %s8723_s25  ;;  %p8729_p11 = scmp.lt.s32.totalorder %s8723_s25, %s8723_s25 }
  0x95   :  { %p8730_p12 = por %p8729_p11, %p8728_p10 }
  0x97   :  { %p8731_p13 = pnand %p8730_p12, %p8724_p9 }
  0x99   :  { %8734 = shalt.err (!%p8731_p13)
}
  0x9a   :  { %79 = dma.hbm_to_vmem [thread:$0]  %s10090_s8, 32, %s74_s3, [#allocation6], %s10073_s9, %s10073_s9, %s8837_s5  }
  0x9b   :  { %s8846_s2 = smov [#allocation10]   ;;  %s8847_s15 = smov [#allocation13]  }
  0x9c   :  { %s101_s7 = sshll.u32 %s8846_s2, 4  ;;  %s125_s29 = sshll.u32 %s8847_s15, 4  ;;  %s102_s7 = int_to_ptr.vmem [resolvable:$true] %s101_s7  ;;  %s126_s29 = int_to_ptr.vmem [resolvable:$true] %s125_s29 }
  0x9d   :  { %s8735_s26 = scalar_lea.hbm %s10042_s10, 32 }
  0x9e   :  { %p8736_p0 = scmp.ne.s32.totalorder %s10042_s10, %s8735_s26  ;;  %p8739_p1 = scmp.lt.u32.totalorder %s8735_s26, %s10042_s10 }
  0xa0   :  { %p8741_p2 = pnand %p8739_p1, %p8736_p0 }
  0xa2   :  { %8744 = shalt.err (!%p8741_p2)
}
  0xa3   :  { %s8745_s3 = scalar_lea.vmem %s102_s7, 32  ;;  %p8750_p4 = scmp.lt.s32.totalorder %s102_s7, %s102_s7 }
  0xa4   :  { %p8746_p3 = scmp.ne.s32.totalorder %s102_s7, %s8745_s3  ;;  %p8751_p5 = scmp.lt.s32.totalorder %s8745_s3, %s8745_s3 }
  0xa6   :  { %p8752_p6 = por %p8751_p5, %p8750_p4 }
  0xa8   :  { %p8753_p7 = pnand %p8752_p6, %p8746_p3 }
  0xaa   :  { %8756 = shalt.err (!%p8753_p7)
}
  0xab   :  { %107 = dma.hbm_to_vmem [thread:$0]  %s10042_s10, 32, %s102_s7, [#allocation9], %s10073_s9, %s10073_s9, %s8837_s5  }
  0xac   :  { %s8757_s30 = scalar_lea.hbm %s10044_s12, 32 }
  0xad   :  { %p8758_p8 = scmp.ne.s32.totalorder %s10044_s12, %s8757_s30  ;;  %p8761_p9 = scmp.lt.u32.totalorder %s8757_s30, %s10044_s12 }
  0xaf   :  { %p8763_p10 = pnand %p8761_p9, %p8758_p8 }
  0xb1   :  { %8766 = shalt.err (!%p8763_p10)
}
  0xb2   :  { %s8767_s26 = scalar_lea.vmem %s126_s29, 32  ;;  %p8772_p12 = scmp.lt.s32.totalorder %s126_s29, %s126_s29 }
  0xb3   :  { %p8768_p11 = scmp.ne.s32.totalorder %s126_s29, %s8767_s26  ;;  %p8773_p13 = scmp.lt.s32.totalorder %s8767_s26, %s8767_s26 }
  0xb5   :  { %p8774_p0 = por %p8773_p13, %p8772_p12 }
  0xb7   :  { %p8775_p1 = pnand %p8774_p0, %p8768_p11 }
  0xb9   :  { %8778 = shalt.err (!%p8775_p1)
}
  0xba   :  { %131 = dma.hbm_to_vmem [thread:$0]  %s10044_s12, 32, %s126_s29, [#allocation12], %s10073_s9, %s10073_s9, %s8837_s5  }
  0xbb   :  { %s8848_s11 = smov [#allocation16]   ;;  %s8849_s28 = smov [#allocation19]  }
  0xbc   :  { %s149_s24 = sshll.u32 %s8848_s11, 4  ;;  %s179_s0 = sshll.u32 %s8849_s28, 4  ;;  %s150_s24 = int_to_ptr.vmem [resolvable:$true] %s149_s24  ;;  %s180_s0 = int_to_ptr.vmem [resolvable:$true] %s179_s0 }
  0xbd   :  { %s8779_s23 = scalar_lea.hbm %s10046_s14, 32 }
  0xbe   :  { %p8780_p2 = scmp.ne.s32.totalorder %s10046_s14, %s8779_s23  ;;  %p8783_p3 = scmp.lt.u32.totalorder %s8779_s23, %s10046_s14 }
  0xc0   :  { %p8785_p4 = pnand %p8783_p3, %p8780_p2 }
  0xc2   :  { %8788 = shalt.err (!%p8785_p4)
}
  0xc3   :  { %s8789_s12 = scalar_lea.vmem %s150_s24, 32  ;;  %p8794_p6 = scmp.lt.s32.totalorder %s150_s24, %s150_s24 }
  0xc4   :  { %p8790_p5 = scmp.ne.s32.totalorder %s150_s24, %s8789_s12  ;;  %p8795_p7 = scmp.lt.s32.totalorder %s8789_s12, %s8789_s12 }
  0xc6   :  { %p8796_p8 = por %p8795_p7, %p8794_p6 }
  0xc8   :  { %p8797_p9 = pnand %p8796_p8, %p8790_p5 }
  0xca   :  { %8800 = shalt.err (!%p8797_p9)
}
  0xcb   :  { %155 = dma.hbm_to_vmem [thread:$0]  %s10046_s14, 32, %s150_s24, [#allocation15], %s10073_s9, %s10073_s9, %s8837_s5  }
  0xcc   :  { %s8801_s26 = scalar_lea.hbm %s10051_s19, 1024 }
  0xcd   :  { %p8802_p10 = scmp.ne.s32.totalorder %s10051_s19, %s8801_s26  ;;  %p8805_p11 = scmp.lt.u32.totalorder %s8801_s26, %s10051_s19 }
  0xcf   :  { %p8807_p12 = pnand %p8805_p11, %p8802_p10 }
  0xd1   :  { %8810 = shalt.err (!%p8807_p12)
}
  0xd2   :  { %s8811_s3 = scalar_lea.vmem %s180_s0, 1024  ;;  %p8816_p0 = scmp.lt.s32.totalorder %s180_s0, %s180_s0 }
  0xd3   :  { %p8812_p13 = scmp.ne.s32.totalorder %s180_s0, %s8811_s3  ;;  %p8817_p1 = scmp.lt.s32.totalorder %s8811_s3, %s8811_s3 }
  0xd5   :  { %p8818_p2 = por %p8817_p1, %p8816_p0 }
  0xd7   :  { %p8819_p3 = pnand %p8818_p2, %p8812_p13 }
  0xd9   :  { %8822 = shalt.err (!%p8819_p3)
}
  0xda   :  { %185 = dma.hbm_to_vmem [thread:$0]  %s10051_s19, 1024, %s180_s0, [#allocation18], %s8840_s6, %s8840_s6, %s8841_s27  }
  0xdb   :  { %8823 = dma.done.wait [#allocation4], 64  }
  0xdc   :  { %8824 = vsyncadd [#allocation4], 4294967232 }
  0xdd   :  { %8825 = dma.done.wait [#allocation6], 64  }
  0xde   :  { %8826 = vsyncadd [#allocation6], 4294967232 }
  0xdf   :  { %8827 = dma.done.wait [#allocation9], 64  }
  0xe0   :  { %8828 = vsyncadd [#allocation9], 4294967232 }
  0xe1   :  { %8829 = dma.done.wait [#allocation12], 1056  }
  0xe2   :  { %8830 = vsyncadd [#allocation12], 4294966240 }
  0xe3   :  { %8831 = dma.done.wait [#allocation15], 64  }
  0xe4   :  { %8832 = vsyncadd [#allocation15], 4294967232 }
  0xe5   :  { %8833 = dma.done.wait [#allocation18], 1056  }
  0xe6   :  { %8834 = vsyncadd [#allocation18], 4294966240  ;;  %vm254_vm0 = vcmask 1043456   ;;  %vm241_vm1 = vcmask 31744   ;;  %v233_v1 = vld [vmem:[#allocation3] sm:$0xf] }
  0xe7   :  { %s10091_s23 = sld [smem:[#allocation26_spill]]  ;;  %7755 = vmatprep.subr.msk.mxu1 %vm254_vm0, %v233_v1  ;;  %s10092_s4 = sld [smem:[#allocation29_spill]]  ;;  %vm354_vm2 = vcmask 261120   ;;  %v8850_v19 = vmov 0.0   ;;  %vm8851_vm3 = vmmov 0   ;;  %vm444_vm4 = vcmask 64512  }
  0xe8   :  { %7756 = vmatpush3.msk.msra.mxu1 %vm254_vm0, %v233_v1  ;;  %s10093_s3 = sld [smem:[#allocation28_spill]]  ;;  %7774 = vmatprep.subr.mxu0 %v8850_v19  ;;  %v7342_v20 = vld [vmem:[#allocation5] ss:$0 sm:$0xff]  ;;  %s8852_s14 = smov 120   ;;  %vm1102_vm5 = vcmask 130048   ;;  %vm1104_vm6 = vcmask 195584  }
  0xe9   :  { %7776 = vmatprep.mubr.msk.f32.mxu0 %vm8851_vm3, %v8850_v19  ;;  %s8853_s5 = smov 96   ;;  %s8854_s24 = smov 80   ;;  %vm3655_vm7 = vcmask 523264   ;;  %vm7323_vm8 = vcmask 7168  }
  0xea   :  { %s8855_s8 = smov 88   ;;  %s8857_s19 = smov 112  }
  0xeb   :  { %s8858_s6 = smov 104   ;;  %s8859_s0 = smov 56  }
  0xec   :  { %s8860_s25 = smov 64   ;;  %s10069_s30 = smov 40  }
  0xed   :  { %v229_v2 = vld [vmem:[%s10091_s23] sm:$0xff]  ;;  %v230_v3 = vld [vmem:[%s10091_s23 + $0x8] sm:$0xff]  ;;  %v231_v6 = vld [vmem:[%s10091_s23 + $0x10] sm:$0xff]  ;;  %s8862_s2 = smov 48   ;;  %s10071_s12 = smov 24  }
  0xee   :  { %7757 = vmatprep.mubr.msk.f32.mxu1 %vm241_vm1, %v229_v2  ;;  %v343_v4 = vld [vmem:[%s10092_s4] sm:$0xff]  ;;  %v344_v5 = vld [vmem:[%s10092_s4 + $0x8] sm:$0xff]  ;;  %v345_v8 = vld [vmem:[%s10092_s4 + $0x10] sm:$0xff]  ;;  %s10094_s1 = sld [smem:[#allocation31_spill]]  ;;  %s10095_s15 = sld [smem:[#allocation35_spill]] }
  0xef   :  { %v8264_v7 = vpack.c.bf16 %v344_v5, %v343_v4  ;;  %7758 = vmatmul.mubr.msk.f32.vlgmr.msra.gmra.mrb[0].mxu1 %vm241_vm1, %v230_v3  ;;  %v346_v9 = vld [vmem:[%s10092_s4 + $0x18] sm:$0xff]  ;;  %v9190_v12 = vld [vmem:[%s10093_s3] ss:$0 sm:$0xff]  ;;  %s10096_s13 = sld [smem:[#allocation33_spill]] }
  0xf0   :  { %7760 = vmatprep.mubr.msk.f32.mxu1 %vm241_vm1, %v231_v6  ;;  %v232_v10 = vld [vmem:[%s10091_s23 + $0x18] sm:$0xff]  ;;  %v8268_v11 = vpack.c.bf16 %v346_v9, %v345_v8  ;;  %s8856_s23 = smov 72  }
  0xf1   :  { %8265 = vmatprep.subr.bf16.mxu1 %v8264_v7 }
  0xf2   :  { %8267 = vmatpush3.bf16.msra.mxu1 %v8264_v7 }
  0xf3   :  { %7761 = vmatmul.mubr.msk.f32.gmra.mrb[2].mxu1 %vm241_vm1, %v232_v10  ;;  %8269 = vmatprep.subr.bf16.mxu1 %v8268_v11 }
  0xf6   :  { %8271 = vmatpush3.bf16.msra.mxu1 %v8268_v11 }
  0xf7   :  { %7779 = vmatprep.subr.mxu1 %v8850_v19 }
 0x1c2   :  { %v7759_v13 = vpop.f32.mrb[0].mxu1 }
 0x1c3   :  { %v324_v14 = vpop.f32.mrb[1].mxu1  ;;  %v9196_v16 = vadd.f32 %v7759_v13, %v9190_v12 }
 0x1c4   :  { %v9193_v15 = vadd.f32 %v9190_v12, %v324_v14 }
 0x1c6   :  { %7771 = vmatprep.mubr.msk.f32.mxu1 %vm354_vm2, %v9193_v15  ;;  %v9202_v17 = vpop.f32.mrb[2].mxu1 }
 0x1c7   :  { %7772 = vmatmul.mubr.msk.f32.vlgmr.msra.gmra.mrb[4].mxu1 %vm354_vm2, %v9196_v16  ;;  %v9204_v18 = vpop.f32.mrb[3].mxu1 }
 0x1c8   :  { %7781 = vmatprep.mubr.msk.f32.mxu1 %vm8851_vm3, %v8850_v19 }
 0x29a   :  { %v7773_v21 = vpop.f32.mrb[4].mxu1 }
 0x29b   :  { %v427_v22 = vpop.f32.mrb[5].mxu1  ;;  %v9218_v24 = vadd.f32 %v7773_v21, %v7342_v20 }
 0x29c   :  { %v428_v23 = vadd.f32 %v7342_v20, %v427_v22 }
 0x29e   :  { %603 = vrot.lane.b32.xlu1 %v428_v23, %s8852_s14  ;;  %442 = vrot.lane.b32.xlu0 %v428_v23, %s8853_s5 }
 0x2a2   :  { %767 = vrot.lane.b32.xlu1 %v428_v23, %s8854_s24  ;;  %605 = vrot.lane.b32.xlu0 %v428_v23, %s8855_s8 }
 0x2a6   :  { %929 = vrot.lane.b32.xlu1 %v428_v23, %s8856_s23  ;;  %765 = vrot.lane.b32.xlu0 %v428_v23, %s8857_s19 }
 0x2aa   :  { %1107 = vrot.lane.b32.xlu1 %v9218_v24, %s8853_s5  ;;  %927 = vrot.lane.b32.xlu0 %v428_v23, %s8858_s6 }
 0x2ae   :  { %1267 = vrot.lane.b32.xlu1 %v9218_v24, %s8852_s14  ;;  %1269 = vrot.lane.b32.xlu0 %v9218_v24, %s8855_s8 }
 0x2b2   :  { %1429 = vrot.lane.b32.xlu1 %v9218_v24, %s8857_s19  ;;  %1431 = vrot.lane.b32.xlu0 %v9218_v24, %s8854_s24 }
 0x2b6   :  { %1591 = vrot.lane.b32.xlu1 %v9218_v24, %s8858_s6  ;;  %1593 = vrot.lane.b32.xlu0 %v9218_v24, %s8856_s23 }
 0x2ba   :  { %689 = vrot.lane.b32.xlu1 %v428_v23, %s8859_s0  ;;  %527 = vrot.lane.b32.xlu0 %v428_v23, %s8860_s25 }
 0x2be   :  { %1013 = vrot.lane.b32.xlu1 %v428_v23, %s10069_s30  ;;  %851 = vrot.lane.b32.xlu0 %v428_v23, %s8862_s2 }
 0x310   :  { %v604_v25 = vpop.permute.xlu1 %603  ;;  %v443_v26 = vpop.permute.xlu0 %442 }
 0x311   :  { %7775 = vmatpush3.xpose.msk.msra.mxu0 %vm444_vm4, %v443_v26 }
 0x312   :  { %7784 = vmatprep.subr.mxu0 %v8850_v19 }
 0x314   :  { %v768_v27 = vpop.permute.xlu1 %767  ;;  %7777 = vmatmul.mubr.msk.f32.vlgmr.msra.gmra.mrb[0].mxu0 %vm444_vm4, %v428_v23  ;;  %v606_v28 = vpop.permute.xlu0 %605 }
 0x315   :  { %7785 = vmatpush3.xpose.msk.msra.mxu0 %vm444_vm4, %v606_v28  ;;  %7786 = vmatprep.mubr.msk.f32.mxu0 %vm8851_vm3, %v8850_v19 }
 0x316   :  { %7794 = vmatprep.subr.mxu0 %v8850_v19 }
 0x318   :  { %v930_v29 = vpop.permute.xlu1 %929  ;;  %7787 = vmatmul.mubr.msk.f32.vlgmr.msra.gmra.mrb[2].mxu0 %vm444_vm4, %v604_v25  ;;  %v766_v30 = vpop.permute.xlu0 %765 }
 0x319   :  { %7795 = vmatpush3.xpose.msk.msra.mxu0 %vm444_vm4, %v768_v27  ;;  %7796 = vmatprep.mubr.msk.f32.mxu0 %vm8851_vm3, %v8850_v19 }
 0x31a   :  { %7804 = vmatprep.subr.mxu0 %v8850_v19 }
 0x31c   :  { %7797 = vmatmul.mubr.msk.f32.vlgmr.msra.gmra.mrb[4].mxu0 %vm444_vm4, %v766_v30  ;;  %v928_v31 = vpop.permute.xlu0 %927  ;;  %v1108_v32 = vpop.permute.xlu1 %1107 }
 0x31d   :  { %7805 = vmatpush3.xpose.msk.msra.mxu0 %vm444_vm4, %v930_v29  ;;  %7806 = vmatprep.mubr.msk.f32.mxu0 %vm8851_vm3, %v8850_v19 }
 0x31e   :  { %7814 = vmatprep.subr.mxu0 %v8850_v19 }
 0x320   :  { %7807 = vmatmul.mubr.msk.f32.vlgmr.msra.gmra.mrb[6].mxu0 %vm444_vm4, %v928_v31  ;;  %v1270_v33 = vpop.permute.xlu0 %1269  ;;  %v1268_v34 = vpop.permute.xlu1 %1267 }
 0x321   :  { %7815 = vmatpush3.xpose.msk.msra.mxu0 %vm444_vm4, %v1108_v32  ;;  %7816 = vmatprep.mubr.msk.f32.mxu0 %vm8851_vm3, %v8850_v19 }
 0x322   :  { %7824 = vmatprep.subr.mxu0 %v8850_v19 }
 0x324   :  { %7817 = vmatmul.mubr.msk.f32.vlgmr.msra.gmra.mrb[8].mxu0 %vm444_vm4, %v9218_v24  ;;  %v1432_v35 = vpop.permute.xlu0 %1431  ;;  %v1430_v37 = vpop.permute.xlu1 %1429 }
 0x325   :  { %7825 = vmatpush3.xpose.msk.msra.mxu0 %vm444_vm4, %v1270_v33  ;;  %7826 = vmatprep.mubr.msk.f32.mxu0 %vm8851_vm3, %v8850_v19 }
 0x326   :  { %7834 = vmatprep.subr.mxu0 %v8850_v19 }
 0x328   :  { %7827 = vmatmul.mubr.msk.f32.vlgmr.msra.gmra.mrb[10].mxu0 %vm444_vm4, %v1268_v34  ;;  %v1594_v36 = vpop.permute.xlu0 %1593  ;;  %v1592_v39 = vpop.permute.xlu1 %1591 }
 0x329   :  { %7835 = vmatpush3.xpose.msk.msra.mxu0 %vm444_vm4, %v1432_v35  ;;  %7836 = vmatprep.mubr.msk.f32.mxu0 %vm8851_vm3, %v8850_v19 }
 0x32a   :  { %7844 = vmatprep.subr.mxu0 %v8850_v19 }
 0x32c   :  { %7837 = vmatmul.mubr.msk.f32.vlgmr.msra.gmra.mrb[12].mxu0 %vm444_vm4, %v1430_v37  ;;  %v528_v38 = vpop.permute.xlu0 %527  ;;  %v690_v31 = vpop.permute.xlu1 %689 }
 0x32d   :  { %7780 = vmatpush3.msra.mxu1 %v528_v38  ;;  %7845 = vmatpush3.xpose.msk.msra.mxu0 %vm444_vm4, %v1594_v36 }
 0x32e   :  { %7846 = vmatprep.mubr.msk.f32.mxu0 %vm8851_vm3, %v8850_v19  ;;  %7789 = vmatprep.subr.mxu1 %v8850_v19 }
 0x330   :  { %7847 = vmatmul.mubr.msk.f32.vlgmr.msra.gmra.mrb[14].mxu0 %vm444_vm4, %v1592_v39  ;;  %v852_v32 = vpop.permute.xlu0 %851  ;;  %v1014_v33 = vpop.permute.xlu1 %1013 }
 0x3e7   :  { %v515_v40 = vpop.f32.mrb[0].mxu0 }
 0x3e8   :  { %v519_v41 = vmul.f32 0.35355338, %v515_v40  ;;  %v7778_v42 = vpop.f32.mrb[1].mxu0 }
 0x3ea   :  { %v520_v43 = vmul.f32 1.442695, %v519_v41 }
 0x3eb   :  { %v677_v44 = vpop.f32.mrb[2].mxu0 }
 0x3ec   :  { %8429 = vpow2.f32 %v520_v43  ;;  %v681_v45 = vmul.f32 0.35355338, %v677_v44  ;;  %v7788_v46 = vpop.f32.mrb[3].mxu0 }
 0x3ee   :  { %v682_v47 = vmul.f32 1.442695, %v681_v45 }
 0x3ef   :  { %v839_v48 = vpop.f32.mrb[4].mxu0 }
 0x3f0   :  { %8431 = vpow2.f32 %v682_v47  ;;  %v843_v49 = vmul.f32 0.35355338, %v839_v48  ;;  %v7798_v50 = vpop.f32.mrb[5].mxu0 }
 0x3f2   :  { %v844_v51 = vmul.f32 1.442695, %v843_v49 }
 0x3f3   :  { %v1001_v52 = vpop.f32.mrb[6].mxu0 }
 0x3f4   :  { %8433 = vpow2.f32 %v844_v51  ;;  %v1005_v53 = vmul.f32 0.35355338, %v1001_v52  ;;  %v7808_v54 = vpop.f32.mrb[7].mxu0 }
 0x3f6   :  { %v8430_v55 = vpop.eup %8429  ;;  %v1006_v56 = vmul.f32 1.442695, %v1005_v53 }
 0x3f7   :  { %v1179_v57 = vpop.f32.mrb[8].mxu0  ;;  %v522_v58 = vsel %vm444_vm4, %v8430_v55, 0.0 }
 0x3f8   :  { %8435 = vpow2.f32 %v1006_v56  ;;  %523 = vadd.xlane.f32.xlu0 %v522_v58  ;;  %v7818_v59 = vpop.f32.mrb[9].mxu0  ;;  %v1183_v8 = vmul.f32 0.35355338, %v1179_v57 }
 0x3fa   :  { %v8432_v60 = vpop.eup %8431  ;;  %v1184_v9 = vmul.f32 1.442695, %v1183_v8  ;;  %v438_v8 = vld [vmem:[%s10094_s1 + $0x10] sm:$0xff] }
 0x3fb   :  { %v1341_v61 = vpop.f32.mrb[10].mxu0  ;;  %v684_v62 = vsel %vm444_vm4, %v8432_v60, 0.0 }
 0x3fc   :  { %685 = vadd.xlane.f32.xlu1 %v684_v62  ;;  %v7828_v63 = vpop.f32.mrb[11].mxu0  ;;  %v1345_v11 = vmul.f32 0.35355338, %v1341_v61  ;;  %8437 = vpow2.f32 %v1184_v9  ;;  %v439_v9 = vld [vmem:[%s10094_s1 + $0x18] sm:$0xff] }
 0x3fe   :  { %v8434_v0 = vpop.eup %8433  ;;  %v1346_v20 = vmul.f32 1.442695, %v1345_v11  ;;  %v8276_v11 = vpack.c.bf16 %v439_v9, %v438_v8 }
 0x3ff   :  { %v1503_v1 = vpop.f32.mrb[12].mxu0  ;;  %v846_v2 = vsel %vm444_vm4, %v8434_v0, 0.0 }
 0x400   :  { %847 = vadd.xlane.f32.xlu0 %v846_v2  ;;  %v7838_v3 = vpop.f32.mrb[13].mxu0  ;;  %v1507_v10 = vmul.f32 0.35355338, %v1503_v1 }
 0x402   :  { %v9281_v4 = vpop.eup %8435  ;;  %v1508_v13 = vmul.f32 1.442695, %v1507_v10 }
 0x403   :  { %v1665_v5 = vpop.f32.mrb[14].mxu0  ;;  %v1008_v6 = vsel %vm444_vm4, %v9281_v4, 0.0 }
 0x404   :  { %1009 = vadd.xlane.f32.xlu0 %v1008_v6  ;;  %v7848_v7 = vpop.f32.mrb[15].mxu0  ;;  %v1669_v14 = vmul.f32 0.35355338, %v1665_v5  ;;  %8439 = vpow2.f32 %v1508_v13  ;;  %v436_v5 = vld [vmem:[%s10094_s1] sm:$0xff]  ;;  %v437_v6 = vld [vmem:[%s10094_s1 + $0x8] sm:$0xff] }
 0x405   :  { %8441 = vpow2.f32 %v1346_v20  ;;  %v8272_v7 = vpack.c.bf16 %v437_v6, %v436_v5  ;;  %v1995_v20 = vld [vmem:[%s10095_s15 + $0x8] sm:$0xff]  ;;  %v1905_v5 = vld [vmem:[%s10096_s13 + $0x18] sm:$0xff] }
 0x406   :  { %v1670_v21 = vmul.f32 1.442695, %v1669_v14  ;;  %v8438_v22 = vpop.eup %8437  ;;  %v1994_v14 = vld [vmem:[%s10095_s15] sm:$0xff] }
 0x407   :  { %v1186_v23 = vsel %vm444_vm4, %v8438_v22, 0.0  ;;  %8273 = vmatprep.subr.bf16.mxu0 %v8272_v7 }
 0x408   :  { %8443 = vpow2.f32 %v1670_v21  ;;  %8275 = vmatpush3.bf16.msra.mxu0 %v8272_v7  ;;  %v8288_v21 = vpack.c.bf16 %v1995_v20, %v1994_v14  ;;  %v7372_v20 = vld [vmem:[#allocation14] ss:$0 sm:$0xff] }
 0x409   :  { %8277 = vmatprep.subr.bf16.mxu0 %v8276_v11 }
 0x40c   :  { %8279 = vmatpush3.bf16.msra.mxu0 %v8276_v11 }
 0x40d   :  { %1353 = vrot.lane.b32.xlu1 %v9218_v24, %s8859_s0  ;;  %8289 = vmatprep.subr.bf16.mxu0 %v8288_v21 }
 0x40e   :  { %v9290_v25 = vpop.eup %8439 }
 0x40f   :  { %v8442_v26 = vpop.eup %8441  ;;  %v1510_v27 = vsel %vm444_vm4, %v9290_v25, 0.0 }
 0x410   :  { %v1348_v29 = vsel %vm444_vm4, %v8442_v26, 0.0 }
 0x412   :  { %v9294_v28 = vpop.eup %8443 }
 0x413   :  { %v1672_v30 = vsel %vm444_vm4, %v9294_v28, 0.0 }
 0x41a   :  { %1191 = vrot.lane.b32.xlu0 %v9218_v24, %s8860_s25 }
 0x431   :  { %1187 = vadd.xlane.f32.xlu1 %v1186_v23 }
 0x435   :  { %1511 = vadd.xlane.f32.xlu1 %v1510_v27 }
 0x439   :  { %1349 = vadd.xlane.f32.xlu0 %v1348_v29  ;;  %1673 = vadd.xlane.f32.xlu1 %v1672_v30 }
 0x44a   :  { %1677 = vrot.lane.b32.xlu1 %v9218_v24, %s10069_s30 }
 0x44f   :  { %1515 = vrot.lane.b32.xlu0 %v9218_v24, %s8862_s2 }
 0x485   :  { %v524_v34 = vpop.xlane.xlu0 %523 }
 0x486   :  { %8445 = vrcp.f32 %v524_v34 }
 0x489   :  { %v686_v35 = vpop.xlane.xlu1 %685 }
 0x48a   :  { %8447 = vrcp.f32 %v686_v35 }
 0x48d   :  { %v848_v36 = vpop.xlane.xlu0 %847  ;;  %v1354_v46 = vpop.permute.xlu1 %1353 }
 0x48e   :  { %8449 = vrcp.f32 %v848_v36 }
 0x490   :  { %v8446_v37 = vpop.eup %8445 }
 0x491   :  { %v1010_v38 = vpop.xlane.xlu0 %1009  ;;  %v526_v39 = vmul.f32 %v8446_v37, %v8430_v55  ;;  %v1996_v37 = vld [vmem:[%s10095_s15 + $0x10] sm:$0xff] }
 0x492   :  { %8451 = vrcp.f32 %v1010_v38  ;;  %v1997_v38 = vld [vmem:[%s10095_s15 + $0x18] sm:$0xff] }
 0x493   :  { %7782 = vmatmul.mubr.msk.f32.vlgmr.msra.gmra.mrb[6].mxu1 %vm444_vm4, %v526_v39 }
 0x494   :  { %v8448_v40 = vpop.eup %8447  ;;  %7790 = vmatpush3.msra.mxu1 %v690_v31  ;;  %7791 = vmatprep.mubr.msk.f32.mxu1 %vm8851_vm3, %v8850_v19 }
 0x495   :  { %7799 = vmatprep.subr.mxu1 %v8850_v19  ;;  %v688_v24 = vmul.f32 %v8448_v40, %v8432_v60  ;;  %v1192_v45 = vpop.permute.xlu0 %1191 }
 0x497   :  { %7792 = vmatmul.mubr.msk.f32.vlgmr.msra.gmra.mrb[8].mxu1 %vm444_vm4, %v688_v24 }
 0x498   :  { %v8450_v41 = vpop.eup %8449  ;;  %7800 = vmatpush3.msra.mxu1 %v852_v32  ;;  %7801 = vmatprep.mubr.msk.f32.mxu1 %vm8851_vm3, %v8850_v19 }
 0x499   :  { %7809 = vmatprep.subr.mxu1 %v8850_v19  ;;  %v850_v42 = vmul.f32 %v8450_v41, %v8434_v0  ;;  %v8292_v41 = vpack.c.bf16 %v1997_v38, %v1996_v37 }
 0x49b   :  { %7802 = vmatmul.mubr.msk.f32.vlgmr.msra.gmra.mrb[10].mxu1 %vm444_vm4, %v850_v42  ;;  %v9372_v42 = vadd.f32 %v9190_v12, %v9204_v18  ;;  %v7369_v18 = vld [vmem:[#allocation7] ss:$0 sm:$0xff] }
 0x49c   :  { %v8452_v43 = vpop.eup %8451  ;;  %7810 = vmatpush3.msra.mxu1 %v1014_v33  ;;  %7811 = vmatprep.mubr.msk.f32.mxu1 %vm8851_vm3, %v8850_v19 }
 0x49d   :  { %7819 = vmatprep.subr.mxu1 %v8850_v19  ;;  %v1012_v44 = vmul.f32 %v8452_v43, %v9281_v4 }
 0x49f   :  { %7812 = vmatmul.mubr.msk.f32.vlgmr.msra.gmra.mrb[12].mxu1 %vm444_vm4, %v1012_v44  ;;  %v9380_v44 = vadd.f32 %v9202_v17, %v9190_v12  ;;  %v7377_v17 = vld [vmem:[#allocation10] ss:$0 sm:$0xff] }
 0x4a0   :  { %7820 = vmatpush3.msra.mxu1 %v1192_v45  ;;  %7821 = vmatprep.mubr.msk.f32.mxu1 %vm8851_vm3, %v8850_v19 }
 0x4a1   :  { %7829 = vmatprep.subr.mxu1 %v8850_v19 }
 0x4be   :  { %v1188_v47 = vpop.xlane.xlu1 %1187 }
 0x4bf   :  { %8453 = vrcp.f32 %v1188_v47 }
 0x4c2   :  { %v1512_v48 = vpop.xlane.xlu1 %1511 }
 0x4c6   :  { %v1350_v49 = vpop.xlane.xlu0 %1349  ;;  %v1674_v52 = vpop.xlane.xlu1 %1673 }
 0x4c7   :  { %8455 = vrcp.f32 %v1350_v49 }
 0x4c8   :  { %8457 = vrcp.f32 %v1512_v48 }
 0x4c9   :  { %v8454_v50 = vpop.eup %8453  ;;  %8459 = vrcp.f32 %v1674_v52 }
 0x4ca   :  { %v1190_v51 = vmul.f32 %v8454_v50, %v8438_v22  ;;  %v1516_v56 = vpop.permute.xlu0 %1515  ;;  %v1678_v59 = vpop.permute.xlu1 %1677 }
 0x4cc   :  { %7822 = vmatmul.mubr.msk.f32.vlgmr.msra.gmra.mrb[14].mxu1 %vm444_vm4, %v1190_v51 }
 0x4cd   :  { %7830 = vmatpush3.msra.mxu1 %v1354_v46  ;;  %7831 = vmatprep.mubr.msk.f32.mxu1 %vm8851_vm3, %v8850_v19 }
 0x4ce   :  { %7839 = vmatprep.subr.mxu1 %v8850_v19 }
 0x4d1   :  { %v8456_v53 = vpop.eup %8455 }
 0x4d2   :  { %v1352_v54 = vmul.f32 %v8456_v53, %v8442_v26  ;;  %v8458_v55 = vpop.eup %8457 }
 0x4d3   :  { %v1514_v57 = vmul.f32 %v8458_v55, %v9290_v25  ;;  %v8460_v58 = vpop.eup %8459 }
 0x4d4   :  { %7832 = vmatmul.mubr.msk.f32.vlgmr.msra.gmra.mrb[16].mxu1 %vm444_vm4, %v1352_v54  ;;  %v1676_v60 = vmul.f32 %v8460_v58, %v9294_v28 }
 0x4d5   :  { %7840 = vmatpush3.msra.mxu1 %v1516_v56  ;;  %7841 = vmatprep.mubr.msk.f32.mxu1 %vm8851_vm3, %v8850_v19 }
 0x4d6   :  { %7849 = vmatprep.subr.mxu1 %v8850_v19 }
 0x4d8   :  { %7842 = vmatmul.mubr.msk.f32.vlgmr.msra.gmra.mrb[18].mxu1 %vm444_vm4, %v1514_v57 }
 0x4d9   :  { %7850 = vmatpush3.msra.mxu1 %v1678_v59  ;;  %7851 = vmatprep.mubr.msk.f32.mxu1 %vm8851_vm3, %v8850_v19 }
 0x4dc   :  { %7852 = vmatmul.mubr.msk.f32.vlgmr.msra.gmra.mrb[20].mxu1 %vm444_vm4, %v1676_v60 }
 0x566   :  { %v599_v61 = vpop.f32.mrb[6].mxu1 }
 0x567   :  { %v7783_v62 = vpop.f32.mrb[7].mxu1 }
 0x56a   :  { %v761_v63 = vpop.f32.mrb[8].mxu1 }
 0x56b   :  { %1090 = vrot.lane.b32.xlu0 %v761_v63, %s8841_s27  ;;  %v7793_v0 = vpop.f32.mrb[9].mxu1 }
 0x56e   :  { %v923_v1 = vpop.f32.mrb[10].mxu1 }
 0x56f   :  { %1094 = vrot.lane.b32.xlu1 %v923_v1, %s10073_s9  ;;  %v7803_v2 = vpop.f32.mrb[11].mxu1  ;;  %v1902_v1 = vld [vmem:[%s10096_s13] sm:$0xff] }
 0x570   :  { %v1903_v2 = vld [vmem:[%s10096_s13 + $0x8] sm:$0xff] }
 0x572   :  { %v1085_v3 = vpop.f32.mrb[12].mxu1 }
 0x573   :  { %1098 = vrot.lane.b32.xlu1 %v1085_v3, %s10071_s12  ;;  %v7813_v4 = vpop.f32.mrb[13].mxu1  ;;  %v1904_v3 = vld [vmem:[%s10096_s13 + $0x10] sm:$0xff] }
 0x574   :  { %v8280_v4 = vpack.c.bf16 %v1903_v2, %v1902_v1  ;;  %v8284_v6 = vpack.c.bf16 %v1905_v5, %v1904_v3 }
 0x576   :  { %8281 = vmatprep.subr.bf16.mxu1 %v8280_v4 }
 0x577   :  { %8283 = vmatpush3.bf16.msra.mxu1 %v8280_v4 }
 0x578   :  { %8285 = vmatprep.subr.bf16.mxu1 %v8284_v6 }
 0x57b   :  { %8287 = vmatpush3.bf16.msra.mxu1 %v8284_v6 }
 0x57c   :  { %7887 = vmatprep.subr.mxu1 %v8850_v19 }
 0x59f   :  { %v1263_v10 = vpop.f32.mrb[14].mxu1 }
 0x5a0   :  { %v7823_v13 = vpop.f32.mrb[15].mxu1 }
 0x5a7   :  { %v1425_v22 = vpop.f32.mrb[16].mxu1 }
 0x5a8   :  { %1754 = vrot.lane.b32.xlu0 %v1425_v22, %s8841_s27  ;;  %v7833_v23 = vpop.f32.mrb[17].mxu1  ;;  %v7373_v22 = vld [vmem:[#allocation16] ss:$0 sm:$0xff] }
 0x5ab   :  { %v1587_v25 = vpop.f32.mrb[18].mxu1 }
 0x5ac   :  { %1758 = vrot.lane.b32.xlu0 %v1587_v25, %s10073_s9  ;;  %v7843_v26 = vpop.f32.mrb[19].mxu1 }
 0x5af   :  { %v1749_v27 = vpop.f32.mrb[20].mxu1 }
 0x5b0   :  { %1762 = vrot.lane.b32.xlu1 %v1749_v27, %s10071_s12  ;;  %v7853_v28 = vpop.f32.mrb[21].mxu1 }
 0x5dd   :  { %v1091_v29 = vpop.permute.xlu0 %1090 }
 0x5de   :  { %v1101_v31 = vsel %vm444_vm4, %v599_v61, %v1091_v29 }
 0x5e1   :  { %v1095_v30 = vpop.permute.xlu1 %1094 }
 0x5e2   :  { %v1103_v32 = vsel %vm1102_vm5, %v1101_v31, %v1095_v30  ;;  %v7374_v30 = vld [vmem:[#allocation8] ss:$0 sm:$0xff] }
 0x5e5   :  { %v1099_v33 = vpop.permute.xlu1 %1098 }
 0x5e6   :  { %v1105_v34 = vsel %vm1104_vm6, %v1103_v32, %v1099_v33 }
 0x5e7   :  { %7862 = vmatprep.mubr.msk.f32.mxu0 %vm354_vm2, %v1105_v34 }
 0x61a   :  { %v1755_v35 = vpop.permute.xlu0 %1754 }
 0x61b   :  { %v1765_v39 = vsel %vm444_vm4, %v1263_v10, %v1755_v35 }
 0x61e   :  { %v1759_v36 = vpop.permute.xlu0 %1758 }
 0x61f   :  { %v1766_v40 = vsel %vm1102_vm5, %v1765_v39, %v1759_v36 }
 0x622   :  { %v1763_v24 = vpop.permute.xlu1 %1762 }
 0x623   :  { %v1767_v43 = vsel %vm1104_vm6, %v1766_v40, %v1763_v24 }
 0x624   :  { %7863 = vmatmul.mubr.msk.f32.vlgmr.msra.gmra.mrb[16].mxu0 %vm354_vm2, %v1767_v43 }
 0x625   :  { %8291 = vmatpush3.bf16.msra.mxu0 %v8288_v21  ;;  %7884 = vmatprep.mubr.msk.f32.mxu0 %vm354_vm2, %v9372_v42 }
 0x626   :  { %8293 = vmatprep.subr.bf16.mxu0 %v8292_v41 }
 0x629   :  { %8295 = vmatpush3.bf16.msra.mxu0 %v8292_v41 }
 0x62a   :  { %7897 = vmatprep.subr.mxu0 %v8850_v19 }
 0x62c   :  { %7885 = vmatmul.mubr.msk.f32.vlgmr.msra.gmra.mrb[18].mxu0 %vm354_vm2, %v9380_v44 }
 0x62d   :  { %7899 = vmatprep.mubr.msk.f32.mxu0 %vm8851_vm3, %v8850_v19 }
 0x6f7   :  { %v7864_v45 = vpop.f32.mrb[16].mxu0 }
 0x6f8   :  { %v1852_v46 = vadd.f32 %v7864_v45, %v7369_v18  ;;  %v1846_v47 = vpop.f32.mrb[17].mxu0 }
 0x6f9   :  { %v1847_v48 = vadd.f32 %v7369_v18, %v1846_v47 }
 0x6fa   :  { %v1856_v49 = vadd.f32 %v1852_v46, %v9196_v16 }
 0x6fb   :  { %v1855_v50 = vadd.f32 %v1847_v48, %v9193_v15 }
 0x6fc   :  { %v1862_v12 = vsel %vm354_vm2, %v1856_v49, 0.0 }
 0x6fd   :  { %1863 = vadd.xlane.f32.xlu1 %v1862_v12  ;;  %v1859_v51 = vsel %vm354_vm2, %v1855_v50, 0.0 }
 0x6fe   :  { %1860 = vadd.xlane.f32.xlu0 %v1859_v51 }
 0x6ff   :  { %v7886_v52 = vpop.f32.mrb[18].mxu0 }
 0x700   :  { %v9391_v53 = vadd.f32 %v7886_v52, %v7377_v17  ;;  %v2077_v54 = vpop.f32.mrb[19].mxu0 }
 0x701   :  { %v9393_v55 = vadd.f32 %v7377_v17, %v2077_v54 }
 0x70e   :  { %2253 = vrot.lane.b32.xlu1 %v9393_v55, %s8852_s14 }
 0x712   :  { %2415 = vrot.lane.b32.xlu1 %v9393_v55, %s8857_s19 }
 0x78a   :  { %v1864_v15 = vpop.xlane.xlu1 %1863 }
 0x78b   :  { %v1867_v16 = vmul.f32 0.03125, %v1864_v15  ;;  %v1861_v56 = vpop.xlane.xlu0 %1860 }
 0x78c   :  { %v1866_v57 = vmul.f32 0.03125, %v1861_v56 }
 0x78d   :  { %v1869_v58 = vsub.f32 %v1856_v49, %v1867_v16 }
 0x78e   :  { %v1868_v59 = vsub.f32 %v1855_v50, %v1866_v57  ;;  %v2254_v60 = vpop.permute.xlu1 %2253 }
 0x78f   :  { %7898 = vmatpush3.xpose.msk.msra.mxu0 %vm444_vm4, %v2254_v60  ;;  %v1871_v63 = vmul.f32 %v1869_v58, %v1869_v58 }
 0x790   :  { %v1870_v61 = vmul.f32 %v1868_v59, %v1868_v59  ;;  %7907 = vmatprep.subr.mxu0 %v8850_v19 }
 0x791   :  { %v1875_v0 = vsel %vm354_vm2, %v1871_v63, 0.0 }
 0x792   :  { %v1872_v62 = vsel %vm354_vm2, %v1870_v61, 0.0  ;;  %v2416_v35 = vpop.permute.xlu1 %2415 }
 0x793   :  { %1873 = vadd.xlane.f32.xlu0 %v1872_v62 }
 0x797   :  { %1876 = vadd.xlane.f32.xlu0 %v1875_v0 }
 0x820   :  { %v1874_v7 = vpop.xlane.xlu0 %1873 }
 0x821   :  { %v1878_v8 = vmul.f32 0.03125, %v1874_v7 }
 0x823   :  { %v1880_v9 = vadd.f32 1e-05, %v1878_v8 }
 0x824   :  { %v1877_v10 = vpop.xlane.xlu0 %1876 }
 0x825   :  { %8461 = vrsqrt.f32 %v1880_v9  ;;  %v1879_v11 = vmul.f32 0.03125, %v1877_v10 }
 0x827   :  { %v1881_v13 = vadd.f32 1e-05, %v1879_v11 }
 0x829   :  { %8463 = vrsqrt.f32 %v1881_v13 }
 0x82f   :  { %v8462_v14 = vpop.eup %8461 }
 0x830   :  { %v1884_v21 = vmul.f32 %v8462_v14, %v1868_v59 }
 0x832   :  { %v1892_v23 = vmul.f32 %v7372_v20, %v1884_v21 }
 0x833   :  { %v8464_v25 = vpop.eup %8463 }
 0x834   :  { %v1885_v26 = vmul.f32 %v8464_v25, %v1869_v58  ;;  %v9416_v27 = vadd.f32 %v7373_v22, %v1892_v23 }
 0x836   :  { %v1893_v28 = vmul.f32 %v7372_v20, %v1885_v26  ;;  %7873 = vmatprep.mubr.msk.f32.mxu1 %vm354_vm2, %v9416_v27 }
 0x838   :  { %v9420_v29 = vadd.f32 %v7373_v22, %v1893_v28 }
 0x83a   :  { %7874 = vmatmul.mubr.msk.f32.vlgmr.msra.gmra.mrb[22].mxu1 %vm354_vm2, %v9420_v29 }
 0x83b   :  { %7888 = vmatpush3.xpose.msk.msra.mxu1 %vm444_vm4, %v9393_v55  ;;  %7889 = vmatprep.mubr.msk.f32.mxu1 %vm8851_vm3, %v8850_v19 }
 0x83c   :  { %7892 = vmatprep.subr.mxu1 %v8850_v19 }
 0x90d   :  { %v7875_v31 = vpop.f32.mrb[22].mxu1 }
 0x90e   :  { %v1985_v32 = vpop.f32.mrb[23].mxu1  ;;  %v1991_v34 = vadd.f32 %v7875_v31, %v7374_v30 }
 0x90f   :  { %v1986_v33 = vadd.f32 %v7374_v30, %v1985_v32 }
 0x911   :  { %2413 = vrot.lane.b32.xlu1 %v1986_v33, %s8857_s19  ;;  %2251 = vrot.lane.b32.xlu0 %v1986_v33, %s8852_s14 }
 0x912   :  { %7890 = vmatmul.mubr.msk.f32.vlgmr.msra.gmra.mrb[24].mxu1 %vm444_vm4, %v1986_v33 }
 0x913   :  { %7894 = vmatprep.mubr.msk.f32.mxu1 %vm8851_vm3, %v8850_v19 }
 0x915   :  { %2575 = vrot.lane.b32.xlu1 %v1986_v33, %s8858_s6  ;;  %2577 = vrot.lane.b32.xlu0 %v9393_v55, %s8858_s6 }
 0x919   :  { %2912 = vrot.lane.b32.xlu1 %v1991_v34, %s8852_s14  ;;  %2914 = vrot.lane.b32.xlu0 %v9391_v53, %s8852_s14 }
 0x91d   :  { %3074 = vrot.lane.b32.xlu1 %v1991_v34, %s8857_s19  ;;  %3076 = vrot.lane.b32.xlu0 %v9391_v53, %s8857_s19 }
 0x921   :  { %3236 = vrot.lane.b32.xlu1 %v1991_v34, %s8858_s6  ;;  %3238 = vrot.lane.b32.xlu0 %v9391_v53, %s8858_s6 }
 0x925   :  { %2337 = vrot.lane.b32.xlu1 %v9393_v55, %s8855_s8  ;;  %2175 = vrot.lane.b32.xlu0 %v9393_v55, %s8853_s5 }
 0x929   :  { %2661 = vrot.lane.b32.xlu1 %v9393_v55, %s8856_s23  ;;  %2499 = vrot.lane.b32.xlu0 %v9393_v55, %s8854_s24 }
 0x983   :  { %v2414_v36 = vpop.permute.xlu1 %2413  ;;  %v2252_v37 = vpop.permute.xlu0 %2251 }
 0x984   :  { %7900 = vmatmul.mubr.msk.f32.vlgmr.msra.gmra.mrb[20].mxu0 %vm444_vm4, %v2252_v37 }
 0x985   :  { %7908 = vmatpush3.xpose.msk.msra.mxu0 %vm444_vm4, %v2416_v35  ;;  %7909 = vmatprep.mubr.msk.f32.mxu0 %vm8851_vm3, %v8850_v19 }
 0x986   :  { %7917 = vmatprep.subr.mxu0 %v8850_v19 }
 0x987   :  { %v2578_v38 = vpop.permute.xlu0 %2577  ;;  %v2576_v39 = vpop.permute.xlu1 %2575 }
 0x988   :  { %7910 = vmatmul.mubr.msk.f32.vlgmr.msra.gmra.mrb[22].mxu0 %vm444_vm4, %v2414_v36 }
 0x989   :  { %7918 = vmatpush3.xpose.msk.msra.mxu0 %vm444_vm4, %v2578_v38  ;;  %7919 = vmatprep.mubr.msk.f32.mxu0 %vm8851_vm3, %v8850_v19 }
 0x98a   :  { %7927 = vmatprep.subr.mxu0 %v8850_v19 }
 0x98b   :  { %v2915_v40 = vpop.permute.xlu0 %2914  ;;  %v2913_v24 = vpop.permute.xlu1 %2912 }
 0x98c   :  { %7920 = vmatmul.mubr.msk.f32.vlgmr.msra.gmra.mrb[24].mxu0 %vm444_vm4, %v2576_v39 }
 0x98d   :  { %7928 = vmatpush3.xpose.msk.msra.mxu0 %vm444_vm4, %v9391_v53  ;;  %7929 = vmatprep.mubr.msk.f32.mxu0 %vm8851_vm3, %v8850_v19 }
 0x98e   :  { %7937 = vmatprep.subr.mxu0 %v8850_v19 }
 0x98f   :  { %v3077_v41 = vpop.permute.xlu0 %3076  ;;  %v3075_v18 = vpop.permute.xlu1 %3074 }
 0x990   :  { %7930 = vmatmul.mubr.msk.f32.vlgmr.msra.gmra.mrb[26].mxu0 %vm444_vm4, %v1991_v34 }
 0x991   :  { %7938 = vmatpush3.xpose.msk.msra.mxu0 %vm444_vm4, %v2915_v40  ;;  %7939 = vmatprep.mubr.msk.f32.mxu0 %vm8851_vm3, %v8850_v19 }
 0x992   :  { %7947 = vmatprep.subr.mxu0 %v8850_v19 }
 0x993   :  { %v3239_v43 = vpop.permute.xlu0 %3238  ;;  %v3237_v46 = vpop.permute.xlu1 %3236 }
 0x994   :  { %7940 = vmatmul.mubr.msk.f32.vlgmr.msra.gmra.mrb[28].mxu0 %vm444_vm4, %v2913_v24 }
 0x995   :  { %7948 = vmatpush3.xpose.msk.msra.mxu0 %vm444_vm4, %v3077_v41  ;;  %7949 = vmatprep.mubr.msk.f32.mxu0 %vm8851_vm3, %v8850_v19 }
 0x996   :  { %7957 = vmatprep.subr.mxu0 %v8850_v19 }
 0x997   :  { %v2176_v45 = vpop.permute.xlu0 %2175  ;;  %v2338_v31 = vpop.permute.xlu1 %2337 }
 0x998   :  { %7893 = vmatpush3.msra.mxu1 %v2176_v45  ;;  %7950 = vmatmul.mubr.msk.f32.vlgmr.msra.gmra.mrb[30].mxu0 %vm444_vm4, %v3075_v18 }
 0x999   :  { %7958 = vmatpush3.xpose.msk.msra.mxu0 %vm444_vm4, %v3239_v43  ;;  %7959 = vmatprep.mubr.msk.f32.mxu0 %vm8851_vm3, %v8850_v19 }
 0x99a   :  { %7902 = vmatprep.subr.mxu1 %v8850_v19 }
 0x99b   :  { %v2500_v13 = vpop.permute.xlu0 %2499  ;;  %v2662_v41 = vpop.permute.xlu1 %2661 }
 0x99c   :  { %7960 = vmatmul.mubr.msk.f32.vlgmr.msra.gmra.mrb[32].mxu0 %vm444_vm4, %v3237_v46 }
 0x9e5   :  { %v2163_v47 = vpop.f32.mrb[24].mxu1 }
 0x9e6   :  { %v2167_v48 = vmul.f32 0.35355338, %v2163_v47  ;;  %v7891_v49 = vpop.f32.mrb[25].mxu1 }
 0x9e8   :  { %v2168_v50 = vmul.f32 1.442695, %v2167_v48 }
 0x9ea   :  { %8465 = vpow2.f32 %v2168_v50 }
 0x9f4   :  { %v8466_v12 = vpop.eup %8465 }
 0x9f5   :  { %v2170_v17 = vsel %vm444_vm4, %v8466_v12, 0.0 }
 0x9f6   :  { %2171 = vadd.xlane.f32.xlu0 %v2170_v17 }
 0xa57   :  { %v2325_v51 = vpop.f32.mrb[20].mxu0 }
 0xa58   :  { %v2329_v52 = vmul.f32 0.35355338, %v2325_v51  ;;  %v7901_v54 = vpop.f32.mrb[21].mxu0 }
 0xa5a   :  { %v2330_v55 = vmul.f32 1.442695, %v2329_v52 }
 0xa5b   :  { %v2487_v15 = vpop.f32.mrb[22].mxu0 }
 0xa5c   :  { %8467 = vpow2.f32 %v2330_v55  ;;  %v2491_v16 = vmul.f32 0.35355338, %v2487_v15  ;;  %v7911_v56 = vpop.f32.mrb[23].mxu0 }
 0xa5e   :  { %v2492_v57 = vmul.f32 1.442695, %v2491_v16 }
 0xa5f   :  { %v2649_v58 = vpop.f32.mrb[24].mxu0 }
 0xa60   :  { %8469 = vpow2.f32 %v2492_v57  ;;  %v2653_v59 = vmul.f32 0.35355338, %v2649_v58  ;;  %v7921_v60 = vpop.f32.mrb[25].mxu0 }
 0xa62   :  { %v2654_v61 = vmul.f32 1.442695, %v2653_v59 }
 0xa63   :  { %v2824_v62 = vpop.f32.mrb[26].mxu0 }
 0xa64   :  { %8471 = vpow2.f32 %v2654_v61  ;;  %v7931_v63 = vpop.f32.mrb[27].mxu0  ;;  %v2828_v20 = vmul.f32 0.35355338, %v2824_v62 }
 0xa66   :  { %v8468_v0 = vpop.eup %8467  ;;  %v2829_v21 = vmul.f32 1.442695, %v2828_v20 }
 0xa67   :  { %v2986_v1 = vpop.f32.mrb[28].mxu0  ;;  %v2332_v2 = vsel %vm444_vm4, %v8468_v0, 0.0 }
 0xa68   :  { %2333 = vadd.xlane.f32.xlu1 %v2332_v2  ;;  %v7941_v3 = vpop.f32.mrb[29].mxu0  ;;  %v2990_v25 = vmul.f32 0.35355338, %v2986_v1 }
 0xa6a   :  { %v8470_v4 = vpop.eup %8469  ;;  %v2991_v32 = vmul.f32 1.442695, %v2990_v25 }
 0xa6b   :  { %v3148_v5 = vpop.f32.mrb[30].mxu0  ;;  %v2494_v6 = vsel %vm444_vm4, %v8470_v4, 0.0 }
 0xa6c   :  { %v7951_v7 = vpop.f32.mrb[31].mxu0  ;;  %2495 = vadd.xlane.f32.xlu0 %v2494_v6  ;;  %v3152_v22 = vmul.f32 0.35355338, %v3148_v5 }
 0xa6e   :  { %v9489_v8 = vpop.eup %8471  ;;  %v3153_v26 = vmul.f32 1.442695, %v3152_v22 }
 0xa6f   :  { %v3310_v9 = vpop.f32.mrb[32].mxu0  ;;  %v2656_v10 = vsel %vm444_vm4, %v9489_v8, 0.0 }
 0xa70   :  { %v7961_v11 = vpop.f32.mrb[33].mxu0  ;;  %2657 = vadd.xlane.f32.xlu0 %v2656_v10  ;;  %v3314_v28 = vmul.f32 0.35355338, %v3310_v9  ;;  %v2087_v9 = vld [vmem:[#allocation11 + $0x8] sm:$0xff] }
 0xa72   :  { %v3315_v33 = vmul.f32 1.442695, %v3314_v28 }
 0xa79   :  { %2998 = vrot.lane.b32.xlu1 %v9391_v53, %s8855_s8 }
 0xa83   :  { %v2172_v14 = vpop.xlane.xlu0 %2171 }
 0xa84   :  { %8473 = vrcp.f32 %v2172_v14  ;;  %v2089_v14 = vld [vmem:[#allocation11 + $0x18] sm:$0xff] }
 0xa85   :  { %8475 = vpow2.f32 %v2829_v21 }
 0xa86   :  { %2836 = vrot.lane.b32.xlu0 %v9391_v53, %s8853_s5  ;;  %8477 = vpow2.f32 %v3153_v26 }
 0xa87   :  { %8479 = vpow2.f32 %v2991_v32 }
 0xa88   :  { %8481 = vpow2.f32 %v3315_v33 }
 0xa8e   :  { %v8474_v23 = vpop.eup %8473 }
 0xa8f   :  { %v2174_v30 = vmul.f32 %v8474_v23, %v8466_v12  ;;  %v8476_v34 = vpop.eup %8475 }
 0xa90   :  { %v2831_v35 = vsel %vm444_vm4, %v8476_v34, 0.0  ;;  %v8478_v36 = vpop.eup %8477 }
 0xa91   :  { %7895 = vmatmul.mubr.msk.f32.vlgmr.msra.gmra.mrb[26].mxu1 %vm444_vm4, %v2174_v30  ;;  %v8480_v37 = vpop.eup %8479  ;;  %v3155_v38 = vsel %vm444_vm4, %v8478_v36, 0.0 }
 0xa92   :  { %7903 = vmatpush3.msra.mxu1 %v2338_v31  ;;  %7904 = vmatprep.mubr.msk.f32.mxu1 %vm8851_vm3, %v8850_v19  ;;  %v9503_v39 = vpop.eup %8481  ;;  %v2993_v24 = vsel %vm444_vm4, %v8480_v37, 0.0 }
 0xa93   :  { %7912 = vmatprep.subr.mxu1 %v8850_v19  ;;  %v3317_v40 = vsel %vm444_vm4, %v9503_v39, 0.0 }
 0xa9d   :  { %2832 = vadd.xlane.f32.xlu1 %v2831_v35 }
 0xaa1   :  { %3156 = vadd.xlane.f32.xlu1 %v3155_v38 }
 0xaa5   :  { %3318 = vadd.xlane.f32.xlu1 %v3317_v40  ;;  %2994 = vadd.xlane.f32.xlu0 %v2993_v24 }
 0xab6   :  { %3322 = vrot.lane.b32.xlu1 %v9391_v53, %s8856_s23 }
 0xabb   :  { %3160 = vrot.lane.b32.xlu0 %v9391_v53, %s8854_s24 }
 0xaf5   :  { %v2334_v43 = vpop.xlane.xlu1 %2333 }
 0xaf6   :  { %8483 = vrcp.f32 %v2334_v43  ;;  %v7404_v43 = vld [vmem:[#allocation13] ss:$0 sm:$0xff] }
 0xaf9   :  { %v2496_v18 = vpop.xlane.xlu0 %2495  ;;  %v2999_v17 = vpop.permute.xlu1 %2998 }
 0xafa   :  { %8485 = vrcp.f32 %v2496_v18 }
 0xafd   :  { %v2658_v45 = vpop.xlane.xlu0 %2657 }
 0xafe   :  { %8487 = vrcp.f32 %v2658_v45 }
 0xb00   :  { %v8484_v46 = vpop.eup %8483 }
 0xb01   :  { %v2336_v47 = vmul.f32 %v8484_v46, %v8468_v0  ;;  %v2837_v12 = vpop.permute.xlu0 %2836 }
 0xb03   :  { %7905 = vmatmul.mubr.msk.f32.vlgmr.msra.gmra.mrb[28].mxu1 %vm444_vm4, %v2336_v47 }
 0xb04   :  { %v8486_v48 = vpop.eup %8485  ;;  %7913 = vmatpush3.msra.mxu1 %v2500_v13  ;;  %7914 = vmatprep.mubr.msk.f32.mxu1 %vm8851_vm3, %v8850_v19  ;;  %v2088_v13 = vld [vmem:[#allocation11 + $0x10] sm:$0xff] }
 0xb05   :  { %7922 = vmatprep.subr.mxu1 %v8850_v19  ;;  %v2498_v49 = vmul.f32 %v8486_v48, %v8470_v4  ;;  %v8300_v21 = vpack.c.bf16 %v2089_v14, %v2088_v13 }
 0xb07   :  { %7915 = vmatmul.mubr.msk.f32.vlgmr.msra.gmra.mrb[30].mxu1 %vm444_vm4, %v2498_v49 }
 0xb08   :  { %v8488_v53 = vpop.eup %8487  ;;  %7923 = vmatpush3.msra.mxu1 %v2662_v41  ;;  %7924 = vmatprep.mubr.msk.f32.mxu1 %vm8851_vm3, %v8850_v19 }
 0xb09   :  { %7932 = vmatprep.subr.mxu1 %v8850_v19  ;;  %v2660_v50 = vmul.f32 %v8488_v53, %v9489_v8  ;;  %v2086_v8 = vld [vmem:[#allocation11] sm:$0xff] }
 0xb0a   :  { %v8296_v10 = vpack.c.bf16 %v2087_v9, %v2086_v8 }
 0xb0b   :  { %7925 = vmatmul.mubr.msk.f32.vlgmr.msra.gmra.mrb[32].mxu1 %vm444_vm4, %v2660_v50 }
 0xb0c   :  { %7933 = vmatpush3.msra.mxu1 %v2837_v12  ;;  %7934 = vmatprep.mubr.msk.f32.mxu1 %vm8851_vm3, %v8850_v19 }
 0xb0d   :  { %7942 = vmatprep.subr.mxu1 %v8850_v19  ;;  %8297 = vmatprep.subr.bf16.mxu0 %v8296_v10 }
 0xb0e   :  { %8299 = vmatpush3.bf16.msra.mxu0 %v8296_v10 }
 0xb0f   :  { %8301 = vmatprep.subr.bf16.mxu0 %v8300_v21 }
 0xb12   :  { %8303 = vmatpush3.bf16.msra.mxu0 %v8300_v21 }
 0xb2a   :  { %v2833_v51 = vpop.xlane.xlu1 %2832 }
 0xb2b   :  { %8489 = vrcp.f32 %v2833_v51 }
 0xb2e   :  { %v3157_v52 = vpop.xlane.xlu1 %3156 }
 0xb32   :  { %v2995_v54 = vpop.xlane.xlu0 %2994  ;;  %v3319_v16 = vpop.xlane.xlu1 %3318 }
 0xb33   :  { %8491 = vrcp.f32 %v2995_v54 }
 0xb34   :  { %8493 = vrcp.f32 %v3157_v52 }
 0xb35   :  { %v8490_v55 = vpop.eup %8489  ;;  %8495 = vrcp.f32 %v3319_v16 }
 0xb36   :  { %v2835_v15 = vmul.f32 %v8490_v55, %v8476_v34  ;;  %v3161_v59 = vpop.permute.xlu0 %3160  ;;  %v3323_v62 = vpop.permute.xlu1 %3322 }
 0xb38   :  { %7935 = vmatmul.mubr.msk.f32.vlgmr.msra.gmra.mrb[34].mxu1 %vm444_vm4, %v2835_v15 }
 0xb39   :  { %7943 = vmatpush3.msra.mxu1 %v2999_v17  ;;  %7944 = vmatprep.mubr.msk.f32.mxu1 %vm8851_vm3, %v8850_v19 }
 0xb3a   :  { %7952 = vmatprep.subr.mxu1 %v8850_v19 }
 0xb3d   :  { %v8492_v56 = vpop.eup %8491 }
 0xb3e   :  { %v2997_v57 = vmul.f32 %v8492_v56, %v8480_v37  ;;  %v8494_v58 = vpop.eup %8493 }
 0xb3f   :  { %v3159_v60 = vmul.f32 %v8494_v58, %v8478_v36  ;;  %v8496_v61 = vpop.eup %8495 }
 0xb40   :  { %7945 = vmatmul.mubr.msk.f32.vlgmr.msra.gmra.mrb[36].mxu1 %vm444_vm4, %v2997_v57  ;;  %v3321_v63 = vmul.f32 %v8496_v61, %v9503_v39  ;;  %v3547_v57 = vld [vmem:[#allocation19 + $0x8] sm:$0xff] }
 0xb41   :  { %7953 = vmatpush3.msra.mxu1 %v3161_v59  ;;  %7954 = vmatprep.mubr.msk.f32.mxu1 %vm8851_vm3, %v8850_v19  ;;  %v3548_v59 = vld [vmem:[#allocation19 + $0x10] sm:$0xff] }
 0xb42   :  { %7962 = vmatprep.subr.mxu1 %v8850_v19 }
 0xb44   :  { %7955 = vmatmul.mubr.msk.f32.vlgmr.msra.gmra.mrb[38].mxu1 %vm444_vm4, %v3159_v60  ;;  %v3549_v60 = vld [vmem:[#allocation19 + $0x18] sm:$0xff] }
 0xb45   :  { %7963 = vmatpush3.msra.mxu1 %v3323_v62  ;;  %7964 = vmatprep.mubr.msk.f32.mxu1 %vm8851_vm3, %v8850_v19  ;;  %v8308_v61 = vpack.c.bf16 %v3549_v60, %v3548_v59  ;;  %v3640_v62 = vld [vmem:[%s10053_s21] sm:$0xff]  ;;  %v7420_v59 = vld [vmem:[%s10092_s4 + $0x38] sm:$0xff] }
 0xb48   :  { %7965 = vmatmul.mubr.msk.f32.vlgmr.msra.gmra.mrb[40].mxu1 %vm444_vm4, %v3321_v63  ;;  %v3641_v63 = vld [vmem:[%s10053_s21 + $0x8] sm:$0xff] }
 0xb64   :  { %v2247_v0 = vpop.f32.mrb[26].mxu1 }
 0xb65   :  { %v7896_v1 = vpop.f32.mrb[27].mxu1 }
 0xb66   :  { %v8312_v1 = vpack.c.bf16 %v3641_v63, %v3640_v62 }
 0xb68   :  { %8313 = vmatprep.subr.bf16.mxu0 %v8312_v1 }
 0xbd6   :  { %v2409_v2 = vpop.f32.mrb[28].mxu1 }
 0xbd7   :  { %2738 = vrot.lane.b32.xlu0 %v2409_v2, %s8841_s27  ;;  %v7906_v3 = vpop.f32.mrb[29].mxu1  ;;  %v3643_v2 = vld [vmem:[%s10053_s21 + $0x18] sm:$0xff] }
 0xbda   :  { %v2571_v4 = vpop.f32.mrb[30].mxu1 }
 0xbdb   :  { %2742 = vrot.lane.b32.xlu1 %v2571_v4, %s10073_s9  ;;  %v7916_v5 = vpop.f32.mrb[31].mxu1  ;;  %v3644_v4 = vld [vmem:[%s10053_s21 + $0x20] sm:$0xff] }
 0xbdc   :  { %v3645_v5 = vld [vmem:[%s10053_s21 + $0x28] sm:$0xff] }
 0xbde   :  { %v2733_v6 = vpop.f32.mrb[32].mxu1 }
 0xbdf   :  { %2746 = vrot.lane.b32.xlu1 %v2733_v6, %s10071_s12  ;;  %v7926_v7 = vpop.f32.mrb[33].mxu1  ;;  %v8320_v6 = vpack.c.bf16 %v3645_v5, %v3644_v4  ;;  %v7415_v4 = vld [vmem:[%s10049_s17] ss:$0 sm:$0xff] }
 0xc0b   :  { %v2908_v11 = vpop.f32.mrb[34].mxu1 }
 0xc0c   :  { %v7936_v20 = vpop.f32.mrb[35].mxu1 }
 0xc0d   :  { %v7407_v20 = vld [vmem:[#allocation17] ss:$0 sm:$0xff] }
 0xc13   :  { %v3070_v22 = vpop.f32.mrb[36].mxu1 }
 0xc14   :  { %3399 = vrot.lane.b32.xlu0 %v3070_v22, %s8841_s27  ;;  %v7946_v23 = vpop.f32.mrb[37].mxu1  ;;  %v7408_v22 = vld [vmem:[%s10048_s16] ss:$0 sm:$0xff] }
 0xc17   :  { %v3232_v25 = vpop.f32.mrb[38].mxu1 }
 0xc18   :  { %3403 = vrot.lane.b32.xlu0 %v3232_v25, %s10073_s9  ;;  %v7956_v26 = vpop.f32.mrb[39].mxu1 }
 0xc1b   :  { %v3394_v28 = vpop.f32.mrb[40].mxu1 }
 0xc1c   :  { %3407 = vrot.lane.b32.xlu1 %v3394_v28, %s10071_s12  ;;  %v7966_v30 = vpop.f32.mrb[41].mxu1  ;;  %s10097_s12 = smov 40  }
 0xc49   :  { %v2739_v31 = vpop.permute.xlu0 %2738 }
 0xc4a   :  { %v2749_v33 = vsel %vm444_vm4, %v2247_v0, %v2739_v31  ;;  %v3642_v0 = vld [vmem:[%s10053_s21 + $0x10] sm:$0xff] }
 0xc4b   :  { %v8316_v3 = vpack.c.bf16 %v3643_v2, %v3642_v0 }
 0xc4d   :  { %v2743_v32 = vpop.permute.xlu1 %2742 }
 0xc4e   :  { %v2750_v34 = vsel %vm1102_vm5, %v2749_v33, %v2743_v32  ;;  %v3646_v32 = vld [vmem:[%s10053_s21 + $0x30] sm:$0xff]  ;;  %v3647_v33 = vld [vmem:[%s10053_s21 + $0x38] sm:$0xff] }
 0xc51   :  { %v2747_v35 = vpop.permute.xlu1 %2746 }
 0xc52   :  { %v2751_v36 = vsel %vm1104_vm6, %v2750_v34, %v2747_v35  ;;  %v8324_v34 = vpack.c.bf16 %v3647_v33, %v3646_v32  ;;  %v7409_v35 = vld [vmem:[%s10052_s20] ss:$0 sm:$0xff] }
 0xc53   :  { %7975 = vmatprep.mubr.msk.f32.mxu0 %vm354_vm2, %v2751_v36 }
 0xc86   :  { %v3400_v37 = vpop.permute.xlu0 %3399 }
 0xc87   :  { %v3410_v39 = vsel %vm444_vm4, %v2908_v11, %v3400_v37 }
 0xc8a   :  { %v3404_v38 = vpop.permute.xlu0 %3403 }
 0xc8b   :  { %v3411_v40 = vsel %vm1102_vm5, %v3410_v39, %v3404_v38 }
 0xc8e   :  { %v3408_v24 = vpop.permute.xlu1 %3407 }
 0xc8f   :  { %v3412_v41 = vsel %vm1104_vm6, %v3411_v40, %v3408_v24 }
 0xc90   :  { %7976 = vmatmul.mubr.msk.f32.vlgmr.msra.gmra.mrb[34].mxu0 %vm354_vm2, %v3412_v41  ;;  %v7412_v41 = vld [vmem:[%s10054_s22] ss:$0 sm:$0xff] }
 0xc91   :  { %8315 = vmatpush3.bf16.msra.mxu0 %v8312_v1 }
 0xc92   :  { %8317 = vmatprep.subr.bf16.mxu0 %v8316_v3 }
 0xc95   :  { %8319 = vmatpush3.bf16.msra.mxu0 %v8316_v3 }
 0xc96   :  { %8321 = vmatprep.subr.bf16.mxu0 %v8320_v6 }
 0xc99   :  { %8323 = vmatpush3.bf16.msra.mxu0 %v8320_v6 }
 0xc9a   :  { %8325 = vmatprep.subr.bf16.mxu0 %v8324_v34 }
 0xc9d   :  { %8327 = vmatpush3.bf16.msra.mxu0 %v8324_v34 }
 0xc9e   :  { %8029 = vmatprep.subr.mxu0 %v8850_v19 }
 0xd63   :  { %v7977_v18 = vpop.f32.mrb[34].mxu0 }
 0xd64   :  { %v3497_v45 = vadd.f32 %v7977_v18, %v7404_v43  ;;  %v3491_v46 = vpop.f32.mrb[35].mxu0 }
 0xd65   :  { %v3492_v47 = vadd.f32 %v7404_v43, %v3491_v46 }
 0xd66   :  { %v3501_v48 = vadd.f32 %v3497_v45, %v9420_v29 }
 0xd67   :  { %v3500_v49 = vadd.f32 %v3492_v47, %v9416_v27  ;;  %v3546_v27 = vld [vmem:[#allocation19] sm:$0xff] }
 0xd68   :  { %v3507_v53 = vsel %vm354_vm2, %v3501_v48, 0.0  ;;  %v8304_v58 = vpack.c.bf16 %v3547_v57, %v3546_v27  ;;  %v7418_v27 = vld [vmem:[%s10092_s4 + $0x28] sm:$0xff] }
 0xd69   :  { %3508 = vadd.xlane.f32.xlu1 %v3507_v53  ;;  %v3504_v50 = vsel %vm354_vm2, %v3500_v49, 0.0 }
 0xd6a   :  { %3505 = vadd.xlane.f32.xlu0 %v3504_v50  ;;  %8305 = vmatprep.subr.bf16.mxu1 %v8304_v58 }
 0xd6b   :  { %8307 = vmatpush3.bf16.msra.mxu1 %v8304_v58  ;;  %v7419_v58 = vld [vmem:[%s10092_s4 + $0x30] sm:$0xff] }
 0xd6c   :  { %8309 = vmatprep.subr.bf16.mxu1 %v8308_v61  ;;  %v8332_v60 = vpack.c.bf16 %v7420_v59, %v7419_v58 }
 0xd6f   :  { %8311 = vmatpush3.bf16.msra.mxu1 %v8308_v61 }
 0xdf6   :  { %v3509_v12 = vpop.xlane.xlu1 %3508 }
 0xdf7   :  { %v3511_v17 = vmul.f32 0.03125, %v3509_v12  ;;  %v3506_v51 = vpop.xlane.xlu0 %3505 }
 0xdf8   :  { %v3510_v52 = vmul.f32 0.03125, %v3506_v51 }
 0xdf9   :  { %v3513_v54 = vsub.f32 %v3501_v48, %v3511_v17 }
 0xdfa   :  { %v3512_v55 = vsub.f32 %v3500_v49, %v3510_v52 }
 0xdfb   :  { %v3515_v56 = vmul.f32 %v3513_v54, %v3513_v54 }
 0xdfc   :  { %v3514_v15 = vmul.f32 %v3512_v55, %v3512_v55 }
 0xdfd   :  { %v3519_v29 = vsel %vm354_vm2, %v3515_v56, 0.0 }
 0xdfe   :  { %v3516_v16 = vsel %vm354_vm2, %v3514_v15, 0.0 }
 0xdff   :  { %3517 = vadd.xlane.f32.xlu0 %v3516_v16 }
 0xe03   :  { %3520 = vadd.xlane.f32.xlu0 %v3519_v29  ;;  %v7417_v29 = vld [vmem:[%s10092_s4 + $0x20] sm:$0xff] }
 0xe04   :  { %v8328_v57 = vpack.c.bf16 %v7418_v27, %v7417_v29 }
 0xe06   :  { %8329 = vmatprep.subr.bf16.mxu1 %v8328_v57 }
 0xe8c   :  { %v3518_v7 = vpop.xlane.xlu0 %3517 }
 0xe8d   :  { %v3522_v8 = vmul.f32 0.03125, %v3518_v7 }
 0xe8f   :  { %v3524_v9 = vadd.f32 1e-05, %v3522_v8  ;;  %v7416_v8 = vld [vmem:[%s10050_s18] ss:$0 sm:$0xff] }
 0xe90   :  { %v3521_v10 = vpop.xlane.xlu0 %3520 }
 0xe91   :  { %8497 = vrsqrt.f32 %v3524_v9  ;;  %v3523_v11 = vmul.f32 0.03125, %v3521_v10 }
 0xe93   :  { %v3525_v13 = vadd.f32 1e-05, %v3523_v11 }
 0xe95   :  { %8499 = vrsqrt.f32 %v3525_v13 }
 0xe9b   :  { %v8498_v14 = vpop.eup %8497 }
 0xe9c   :  { %v3528_v21 = vmul.f32 %v8498_v14, %v3512_v55  ;;  %v7421_v14 = vld [vmem:[#allocation5 + $0x1] ss:$0 sm:$0xff] }
 0xe9e   :  { %v3536_v23 = vmul.f32 %v7407_v20, %v3528_v21 }
 0xe9f   :  { %v8500_v25 = vpop.eup %8499 }
 0xea0   :  { %v3529_v26 = vmul.f32 %v8500_v25, %v3513_v54  ;;  %v3544_v28 = vadd.f32 %v7408_v22, %v3536_v23 }
 0xea2   :  { %v3537_v30 = vmul.f32 %v7407_v20, %v3529_v26  ;;  %7986 = vmatprep.mubr.msk.f32.mxu1 %vm354_vm2, %v3544_v28 }
 0xea4   :  { %v3545_v31 = vadd.f32 %v7408_v22, %v3537_v30 }
 0xea6   :  { %7987 = vmatmul.mubr.msk.f32.vlgmr.msra.gmra.mrb[42].mxu1 %vm354_vm2, %v3545_v31 }
 0xea7   :  { %8331 = vmatpush3.bf16.msra.mxu1 %v8328_v57 }
 0xea8   :  { %8333 = vmatprep.subr.bf16.mxu1 %v8332_v60 }
 0xeab   :  { %8335 = vmatpush3.bf16.msra.mxu1 %v8332_v60 }
 0xeac   :  { %8019 = vmatprep.subr.mxu1 %v8850_v19 }
 0xf79   :  { %v7988_v36 = vpop.f32.mrb[42].mxu1 }
 0xf7a   :  { %v3635_v37 = vadd.f32 %v7988_v36, %v7409_v35  ;;  %v3629_v38 = vpop.f32.mrb[43].mxu1 }
 0xf7b   :  { %v3630_v39 = vadd.f32 %v7409_v35, %v3629_v38 }
 0xf7c   :  { %v3639_v24 = vmax.f32 %v3635_v37, 0.0 }
 0xf7d   :  { %v3638_v40 = vmax.f32 %v3630_v39, 0.0 }
 0xf7f   :  { %8005 = vmatprep.mubr.msk.f32.mxu0 %vm3655_vm7, %v3638_v40 }
 0xf80   :  { %8006 = vmatmul.mubr.msk.f32.vlgmr.msra.gmra.mrb[36].mxu0 %vm3655_vm7, %v3639_v24 }
 0xf81   :  { %8031 = vmatprep.mubr.msk.f32.mxu0 %vm8851_vm3, %v8850_v19 }
0x1053   :  { %v8007_v43 = vpop.f32.mrb[36].mxu0 }
0x1054   :  { %v3734_v18 = vadd.f32 %v8007_v43, %v7412_v41  ;;  %v3728_v45 = vpop.f32.mrb[37].mxu0 }
0x1055   :  { %v3729_v46 = vadd.f32 %v7412_v41, %v3728_v45 }
0x1056   :  { %v3738_v47 = vadd.f32 %v3734_v18, %v3545_v31 }
0x1057   :  { %v3737_v48 = vadd.f32 %v3729_v46, %v3544_v28 }
0x1058   :  { %v3744_v49 = vsel %vm354_vm2, %v3738_v47, 0.0 }
0x1059   :  { %3745 = vadd.xlane.f32.xlu0 %v3744_v49  ;;  %v3741_v53 = vsel %vm354_vm2, %v3737_v48, 0.0 }
0x105a   :  { %3742 = vadd.xlane.f32.xlu1 %v3741_v53 }
0x10e6   :  { %v3746_v50 = vpop.xlane.xlu0 %3745 }
0x10e7   :  { %v3748_v12 = vmul.f32 0.03125, %v3746_v50  ;;  %v3743_v17 = vpop.xlane.xlu1 %3742 }
0x10e8   :  { %v3747_v51 = vmul.f32 0.03125, %v3743_v17 }
0x10e9   :  { %v3750_v52 = vsub.f32 %v3738_v47, %v3748_v12 }
0x10ea   :  { %v3749_v54 = vsub.f32 %v3737_v48, %v3747_v51 }
0x10eb   :  { %v3752_v55 = vmul.f32 %v3750_v52, %v3750_v52 }
0x10ec   :  { %v3751_v15 = vmul.f32 %v3749_v54, %v3749_v54 }
0x10ed   :  { %v3756_v16 = vsel %vm354_vm2, %v3752_v55, 0.0 }
0x10ee   :  { %3757 = vadd.xlane.f32.xlu0 %v3756_v16  ;;  %v3753_v56 = vsel %vm354_vm2, %v3751_v15, 0.0 }
0x10ef   :  { %3754 = vadd.xlane.f32.xlu1 %v3753_v56 }
0x117b   :  { %v3758_v61 = vpop.xlane.xlu0 %3757 }
0x117c   :  { %v3760_v62 = vmul.f32 0.03125, %v3758_v61  ;;  %v3755_v63 = vpop.xlane.xlu1 %3754 }
0x117d   :  { %v3759_v0 = vmul.f32 0.03125, %v3755_v63 }
0x117e   :  { %v3762_v1 = vadd.f32 1e-05, %v3760_v62 }
0x117f   :  { %v3761_v2 = vadd.f32 1e-05, %v3759_v0 }
0x1180   :  { %8501 = vrsqrt.f32 %v3762_v1 }
0x1181   :  { %8503 = vrsqrt.f32 %v3761_v2 }
0x118a   :  { %v8502_v3 = vpop.eup %8501 }
0x118b   :  { %v8504_v5 = vpop.eup %8503  ;;  %v3766_v6 = vmul.f32 %v8502_v3, %v3750_v52 }
0x118c   :  { %v3765_v7 = vmul.f32 %v8504_v5, %v3749_v54 }
0x118d   :  { %v3774_v9 = vmul.f32 %v7415_v4, %v3766_v6 }
0x118e   :  { %v3773_v10 = vmul.f32 %v7415_v4, %v3765_v7 }
0x118f   :  { %v9623_v13 = vadd.f32 %v7416_v8, %v3774_v9 }
0x1190   :  { %v9621_v11 = vadd.f32 %v7416_v8, %v3773_v10 }
0x1192   :  { %8016 = vmatprep.mubr.msk.f32.mxu1 %vm354_vm2, %v9621_v11 }
0x1193   :  { %8017 = vmatmul.mubr.msk.f32.vlgmr.msra.gmra.mrb[44].mxu1 %vm354_vm2, %v9623_v13 }
0x1194   :  { %8021 = vmatprep.mubr.msk.f32.mxu1 %vm8851_vm3, %v8850_v19 }
0x1266   :  { %v8018_v20 = vpop.f32.mrb[44].mxu1 }
0x1267   :  { %v3868_v21 = vpop.f32.mrb[45].mxu1  ;;  %v9637_v23 = vadd.f32 %v8018_v20, %v7421_v14 }
0x1268   :  { %v3869_v22 = vadd.f32 %v7421_v14, %v3868_v21 }
0x126a   :  { %4047 = vrot.lane.b32.xlu0 %v3869_v22, %s8855_s8  ;;  %3885 = vrot.lane.b32.xlu1 %v3869_v22, %s8853_s5 }
0x126e   :  { %4207 = vrot.lane.b32.xlu0 %v3869_v22, %s8857_s19  ;;  %4045 = vrot.lane.b32.xlu1 %v3869_v22, %s8852_s14 }
0x1272   :  { %4369 = vrot.lane.b32.xlu0 %v3869_v22, %s8858_s6  ;;  %4209 = vrot.lane.b32.xlu1 %v3869_v22, %s8854_s24 }
0x1276   :  { %4709 = vrot.lane.b32.xlu0 %v9637_v23, %s8855_s8  ;;  %4371 = vrot.lane.b32.xlu1 %v3869_v22, %s8856_s23 }
0x127a   :  { %4871 = vrot.lane.b32.xlu0 %v9637_v23, %s8854_s24  ;;  %4547 = vrot.lane.b32.xlu1 %v9637_v23, %s8853_s5 }
0x127e   :  { %5033 = vrot.lane.b32.xlu0 %v9637_v23, %s8856_s23  ;;  %4707 = vrot.lane.b32.xlu1 %v9637_v23, %s8852_s14 }
0x1282   :  { %3969 = vrot.lane.b32.xlu0 %v3869_v22, %s8860_s25  ;;  %4869 = vrot.lane.b32.xlu1 %v9637_v23, %s8857_s19 }
0x1286   :  { %4293 = vrot.lane.b32.xlu0 %v3869_v22, %s8862_s2  ;;  %5031 = vrot.lane.b32.xlu1 %v9637_v23, %s8858_s6 }
0x128a   :  { %4131 = vrot.lane.b32.xlu1 %v3869_v22, %s8859_s0 }
0x128e   :  { %4455 = vrot.lane.b32.xlu1 %v3869_v22, %s10097_s12 }
0x12dc   :  { %v4048_v25 = vpop.permute.xlu0 %4047  ;;  %v3886_v26 = vpop.permute.xlu1 %3885 }
0x12dd   :  { %8020 = vmatpush3.xpose.msk.msra.mxu1 %vm444_vm4, %v3886_v26  ;;  %8030 = vmatpush3.xpose.msk.msra.mxu0 %vm444_vm4, %v4048_v25 }
0x12de   :  { %8039 = vmatprep.subr.mxu0 %v8850_v19  ;;  %8024 = vmatprep.subr.mxu1 %v8850_v19 }
0x12e0   :  { %v4208_v28 = vpop.permute.xlu0 %4207  ;;  %8022 = vmatmul.mubr.msk.f32.vlgmr.msra.gmra.mrb[46].mxu1 %vm444_vm4, %v3869_v22  ;;  %v4046_v30 = vpop.permute.xlu1 %4045 }
0x12e1   :  { %8032 = vmatmul.mubr.msk.f32.vlgmr.msra.gmra.mrb[38].mxu0 %vm444_vm4, %v4046_v30  ;;  %8026 = vmatprep.mubr.msk.f32.mxu1 %vm8851_vm3, %v8850_v19 }
0x12e2   :  { %8041 = vmatprep.mubr.msk.f32.mxu0 %vm8851_vm3, %v8850_v19 }
0x12e4   :  { %v4370_v31 = vpop.permute.xlu0 %4369  ;;  %v4210_v32 = vpop.permute.xlu1 %4209 }
0x12e5   :  { %8040 = vmatpush3.xpose.msk.msra.mxu0 %vm444_vm4, %v4210_v32 }
0x12e6   :  { %8049 = vmatprep.subr.mxu0 %v8850_v19 }
0x12e8   :  { %v4710_v33 = vpop.permute.xlu0 %4709  ;;  %8042 = vmatmul.mubr.msk.f32.vlgmr.msra.gmra.mrb[40].mxu0 %vm444_vm4, %v4208_v28  ;;  %v4372_v34 = vpop.permute.xlu1 %4371 }
0x12e9   :  { %8050 = vmatpush3.xpose.msk.msra.mxu0 %vm444_vm4, %v4372_v34  ;;  %8051 = vmatprep.mubr.msk.f32.mxu0 %vm8851_vm3, %v8850_v19 }
0x12ea   :  { %8059 = vmatprep.subr.mxu0 %v8850_v19 }
0x12ec   :  { %v4872_v35 = vpop.permute.xlu0 %4871  ;;  %8052 = vmatmul.mubr.msk.f32.vlgmr.msra.gmra.mrb[42].mxu0 %vm444_vm4, %v4370_v31  ;;  %v4548_v36 = vpop.permute.xlu1 %4547 }
0x12ed   :  { %8060 = vmatpush3.xpose.msk.msra.mxu0 %vm444_vm4, %v4548_v36  ;;  %8061 = vmatprep.mubr.msk.f32.mxu0 %vm8851_vm3, %v8850_v19 }
0x12ee   :  { %8069 = vmatprep.subr.mxu0 %v8850_v19 }
0x12f0   :  { %v5034_v37 = vpop.permute.xlu0 %5033  ;;  %8062 = vmatmul.mubr.msk.f32.vlgmr.msra.gmra.mrb[44].mxu0 %vm444_vm4, %v9637_v23  ;;  %v4708_v38 = vpop.permute.xlu1 %4707 }
0x12f1   :  { %8070 = vmatpush3.xpose.msk.msra.mxu0 %vm444_vm4, %v4710_v33  ;;  %8071 = vmatprep.mubr.msk.f32.mxu0 %vm8851_vm3, %v8850_v19 }
0x12f2   :  { %8079 = vmatprep.subr.mxu0 %v8850_v19 }
0x12f4   :  { %v3970_v39 = vpop.permute.xlu0 %3969  ;;  %8072 = vmatmul.mubr.msk.f32.vlgmr.msra.gmra.mrb[46].mxu0 %vm444_vm4, %v4708_v38  ;;  %v4870_v40 = vpop.permute.xlu1 %4869 }
0x12f5   :  { %8025 = vmatpush3.msra.mxu1 %v3970_v39  ;;  %8080 = vmatpush3.xpose.msk.msra.mxu0 %vm444_vm4, %v4872_v35 }
0x12f6   :  { %8081 = vmatprep.mubr.msk.f32.mxu0 %vm8851_vm3, %v8850_v19  ;;  %8089 = vmatprep.subr.mxu0 %v8850_v19 }
0x12f7   :  { %8034 = vmatprep.subr.mxu1 %v8850_v19 }
0x12f8   :  { %8082 = vmatmul.mubr.msk.f32.vlgmr.msra.gmra.mrb[48].mxu0 %vm444_vm4, %v4870_v40  ;;  %v5032_v24 = vpop.permute.xlu1 %5031  ;;  %v4294_v33 = vpop.permute.xlu0 %4293 }
0x12f9   :  { %8090 = vmatpush3.xpose.msk.msra.mxu0 %vm444_vm4, %v5034_v37  ;;  %8091 = vmatprep.mubr.msk.f32.mxu0 %vm8851_vm3, %v8850_v19 }
0x12fc   :  { %8092 = vmatmul.mubr.msk.f32.vlgmr.msra.gmra.mrb[50].mxu0 %vm444_vm4, %v5032_v24  ;;  %v4132_v32 = vpop.permute.xlu1 %4131 }
0x1300   :  { %v4456_v34 = vpop.permute.xlu1 %4455 }
0x13b3   :  { %v3957_v41 = vpop.f32.mrb[46].mxu1 }
0x13b4   :  { %v3961_v43 = vmul.f32 0.35355338, %v3957_v41  ;;  %v8023_v18 = vpop.f32.mrb[47].mxu1  ;;  %v4119_v45 = vpop.f32.mrb[38].mxu0 }
0x13b5   :  { %v4123_v46 = vmul.f32 0.35355338, %v4119_v45  ;;  %v8033_v47 = vpop.f32.mrb[39].mxu0 }
0x13b6   :  { %v3962_v48 = vmul.f32 1.442695, %v3961_v43 }
0x13b7   :  { %v4124_v49 = vmul.f32 1.442695, %v4123_v46 }
0x13b8   :  { %8505 = vpow2.f32 %v3962_v48 }
0x13b9   :  { %8507 = vpow2.f32 %v4124_v49 }
0x13bb   :  { %v4281_v53 = vpop.f32.mrb[40].mxu0 }
0x13bc   :  { %v4285_v50 = vmul.f32 0.35355338, %v4281_v53  ;;  %v8043_v12 = vpop.f32.mrb[41].mxu0 }
0x13be   :  { %v4286_v17 = vmul.f32 1.442695, %v4285_v50 }
0x13bf   :  { %v4443_v51 = vpop.f32.mrb[42].mxu0 }
0x13c0   :  { %8509 = vpow2.f32 %v4286_v17  ;;  %v4447_v52 = vmul.f32 0.35355338, %v4443_v51  ;;  %v8053_v54 = vpop.f32.mrb[43].mxu0 }
0x13c2   :  { %v8506_v55 = vpop.eup %8505  ;;  %v4448_v15 = vmul.f32 1.442695, %v4447_v52 }
0x13c3   :  { %v9697_v16 = vpop.eup %8507  ;;  %v4619_v56 = vpop.f32.mrb[44].mxu0  ;;  %v3964_v29 = vsel %vm444_vm4, %v8506_v55, 0.0 }
0x13c4   :  { %8511 = vpow2.f32 %v4448_v15  ;;  %3965 = vadd.xlane.f32.xlu0 %v3964_v29  ;;  %v8063_v27 = vpop.f32.mrb[45].mxu0  ;;  %v4126_v57 = vsel %vm444_vm4, %v9697_v16, 0.0  ;;  %v4623_v4 = vmul.f32 0.35355338, %v4619_v56 }
0x13c5   :  { %4127 = vadd.xlane.f32.xlu1 %v4126_v57 }
0x13c6   :  { %v4624_v5 = vmul.f32 1.442695, %v4623_v4 }
0x13c7   :  { %v4781_v58 = vpop.f32.mrb[46].mxu0 }
0x13c8   :  { %v8073_v59 = vpop.f32.mrb[47].mxu0  ;;  %8513 = vpow2.f32 %v4624_v5  ;;  %v4785_v9 = vmul.f32 0.35355338, %v4781_v58  ;;  %v7426_v5 = vld [vmem:[%s10094_s1 + $0x30] sm:$0xff] }
0x13ca   :  { %v8510_v60 = vpop.eup %8509  ;;  %v4786_v14 = vmul.f32 1.442695, %v4785_v9  ;;  %v7465_v9 = vld [vmem:[%s10095_s15 + $0x28] sm:$0xff] }
0x13cb   :  { %v4943_v61 = vpop.f32.mrb[48].mxu0  ;;  %v4288_v62 = vsel %vm444_vm4, %v8510_v60, 0.0 }
0x13cc   :  { %4289 = vadd.xlane.f32.xlu0 %v4288_v62  ;;  %v8083_v63 = vpop.f32.mrb[49].mxu0  ;;  %v4947_v6 = vmul.f32 0.35355338, %v4943_v61 }
0x13ce   :  { %v8512_v0 = vpop.eup %8511  ;;  %v4948_v7 = vmul.f32 1.442695, %v4947_v6  ;;  %v7427_v6 = vld [vmem:[%s10094_s1 + $0x38] sm:$0xff] }
0x13cf   :  { %v5105_v1 = vpop.f32.mrb[50].mxu0  ;;  %v4450_v2 = vsel %vm444_vm4, %v8512_v0, 0.0 }
0x13d0   :  { %4451 = vadd.xlane.f32.xlu0 %v4450_v2  ;;  %v8093_v3 = vpop.f32.mrb[51].mxu0  ;;  %v5109_v8 = vmul.f32 0.35355338, %v5105_v1  ;;  %8515 = vpow2.f32 %v4948_v7  ;;  %v7425_v1 = vld [vmem:[%s10094_s1 + $0x28] sm:$0xff]  ;;  %v8340_v7 = vpack.c.bf16 %v7427_v6, %v7426_v5 }
0x13d2   :  { %v5110_v10 = vmul.f32 1.442695, %v5109_v8  ;;  %v8514_v20 = vpop.eup %8513  ;;  %v7464_v8 = vld [vmem:[%s10095_s15 + $0x20] sm:$0xff] }
0x13d3   :  { %v4626_v21 = vsel %vm444_vm4, %v8514_v20, 0.0 }
0x13d4   :  { %8517 = vpow2.f32 %v5110_v10  ;;  %v8352_v10 = vpack.c.bf16 %v7465_v9, %v7464_v8  ;;  %v7456_v9 = vld [vmem:[#allocation16 + $0x1] ss:$0 sm:$0xff] }
0x13d5   :  { %8519 = vpow2.f32 %v4786_v14 }
0x13d6   :  { %4793 = vrot.lane.b32.xlu1 %v9637_v23, %s8859_s0  ;;  %s10098_s0 = smov 16  }
0x13da   :  { %v9709_v22 = vpop.eup %8515 }
0x13db   :  { %v4950_v25 = vsel %vm444_vm4, %v9709_v22, 0.0 }
0x13de   :  { %v9713_v26 = vpop.eup %8517 }
0x13df   :  { %v8520_v28 = vpop.eup %8519  ;;  %v5112_v30 = vsel %vm444_vm4, %v9713_v26, 0.0 }
0x13e0   :  { %v4788_v31 = vsel %vm444_vm4, %v8520_v28, 0.0 }
0x13e6   :  { %4631 = vrot.lane.b32.xlu0 %v9637_v23, %s8860_s25  ;;  %s10099_s25 = smov 24  }
0x13fa   :  { %4627 = vadd.xlane.f32.xlu1 %v4626_v21 }
0x13fe   :  { %4951 = vadd.xlane.f32.xlu1 %v4950_v25 }
0x1402   :  { %5113 = vadd.xlane.f32.xlu1 %v5112_v30 }
0x1405   :  { %4789 = vadd.xlane.f32.xlu0 %v4788_v31 }
0x1413   :  { %5117 = vrot.lane.b32.xlu1 %v9637_v23, %s10097_s12 }
0x141b   :  { %4955 = vrot.lane.b32.xlu0 %v9637_v23, %s8862_s2 }
0x1451   :  { %v3966_v35 = vpop.xlane.xlu0 %3965 }
0x1452   :  { %8521 = vrcp.f32 %v3966_v35  ;;  %v4128_v36 = vpop.xlane.xlu1 %4127 }
0x1453   :  { %8523 = vrcp.f32 %v4128_v36 }
0x1456   :  { %v4794_v47 = vpop.permute.xlu1 %4793 }
0x1459   :  { %v4290_v37 = vpop.xlane.xlu0 %4289 }
0x145a   :  { %8525 = vrcp.f32 %v4290_v37  ;;  %v7466_v37 = vld [vmem:[%s10095_s15 + $0x30] sm:$0xff] }
0x145c   :  { %v8522_v38 = vpop.eup %8521 }
0x145d   :  { %v3968_v39 = vmul.f32 %v8522_v38, %v8506_v55  ;;  %v4452_v40 = vpop.xlane.xlu0 %4451  ;;  %v8524_v24 = vpop.eup %8523  ;;  %v7467_v38 = vld [vmem:[%s10095_s15 + $0x38] sm:$0xff] }
0x145e   :  { %8527 = vrcp.f32 %v4452_v40  ;;  %v4130_v23 = vmul.f32 %v8524_v24, %v9697_v16 }
0x145f   :  { %8027 = vmatmul.mubr.msk.f32.vlgmr.msra.gmra.mrb[48].mxu1 %vm444_vm4, %v3968_v39 }
0x1460   :  { %8035 = vmatpush3.msra.mxu1 %v4132_v32  ;;  %8036 = vmatprep.mubr.msk.f32.mxu1 %vm8851_vm3, %v8850_v19 }
0x1461   :  { %8044 = vmatprep.subr.mxu1 %v8850_v19  ;;  %v4632_v46 = vpop.permute.xlu0 %4631 }
0x1463   :  { %8037 = vmatmul.mubr.msk.f32.vlgmr.msra.gmra.mrb[50].mxu1 %vm444_vm4, %v4130_v23  ;;  %v8356_v23 = vpack.c.bf16 %v7467_v38, %v7466_v37 }
0x1464   :  { %v8526_v41 = vpop.eup %8525  ;;  %8045 = vmatpush3.msra.mxu1 %v4294_v33  ;;  %8046 = vmatprep.mubr.msk.f32.mxu1 %vm8851_vm3, %v8850_v19 }
0x1465   :  { %v4292_v43 = vmul.f32 %v8526_v41, %v8510_v60  ;;  %8054 = vmatprep.subr.mxu1 %v8850_v19 }
0x1467   :  { %8047 = vmatmul.mubr.msk.f32.vlgmr.msra.gmra.mrb[52].mxu1 %vm444_vm4, %v4292_v43  ;;  %v7452_v43 = vld [vmem:[#allocation7 + $0x1] ss:$0 sm:$0xff] }
0x1468   :  { %v8528_v18 = vpop.eup %8527  ;;  %8055 = vmatpush3.msra.mxu1 %v4456_v34  ;;  %8056 = vmatprep.mubr.msk.f32.mxu1 %vm8851_vm3, %v8850_v19 }
0x1469   :  { %v4454_v45 = vmul.f32 %v8528_v18, %v8512_v0  ;;  %8064 = vmatprep.subr.mxu1 %v8850_v19  ;;  %v7424_v0 = vld [vmem:[%s10094_s1 + $0x20] sm:$0xff] }
0x146a   :  { %v8336_v2 = vpack.c.bf16 %v7425_v1, %v7424_v0 }
0x146b   :  { %8057 = vmatmul.mubr.msk.f32.vlgmr.msra.gmra.mrb[54].mxu1 %vm444_vm4, %v4454_v45 }
0x146c   :  { %8065 = vmatpush3.msra.mxu1 %v4632_v46  ;;  %8066 = vmatprep.mubr.msk.f32.mxu1 %vm8851_vm3, %v8850_v19 }
0x146d   :  { %8074 = vmatprep.subr.mxu1 %v8850_v19  ;;  %8337 = vmatprep.subr.bf16.mxu0 %v8336_v2 }
0x146e   :  { %8339 = vmatpush3.bf16.msra.mxu0 %v8336_v2 }
0x146f   :  { %8341 = vmatprep.subr.bf16.mxu0 %v8340_v7 }
0x1472   :  { %8343 = vmatpush3.bf16.msra.mxu0 %v8340_v7  ;;  %v7455_v7 = vld [vmem:[#allocation14 + $0x1] ss:$0 sm:$0xff] }
0x1473   :  { %8353 = vmatprep.subr.bf16.mxu0 %v8352_v10 }
0x1487   :  { %v4628_v48 = vpop.xlane.xlu1 %4627 }
0x1488   :  { %8529 = vrcp.f32 %v4628_v48 }
0x148b   :  { %v4952_v49 = vpop.xlane.xlu1 %4951 }
0x148f   :  { %v5114_v17 = vpop.xlane.xlu1 %5113 }
0x1492   :  { %v8530_v53 = vpop.eup %8529  ;;  %v4790_v50 = vpop.xlane.xlu0 %4789 }
0x1493   :  { %v4630_v12 = vmul.f32 %v8530_v53, %v8514_v20  ;;  %8531 = vrcp.f32 %v4790_v50  ;;  %v5118_v56 = vpop.permute.xlu1 %5117  ;;  %v7468_v53 = vld [vmem:[#allocation10 + $0x1] ss:$0 sm:$0xff] }
0x1494   :  { %8533 = vrcp.f32 %v4952_v49 }
0x1495   :  { %8067 = vmatmul.mubr.msk.f32.vlgmr.msra.gmra.mrb[56].mxu1 %vm444_vm4, %v4630_v12  ;;  %8535 = vrcp.f32 %v5114_v17 }
0x1496   :  { %8075 = vmatpush3.msra.mxu1 %v4794_v47  ;;  %8076 = vmatprep.mubr.msk.f32.mxu1 %vm8851_vm3, %v8850_v19  ;;  %v4956_v55 = vpop.permute.xlu0 %4955 }
0x1497   :  { %8084 = vmatprep.subr.mxu1 %v8850_v19 }
0x149d   :  { %v8532_v51 = vpop.eup %8531 }
0x149e   :  { %v4792_v52 = vmul.f32 %v8532_v51, %v8520_v28  ;;  %v8534_v54 = vpop.eup %8533 }
0x149f   :  { %v4954_v15 = vmul.f32 %v8534_v54, %v9709_v22  ;;  %v8536_v16 = vpop.eup %8535 }
0x14a0   :  { %8077 = vmatmul.mubr.msk.f32.vlgmr.msra.gmra.mrb[58].mxu1 %vm444_vm4, %v4792_v52  ;;  %v5116_v29 = vmul.f32 %v8536_v16, %v9713_v26 }
0x14a1   :  { %8085 = vmatpush3.msra.mxu1 %v4956_v55  ;;  %8086 = vmatprep.mubr.msk.f32.mxu1 %vm8851_vm3, %v8850_v19 }
0x14a2   :  { %8094 = vmatprep.subr.mxu1 %v8850_v19 }
0x14a4   :  { %8087 = vmatmul.mubr.msk.f32.vlgmr.msra.gmra.mrb[60].mxu1 %vm444_vm4, %v4954_v15 }
0x14a5   :  { %8095 = vmatpush3.msra.mxu1 %v5118_v56  ;;  %8096 = vmatprep.mubr.msk.f32.mxu1 %vm8851_vm3, %v8850_v19 }
0x14a8   :  { %8097 = vmatmul.mubr.msk.f32.vlgmr.msra.gmra.mrb[62].mxu1 %vm444_vm4, %v5116_v29 }
0x1532   :  { %v4041_v27 = vpop.f32.mrb[48].mxu1 }
0x1533   :  { %v8028_v57 = vpop.f32.mrb[49].mxu1 }
0x1536   :  { %v4203_v58 = vpop.f32.mrb[50].mxu1 }
0x1537   :  { %4532 = vrot.lane.b32.xlu0 %v4203_v58, %s8841_s27  ;;  %v8038_v59 = vpop.f32.mrb[51].mxu1  ;;  %v7457_v58 = vld [vmem:[%s10096_s13 + $0x20] sm:$0xff] }
0x1538   :  { %v7458_v59 = vld [vmem:[%s10096_s13 + $0x28] sm:$0xff] }
0x153a   :  { %v4365_v60 = vpop.f32.mrb[52].mxu1 }
0x153b   :  { %4536 = vrot.lane.b32.xlu1 %v4365_v60, %s10098_s0  ;;  %v8048_v61 = vpop.f32.mrb[53].mxu1  ;;  %v8344_v60 = vpack.c.bf16 %v7458_v59, %v7457_v58 }
0x153c   :  { %v7459_v61 = vld [vmem:[%s10096_s13 + $0x30] sm:$0xff] }
0x153d   :  { %8345 = vmatprep.subr.bf16.mxu1 %v8344_v60 }
0x153e   :  { %v4527_v62 = vpop.f32.mrb[54].mxu1  ;;  %8347 = vmatpush3.bf16.msra.mxu1 %v8344_v60 }
0x153f   :  { %4540 = vrot.lane.b32.xlu1 %v4527_v62, %s10099_s25  ;;  %v8058_v63 = vpop.f32.mrb[55].mxu1  ;;  %v7460_v62 = vld [vmem:[%s10096_s13 + $0x38] sm:$0xff] }
0x1540   :  { %v8348_v63 = vpack.c.bf16 %v7460_v62, %v7459_v61 }
0x1542   :  { %8349 = vmatprep.subr.bf16.mxu1 %v8348_v63 }
0x1543   :  { %8351 = vmatpush3.bf16.msra.mxu1 %v8348_v63 }
0x1544   :  { %8132 = vmatprep.subr.mxu1 %v8850_v19 }
0x1568   :  { %v4703_v3 = vpop.f32.mrb[56].mxu1 }
0x1569   :  { %v8068_v4 = vpop.f32.mrb[57].mxu1 }
0x1573   :  { %v4865_v14 = vpop.f32.mrb[58].mxu1 }
0x1574   :  { %5194 = vrot.lane.b32.xlu0 %v4865_v14, %s8841_s27  ;;  %v8078_v20 = vpop.f32.mrb[59].mxu1 }
0x1577   :  { %v5027_v21 = vpop.f32.mrb[60].mxu1 }
0x1578   :  { %5198 = vrot.lane.b32.xlu0 %v5027_v21, %s10098_s0  ;;  %v8088_v22 = vpop.f32.mrb[61].mxu1 }
0x157b   :  { %v5189_v25 = vpop.f32.mrb[62].mxu1 }
0x157c   :  { %5202 = vrot.lane.b32.xlu1 %v5189_v25, %s10099_s25  ;;  %v8098_v26 = vpop.f32.mrb[63].mxu1 }
0x157d   :  { %v7461_v26 = vld [vmem:[#allocation8 + $0x1] ss:$0 sm:$0xff] }
0x15a9   :  { %v4533_v28 = vpop.permute.xlu0 %4532 }
0x15aa   :  { %v4543_v31 = vsel %vm444_vm4, %v4041_v27, %v4533_v28 }
0x15ad   :  { %v4537_v30 = vpop.permute.xlu1 %4536 }
0x15ae   :  { %v4544_v32 = vsel %vm1102_vm5, %v4543_v31, %v4537_v30 }
0x15b1   :  { %v4541_v33 = vpop.permute.xlu1 %4540 }
0x15b2   :  { %v4545_v34 = vsel %vm1104_vm6, %v4544_v32, %v4541_v33 }
0x15b3   :  { %8107 = vmatprep.mubr.msk.f32.mxu0 %vm354_vm2, %v4545_v34 }
0x15e6   :  { %v5195_v35 = vpop.permute.xlu0 %5194 }
0x15e7   :  { %v5205_v39 = vsel %vm444_vm4, %v4703_v3, %v5195_v35 }
0x15ea   :  { %v5199_v36 = vpop.permute.xlu0 %5198 }
0x15eb   :  { %v5206_v40 = vsel %vm1102_vm5, %v5205_v39, %v5199_v36 }
0x15ee   :  { %v5203_v24 = vpop.permute.xlu1 %5202 }
0x15ef   :  { %v5207_v41 = vsel %vm1104_vm6, %v5206_v40, %v5203_v24 }
0x15f0   :  { %8108 = vmatmul.mubr.msk.f32.vlgmr.msra.gmra.mrb[52].mxu0 %vm354_vm2, %v5207_v41 }
0x15f1   :  { %8355 = vmatpush3.bf16.msra.mxu0 %v8352_v10  ;;  %8129 = vmatprep.mubr.msk.f32.mxu0 %vm354_vm2, %v9372_v42 }
0x15f2   :  { %8357 = vmatprep.subr.bf16.mxu0 %v8356_v23 }
0x15f5   :  { %8359 = vmatpush3.bf16.msra.mxu0 %v8356_v23 }
0x15f6   :  { %8142 = vmatprep.subr.mxu0 %v8850_v19 }
0x15f8   :  { %8130 = vmatmul.mubr.msk.f32.vlgmr.msra.gmra.mrb[54].mxu0 %vm354_vm2, %v9380_v44 }
0x15f9   :  { %8144 = vmatprep.mubr.msk.f32.mxu0 %vm8851_vm3, %v8850_v19 }
0x16c3   :  { %v8109_v18 = vpop.f32.mrb[52].mxu0 }
0x16c4   :  { %v5292_v45 = vadd.f32 %v8109_v18, %v7452_v43  ;;  %v5286_v46 = vpop.f32.mrb[53].mxu0 }
0x16c5   :  { %v5287_v47 = vadd.f32 %v7452_v43, %v5286_v46 }
0x16c6   :  { %v5296_v48 = vadd.f32 %v5292_v45, %v9623_v13 }
0x16c7   :  { %v5295_v49 = vadd.f32 %v5287_v47, %v9621_v11 }
0x16c8   :  { %v5304_v42 = vsel %vm354_vm2, %v5296_v48, 0.0 }
0x16c9   :  { %5305 = vadd.xlane.f32.xlu1 %v5304_v42  ;;  %v5301_v50 = vsel %vm354_vm2, %v5295_v49, 0.0 }
0x16ca   :  { %5302 = vadd.xlane.f32.xlu0 %v5301_v50 }
0x16cb   :  { %v8131_v44 = vpop.f32.mrb[54].mxu0 }
0x16cc   :  { %v9802_v12 = vadd.f32 %v8131_v44, %v7468_v53  ;;  %v5516_v17 = vpop.f32.mrb[55].mxu0 }
0x16cd   :  { %v9804_v51 = vadd.f32 %v7468_v53, %v5516_v17 }
0x16da   :  { %5694 = vrot.lane.b32.xlu1 %v9804_v51, %s8852_s14 }
0x16de   :  { %5856 = vrot.lane.b32.xlu1 %v9804_v51, %s8857_s19 }
0x1756   :  { %v5306_v11 = vpop.xlane.xlu1 %5305 }
0x1757   :  { %v5308_v13 = vmul.f32 0.03125, %v5306_v11  ;;  %v5303_v52 = vpop.xlane.xlu0 %5302 }
0x1758   :  { %v5307_v54 = vmul.f32 0.03125, %v5303_v52 }
0x1759   :  { %v5310_v55 = vsub.f32 %v5296_v48, %v5308_v13 }
0x175a   :  { %v5309_v15 = vsub.f32 %v5295_v49, %v5307_v54  ;;  %v5695_v16 = vpop.permute.xlu1 %5694 }
0x175b   :  { %8143 = vmatpush3.xpose.msk.msra.mxu0 %vm444_vm4, %v5695_v16  ;;  %v5312_v27 = vmul.f32 %v5310_v55, %v5310_v55 }
0x175c   :  { %v5311_v56 = vmul.f32 %v5309_v15, %v5309_v15  ;;  %8152 = vmatprep.subr.mxu0 %v8850_v19 }
0x175d   :  { %v5316_v57 = vsel %vm354_vm2, %v5312_v27, 0.0 }
0x175e   :  { %v5313_v29 = vsel %vm354_vm2, %v5311_v56, 0.0  ;;  %v5857_v33 = vpop.permute.xlu1 %5856 }
0x175f   :  { %5314 = vadd.xlane.f32.xlu0 %v5313_v29 }
0x1763   :  { %5317 = vadd.xlane.f32.xlu0 %v5316_v57 }
0x17ec   :  { %v5315_v0 = vpop.xlane.xlu0 %5314 }
0x17ed   :  { %v5319_v1 = vmul.f32 0.03125, %v5315_v0 }
0x17ef   :  { %v5321_v2 = vadd.f32 1e-05, %v5319_v1 }
0x17f0   :  { %v5318_v3 = vpop.xlane.xlu0 %5317 }
0x17f1   :  { %8537 = vrsqrt.f32 %v5321_v2  ;;  %v5320_v4 = vmul.f32 0.03125, %v5318_v3 }
0x17f3   :  { %v5322_v5 = vadd.f32 1e-05, %v5320_v4 }
0x17f5   :  { %8539 = vrsqrt.f32 %v5322_v5 }
0x17fb   :  { %v8538_v6 = vpop.eup %8537 }
0x17fc   :  { %v5325_v8 = vmul.f32 %v8538_v6, %v5309_v15 }
0x17fe   :  { %v5333_v10 = vmul.f32 %v7455_v7, %v5325_v8 }
0x17ff   :  { %v8540_v14 = vpop.eup %8539 }
0x1800   :  { %v5326_v20 = vmul.f32 %v8540_v14, %v5310_v55  ;;  %v9827_v21 = vadd.f32 %v7456_v9, %v5333_v10 }
0x1802   :  { %v5334_v22 = vmul.f32 %v7455_v7, %v5326_v20  ;;  %8118 = vmatprep.mubr.msk.f32.mxu1 %vm354_vm2, %v9827_v21 }
0x1804   :  { %v9831_v25 = vadd.f32 %v7456_v9, %v5334_v22 }
0x1806   :  { %8119 = vmatmul.mubr.msk.f32.vlgmr.msra.gmra.mrb[64].mxu1 %vm354_vm2, %v9831_v25 }
0x1807   :  { %8133 = vmatpush3.xpose.msk.msra.mxu1 %vm444_vm4, %v9804_v51  ;;  %8134 = vmatprep.mubr.msk.f32.mxu1 %vm8851_vm3, %v8850_v19 }
0x1808   :  { %8137 = vmatprep.subr.mxu1 %v8850_v19 }
0x18d9   :  { %v8120_v28 = vpop.f32.mrb[64].mxu1 }
0x18da   :  { %v5428_v30 = vpop.f32.mrb[65].mxu1  ;;  %v5434_v32 = vadd.f32 %v8120_v28, %v7461_v26 }
0x18db   :  { %v5429_v31 = vadd.f32 %v7461_v26, %v5428_v30 }
0x18dd   :  { %5854 = vrot.lane.b32.xlu1 %v5429_v31, %s8857_s19  ;;  %5692 = vrot.lane.b32.xlu0 %v5429_v31, %s8852_s14 }
0x18de   :  { %8135 = vmatmul.mubr.msk.f32.vlgmr.msra.gmra.mrb[66].mxu1 %vm444_vm4, %v5429_v31 }
0x18df   :  { %8139 = vmatprep.mubr.msk.f32.mxu1 %vm8851_vm3, %v8850_v19 }
0x18e1   :  { %6016 = vrot.lane.b32.xlu1 %v5429_v31, %s8858_s6  ;;  %6018 = vrot.lane.b32.xlu0 %v9804_v51, %s8858_s6 }
0x18e5   :  { %6353 = vrot.lane.b32.xlu1 %v5434_v32, %s8852_s14  ;;  %6355 = vrot.lane.b32.xlu0 %v9802_v12, %s8852_s14 }
0x18e9   :  { %6515 = vrot.lane.b32.xlu1 %v5434_v32, %s8857_s19  ;;  %6517 = vrot.lane.b32.xlu0 %v9802_v12, %s8857_s19 }
0x18ed   :  { %6677 = vrot.lane.b32.xlu1 %v5434_v32, %s8858_s6  ;;  %6679 = vrot.lane.b32.xlu0 %v9802_v12, %s8858_s6  ;;  %s10101_s6 = sld [smem:[#allocation37_spill]] }
0x18f1   :  { %5778 = vrot.lane.b32.xlu1 %v9804_v51, %s8855_s8  ;;  %5616 = vrot.lane.b32.xlu0 %v9804_v51, %s8853_s5 }
0x18f5   :  { %6102 = vrot.lane.b32.xlu1 %v9804_v51, %s8856_s23  ;;  %5940 = vrot.lane.b32.xlu0 %v9804_v51, %s8854_s24 }
0x194f   :  { %v5855_v34 = vpop.permute.xlu1 %5854  ;;  %v5693_v35 = vpop.permute.xlu0 %5692 }
0x1950   :  { %8145 = vmatmul.mubr.msk.f32.vlgmr.msra.gmra.mrb[56].mxu0 %vm444_vm4, %v5693_v35 }
0x1951   :  { %8153 = vmatpush3.xpose.msk.msra.mxu0 %vm444_vm4, %v5857_v33  ;;  %8154 = vmatprep.mubr.msk.f32.mxu0 %vm8851_vm3, %v8850_v19 }
0x1952   :  { %8162 = vmatprep.subr.mxu0 %v8850_v19 }
0x1953   :  { %v6019_v36 = vpop.permute.xlu0 %6018  ;;  %v6017_v37 = vpop.permute.xlu1 %6016 }
0x1954   :  { %8155 = vmatmul.mubr.msk.f32.vlgmr.msra.gmra.mrb[58].mxu0 %vm444_vm4, %v5855_v34 }
0x1955   :  { %8163 = vmatpush3.xpose.msk.msra.mxu0 %vm444_vm4, %v6019_v36  ;;  %8164 = vmatprep.mubr.msk.f32.mxu0 %vm8851_vm3, %v8850_v19 }
0x1956   :  { %8172 = vmatprep.subr.mxu0 %v8850_v19 }
0x1957   :  { %v6356_v38 = vpop.permute.xlu0 %6355  ;;  %v6354_v39 = vpop.permute.xlu1 %6353 }
0x1958   :  { %8165 = vmatmul.mubr.msk.f32.vlgmr.msra.gmra.mrb[60].mxu0 %vm444_vm4, %v6017_v37 }
0x1959   :  { %8173 = vmatpush3.xpose.msk.msra.mxu0 %vm444_vm4, %v9802_v12  ;;  %8174 = vmatprep.mubr.msk.f32.mxu0 %vm8851_vm3, %v8850_v19 }
0x195a   :  { %8182 = vmatprep.subr.mxu0 %v8850_v19 }
0x195b   :  { %v6518_v40 = vpop.permute.xlu0 %6517  ;;  %v6516_v23 = vpop.permute.xlu1 %6515 }
0x195c   :  { %8175 = vmatmul.mubr.msk.f32.vlgmr.msra.gmra.mrb[62].mxu0 %vm444_vm4, %v5434_v32 }
0x195d   :  { %8183 = vmatpush3.xpose.msk.msra.mxu0 %vm444_vm4, %v6356_v38  ;;  %8184 = vmatprep.mubr.msk.f32.mxu0 %vm8851_vm3, %v8850_v19 }
0x195e   :  { %8192 = vmatprep.subr.mxu0 %v8850_v19 }
0x195f   :  { %v6680_v24 = vpop.permute.xlu0 %6679  ;;  %v6678_v43 = vpop.permute.xlu1 %6677 }
0x1960   :  { %8185 = vmatmul.mubr.msk.f32.vlgmr.msra.gmra.mrb[64].mxu0 %vm444_vm4, %v6354_v39 }
0x1961   :  { %8193 = vmatpush3.xpose.msk.msra.mxu0 %vm444_vm4, %v6518_v40  ;;  %8194 = vmatprep.mubr.msk.f32.mxu0 %vm8851_vm3, %v8850_v19 }
0x1962   :  { %8202 = vmatprep.subr.mxu0 %v8850_v19 }
0x1963   :  { %v5617_v41 = vpop.permute.xlu0 %5616  ;;  %v5779_v22 = vpop.permute.xlu1 %5778 }
0x1964   :  { %8138 = vmatpush3.msra.mxu1 %v5617_v41  ;;  %8195 = vmatmul.mubr.msk.f32.vlgmr.msra.gmra.mrb[66].mxu0 %vm444_vm4, %v6516_v23 }
0x1965   :  { %8203 = vmatpush3.xpose.msk.msra.mxu0 %vm444_vm4, %v6680_v24  ;;  %8204 = vmatprep.mubr.msk.f32.mxu0 %vm8851_vm3, %v8850_v19 }
0x1966   :  { %8147 = vmatprep.subr.mxu1 %v8850_v19 }
0x1967   :  { %v5941_v3 = vpop.permute.xlu0 %5940  ;;  %v6103_v38 = vpop.permute.xlu1 %6102 }
0x1968   :  { %8205 = vmatmul.mubr.msk.f32.vlgmr.msra.gmra.mrb[68].mxu0 %vm444_vm4, %v6678_v43 }
0x19b1   :  { %v5604_v18 = vpop.f32.mrb[66].mxu1 }
0x19b2   :  { %v5608_v45 = vmul.f32 0.35355338, %v5604_v18  ;;  %v8136_v46 = vpop.f32.mrb[67].mxu1 }
0x19b4   :  { %v5609_v47 = vmul.f32 1.442695, %v5608_v45 }
0x19b6   :  { %8541 = vpow2.f32 %v5609_v47 }
0x19c0   :  { %v8542_v48 = vpop.eup %8541 }
0x19c1   :  { %v5611_v49 = vsel %vm444_vm4, %v8542_v48, 0.0 }
0x19c2   :  { %5612 = vadd.xlane.f32.xlu0 %v5611_v49 }
0x1a23   :  { %v5766_v42 = vpop.f32.mrb[56].mxu0 }
0x1a24   :  { %v5770_v53 = vmul.f32 0.35355338, %v5766_v42  ;;  %v8146_v50 = vpop.f32.mrb[57].mxu0 }
0x1a26   :  { %v5771_v44 = vmul.f32 1.442695, %v5770_v53 }
0x1a27   :  { %v5928_v17 = vpop.f32.mrb[58].mxu0 }
0x1a28   :  { %8543 = vpow2.f32 %v5771_v44  ;;  %v5932_v51 = vmul.f32 0.35355338, %v5928_v17  ;;  %v8156_v11 = vpop.f32.mrb[59].mxu0 }
0x1a2a   :  { %v5933_v13 = vmul.f32 1.442695, %v5932_v51 }
0x1a2b   :  { %v6090_v52 = vpop.f32.mrb[60].mxu0 }
0x1a2c   :  { %8545 = vpow2.f32 %v5933_v13  ;;  %v6094_v54 = vmul.f32 0.35355338, %v6090_v52  ;;  %v8166_v55 = vpop.f32.mrb[61].mxu0 }
0x1a2e   :  { %v6095_v15 = vmul.f32 1.442695, %v6094_v54 }
0x1a2f   :  { %v6265_v16 = vpop.f32.mrb[62].mxu0 }
0x1a30   :  { %8547 = vpow2.f32 %v6095_v15  ;;  %v8176_v56 = vpop.f32.mrb[63].mxu0  ;;  %v6269_v5 = vmul.f32 0.35355338, %v6265_v16 }
0x1a32   :  { %v8544_v29 = vpop.eup %8543  ;;  %v6270_v6 = vmul.f32 1.442695, %v6269_v5 }
0x1a33   :  { %v6427_v27 = vpop.f32.mrb[64].mxu0  ;;  %v5773_v57 = vsel %vm444_vm4, %v8544_v29, 0.0 }
0x1a34   :  { %5774 = vadd.xlane.f32.xlu1 %v5773_v57  ;;  %v8186_v58 = vpop.f32.mrb[65].mxu0  ;;  %v6431_v9 = vmul.f32 0.35355338, %v6427_v27 }
0x1a36   :  { %v8546_v59 = vpop.eup %8545  ;;  %v6432_v26 = vmul.f32 1.442695, %v6431_v9 }
0x1a37   :  { %v6589_v60 = vpop.f32.mrb[66].mxu0  ;;  %v5935_v61 = vsel %vm444_vm4, %v8546_v59, 0.0 }
0x1a38   :  { %v8196_v62 = vpop.f32.mrb[67].mxu0  ;;  %5936 = vadd.xlane.f32.xlu0 %v5935_v61  ;;  %v6593_v7 = vmul.f32 0.35355338, %v6589_v60  ;;  %v5526_v61 = vld [vmem:[#allocation11 + $0x20] sm:$0xff] }
0x1a3a   :  { %v8548_v63 = vpop.eup %8547  ;;  %v6594_v10 = vmul.f32 1.442695, %v6593_v7 }
0x1a3b   :  { %v6751_v0 = vpop.f32.mrb[68].mxu0  ;;  %v6097_v1 = vsel %vm444_vm4, %v8548_v63, 0.0 }
0x1a3c   :  { %v8206_v2 = vpop.f32.mrb[69].mxu0  ;;  %6098 = vadd.xlane.f32.xlu0 %v6097_v1  ;;  %v6755_v14 = vmul.f32 0.35355338, %v6751_v0  ;;  %v5528_v0 = vld [vmem:[#allocation11 + $0x30] sm:$0xff]  ;;  %v5529_v1 = vld [vmem:[#allocation11 + $0x38] sm:$0xff] }
0x1a3e   :  { %v6756_v28 = vmul.f32 1.442695, %v6755_v14 }
0x1a45   :  { %6439 = vrot.lane.b32.xlu1 %v9802_v12, %s8855_s8 }
0x1a4f   :  { %v5613_v4 = vpop.xlane.xlu0 %5612 }
0x1a50   :  { %8549 = vrcp.f32 %v5613_v4 }
0x1a51   :  { %8551 = vpow2.f32 %v6270_v6 }
0x1a52   :  { %6277 = vrot.lane.b32.xlu0 %v9802_v12, %s8853_s5  ;;  %8553 = vpow2.f32 %v6594_v10 }
0x1a53   :  { %8555 = vpow2.f32 %v6432_v26 }
0x1a54   :  { %8557 = vpow2.f32 %v6756_v28 }
0x1a5a   :  { %v8550_v8 = vpop.eup %8549 }
0x1a5b   :  { %v5615_v20 = vmul.f32 %v8550_v8, %v8542_v48  ;;  %v8552_v30 = vpop.eup %8551 }
0x1a5c   :  { %v6272_v31 = vsel %vm444_vm4, %v8552_v30, 0.0  ;;  %v8554_v32 = vpop.eup %8553 }
0x1a5d   :  { %8140 = vmatmul.mubr.msk.f32.vlgmr.msra.gmra.mrb[68].mxu1 %vm444_vm4, %v5615_v20  ;;  %v8556_v33 = vpop.eup %8555  ;;  %v6596_v34 = vsel %vm444_vm4, %v8554_v32, 0.0 }
0x1a5e   :  { %8148 = vmatpush3.msra.mxu1 %v5779_v22  ;;  %8149 = vmatprep.mubr.msk.f32.mxu1 %vm8851_vm3, %v8850_v19  ;;  %v9911_v35 = vpop.eup %8557  ;;  %v6434_v37 = vsel %vm444_vm4, %v8556_v33, 0.0 }
0x1a5f   :  { %8157 = vmatprep.subr.mxu1 %v8850_v19  ;;  %v6758_v36 = vsel %vm444_vm4, %v9911_v35, 0.0 }
0x1a69   :  { %6273 = vadd.xlane.f32.xlu1 %v6272_v31 }
0x1a6d   :  { %6597 = vadd.xlane.f32.xlu1 %v6596_v34 }
0x1a71   :  { %6759 = vadd.xlane.f32.xlu1 %v6758_v36  ;;  %6435 = vadd.xlane.f32.xlu0 %v6434_v37  ;;  %v7495_v36 = vld [vmem:[#allocation13 + $0x1] ss:$0 sm:$0xff] }
0x1a82   :  { %6763 = vrot.lane.b32.xlu1 %v9802_v12, %s8856_s23 }
0x1a87   :  { %6601 = vrot.lane.b32.xlu0 %v9802_v12, %s8854_s24 }
0x1ac1   :  { %v5775_v39 = vpop.xlane.xlu1 %5774 }
0x1ac2   :  { %8559 = vrcp.f32 %v5775_v39 }
0x1ac5   :  { %v5937_v40 = vpop.xlane.xlu0 %5936  ;;  %v6440_v47 = vpop.permute.xlu1 %6439 }
0x1ac6   :  { %8561 = vrcp.f32 %v5937_v40 }
0x1ac9   :  { %v6099_v24 = vpop.xlane.xlu0 %6098 }
0x1aca   :  { %8563 = vrcp.f32 %v6099_v24 }
0x1acc   :  { %v8560_v23 = vpop.eup %8559 }
0x1acd   :  { %v5777_v41 = vmul.f32 %v8560_v23, %v8544_v29  ;;  %v6278_v46 = vpop.permute.xlu0 %6277 }
0x1acf   :  { %8150 = vmatmul.mubr.msk.f32.vlgmr.msra.gmra.mrb[70].mxu1 %vm444_vm4, %v5777_v41 }
0x1ad0   :  { %v8562_v43 = vpop.eup %8561  ;;  %8158 = vmatpush3.msra.mxu1 %v5941_v3  ;;  %8159 = vmatprep.mubr.msk.f32.mxu1 %vm8851_vm3, %v8850_v19  ;;  %v8364_v3 = vpack.c.bf16 %v5529_v1, %v5528_v0  ;;  %v7500_v1 = vld [vmem:[%s10048_s16 + $0x1] ss:$0 sm:$0xff] }
0x1ad1   :  { %v5939_v18 = vmul.f32 %v8562_v43, %v8546_v59  ;;  %8167 = vmatprep.subr.mxu1 %v8850_v19 }
0x1ad3   :  { %8160 = vmatmul.mubr.msk.f32.vlgmr.msra.gmra.mrb[72].mxu1 %vm444_vm4, %v5939_v18 }
0x1ad4   :  { %v8564_v12 = vpop.eup %8563  ;;  %8168 = vmatpush3.msra.mxu1 %v6103_v38  ;;  %8169 = vmatprep.mubr.msk.f32.mxu1 %vm8851_vm3, %v8850_v19 }
0x1ad5   :  { %v6101_v45 = vmul.f32 %v8564_v12, %v8548_v63  ;;  %8177 = vmatprep.subr.mxu1 %v8850_v19 }
0x1ad7   :  { %8170 = vmatmul.mubr.msk.f32.vlgmr.msra.gmra.mrb[74].mxu1 %vm444_vm4, %v6101_v45 }
0x1ad8   :  { %8178 = vmatpush3.msra.mxu1 %v6278_v46  ;;  %8179 = vmatprep.mubr.msk.f32.mxu1 %vm8851_vm3, %v8850_v19 }
0x1ad9   :  { %8187 = vmatprep.subr.mxu1 %v8850_v19 }
0x1af6   :  { %v6274_v48 = vpop.xlane.xlu1 %6273 }
0x1af7   :  { %8565 = vrcp.f32 %v6274_v48 }
0x1afa   :  { %v6598_v49 = vpop.xlane.xlu1 %6597 }
0x1afe   :  { %v6436_v42 = vpop.xlane.xlu0 %6435  ;;  %v6760_v44 = vpop.xlane.xlu1 %6759 }
0x1aff   :  { %8567 = vrcp.f32 %v6436_v42 }
0x1b00   :  { %8569 = vrcp.f32 %v6598_v49 }
0x1b01   :  { %v8566_v53 = vpop.eup %8565  ;;  %8571 = vrcp.f32 %v6760_v44 }
0x1b02   :  { %v6276_v50 = vmul.f32 %v8566_v53, %v8552_v30  ;;  %v6602_v13 = vpop.permute.xlu0 %6601  ;;  %v6764_v55 = vpop.permute.xlu1 %6763 }
0x1b04   :  { %8180 = vmatmul.mubr.msk.f32.vlgmr.msra.gmra.mrb[76].mxu1 %vm444_vm4, %v6276_v50  ;;  %v6991_v50 = vld [vmem:[#allocation19 + $0x28] sm:$0xff] }
0x1b05   :  { %8188 = vmatpush3.msra.mxu1 %v6440_v47  ;;  %8189 = vmatprep.mubr.msk.f32.mxu1 %vm8851_vm3, %v8850_v19 }
0x1b06   :  { %8197 = vmatprep.subr.mxu1 %v8850_v19 }
0x1b09   :  { %v8568_v17 = vpop.eup %8567 }
0x1b0a   :  { %v6438_v51 = vmul.f32 %v8568_v17, %v8556_v33  ;;  %v8570_v11 = vpop.eup %8569  ;;  %v6992_v17 = vld [vmem:[#allocation19 + $0x30] sm:$0xff] }
0x1b0b   :  { %v6600_v52 = vmul.f32 %v8570_v11, %v8554_v32  ;;  %v8572_v54 = vpop.eup %8571 }
0x1b0c   :  { %8190 = vmatmul.mubr.msk.f32.vlgmr.msra.gmra.mrb[78].mxu1 %vm444_vm4, %v6438_v51  ;;  %v6762_v15 = vmul.f32 %v8572_v54, %v9911_v35  ;;  %v6993_v51 = vld [vmem:[#allocation19 + $0x38] sm:$0xff] }
0x1b0d   :  { %8198 = vmatpush3.msra.mxu1 %v6602_v13  ;;  %8199 = vmatprep.mubr.msk.f32.mxu1 %vm8851_vm3, %v8850_v19  ;;  %v8372_v11 = vpack.c.bf16 %v6993_v51, %v6992_v17  ;;  %v7505_v13 = vld [vmem:[%s10053_s21 + $0x40] sm:$0xff]  ;;  %v7507_v54 = vld [vmem:[%s10053_s21 + $0x50] sm:$0xff] }
0x1b0e   :  { %8207 = vmatprep.subr.mxu1 %v8850_v19 }
0x1b10   :  { %8200 = vmatmul.mubr.msk.f32.vlgmr.msra.gmra.mrb[80].mxu1 %vm444_vm4, %v6600_v52  ;;  %v7506_v52 = vld [vmem:[%s10053_s21 + $0x48] sm:$0xff] }
0x1b11   :  { %8208 = vmatpush3.msra.mxu1 %v6764_v55  ;;  %8209 = vmatprep.mubr.msk.f32.mxu1 %vm8851_vm3, %v8850_v19  ;;  %v5527_v19 = vld [vmem:[#allocation11 + $0x28] sm:$0xff]  ;;  %v8376_v55 = vpack.c.bf16 %v7506_v52, %v7505_v13 }
0x1b12   :  { %v8360_v62 = vpack.c.bf16 %v5527_v19, %v5526_v61 }
0x1b14   :  { %8210 = vmatmul.mubr.msk.f32.vlgmr.msra.gmra.mrb[82].mxu1 %vm444_vm4, %v6762_v15  ;;  %8361 = vmatprep.subr.bf16.mxu0 %v8360_v62  ;;  %v7508_v15 = vld [vmem:[%s10053_s21 + $0x58] sm:$0xff] }
0x1b15   :  { %8363 = vmatpush3.bf16.msra.mxu0 %v8360_v62 }
0x1b16   :  { %8365 = vmatprep.subr.bf16.mxu0 %v8364_v3 }
0x1b19   :  { %8367 = vmatpush3.bf16.msra.mxu0 %v8364_v3 }
0x1b1a   :  { %8377 = vmatprep.subr.bf16.mxu0 %v8376_v55 }
0x1b30   :  { %v5688_v16 = vpop.f32.mrb[68].mxu1 }
0x1b31   :  { %v8141_v56 = vpop.f32.mrb[69].mxu1 }
0x1b32   :  { %v7509_v56 = vld [vmem:[%s10053_s21 + $0x60] sm:$0xff] }
0x1ba2   :  { %v5850_v29 = vpop.f32.mrb[70].mxu1 }
0x1ba3   :  { %6179 = vrot.lane.b32.xlu0 %v5850_v29, %s8841_s27  ;;  %v8151_v27 = vpop.f32.mrb[71].mxu1  ;;  %v7510_v29 = vld [vmem:[%s10053_s21 + $0x68] sm:$0xff] }
0x1ba4   :  { %v8384_v27 = vpack.c.bf16 %v7510_v29, %v7509_v56  ;;  %v7520_v29 = vld [vmem:[%s10050_s18 + $0x1] ss:$0 sm:$0xff] }
0x1ba6   :  { %v6012_v57 = vpop.f32.mrb[72].mxu1 }
0x1ba7   :  { %6183 = vrot.lane.b32.xlu1 %v6012_v57, %s10098_s0  ;;  %v8161_v58 = vpop.f32.mrb[73].mxu1 }
0x1baa   :  { %v6174_v59 = vpop.f32.mrb[74].mxu1 }
0x1bab   :  { %6187 = vrot.lane.b32.xlu1 %v6174_v59, %s10099_s25  ;;  %v8171_v60 = vpop.f32.mrb[75].mxu1 }
0x1bd7   :  { %v6349_v63 = vpop.f32.mrb[76].mxu1 }
0x1bd8   :  { %v8181_v2 = vpop.f32.mrb[77].mxu1 }
0x1bdf   :  { %v6511_v4 = vpop.f32.mrb[78].mxu1 }
0x1be0   :  { %6840 = vrot.lane.b32.xlu0 %v6511_v4, %s8841_s27  ;;  %v8191_v5 = vpop.f32.mrb[79].mxu1 }
0x1be3   :  { %v6673_v6 = vpop.f32.mrb[80].mxu1 }
0x1be4   :  { %6844 = vrot.lane.b32.xlu0 %v6673_v6, %s10098_s0  ;;  %v8201_v7 = vpop.f32.mrb[81].mxu1 }
0x1be7   :  { %v6835_v8 = vpop.f32.mrb[82].mxu1 }
0x1be8   :  { %6848 = vrot.lane.b32.xlu1 %v6835_v8, %s10099_s25  ;;  %v8211_v9 = vpop.f32.mrb[83].mxu1  ;;  %v7511_v8 = vld [vmem:[%s10053_s21 + $0x70] sm:$0xff] }
0x1be9   :  { %v7512_v9 = vld [vmem:[%s10053_s21 + $0x78] sm:$0xff] }
0x1c15   :  { %v6180_v10 = vpop.permute.xlu0 %6179 }
0x1c16   :  { %v6190_v20 = vsel %vm444_vm4, %v5688_v16, %v6180_v10  ;;  %v8380_v16 = vpack.c.bf16 %v7508_v15, %v7507_v54  ;;  %v8388_v10 = vpack.c.bf16 %v7512_v9, %v7511_v8 }
0x1c19   :  { %v6184_v14 = vpop.permute.xlu1 %6183 }
0x1c1a   :  { %v6191_v22 = vsel %vm1102_vm5, %v6190_v20, %v6184_v14  ;;  %v7502_v14 = vld [vmem:[%s10052_s20 + $0x1] ss:$0 sm:$0xff] }
0x1c1d   :  { %v6188_v26 = vpop.permute.xlu1 %6187 }
0x1c1e   :  { %v6192_v28 = vsel %vm1104_vm6, %v6191_v22, %v6188_v26 }
0x1c1f   :  { %8220 = vmatprep.mubr.msk.f32.mxu0 %vm354_vm2, %v6192_v28 }
0x1c52   :  { %v6841_v30 = vpop.permute.xlu0 %6840 }
0x1c53   :  { %v6851_v32 = vsel %vm444_vm4, %v6349_v63, %v6841_v30  ;;  %v7499_v63 = vld [vmem:[#allocation17 + $0x1] ss:$0 sm:$0xff] }
0x1c56   :  { %v6845_v31 = vpop.permute.xlu0 %6844 }
0x1c57   :  { %v6852_v33 = vsel %vm1102_vm5, %v6851_v32, %v6845_v31  ;;  %v7514_v32 = vld [vmem:[%s10054_s22 + $0x1] ss:$0 sm:$0xff]  ;;  %s10100_s22 = sld [smem:[#allocation36_spill]] }
0x1c5a   :  { %v6849_v34 = vpop.permute.xlu1 %6848 }
0x1c5b   :  { %v6853_v35 = vsel %vm1104_vm6, %v6852_v33, %v6849_v34 }
0x1c5c   :  { %8221 = vmatmul.mubr.msk.f32.vlgmr.msra.gmra.mrb[70].mxu0 %vm354_vm2, %v6853_v35 }
0x1c5d   :  { %8379 = vmatpush3.bf16.msra.mxu0 %v8376_v55  ;;  %v7519_v55 = vld [vmem:[%s10049_s17 + $0x1] ss:$0 sm:$0xff] }
0x1c5e   :  { %8381 = vmatprep.subr.bf16.mxu0 %v8380_v16 }
0x1c61   :  { %8383 = vmatpush3.bf16.msra.mxu0 %v8380_v16 }
0x1c62   :  { %8385 = vmatprep.subr.bf16.mxu0 %v8384_v27 }
0x1c65   :  { %8387 = vmatpush3.bf16.msra.mxu0 %v8384_v27 }
0x1c66   :  { %8389 = vmatprep.subr.bf16.mxu0 %v8388_v10 }
0x1c69   :  { %8391 = vmatpush3.bf16.msra.mxu0 %v8388_v10 }
0x1d2f   :  { %v8222_v37 = vpop.f32.mrb[70].mxu0 }
0x1d30   :  { %v6938_v38 = vadd.f32 %v8222_v37, %v7495_v36  ;;  %v6932_v39 = vpop.f32.mrb[71].mxu0 }
0x1d31   :  { %v6933_v40 = vadd.f32 %v7495_v36, %v6932_v39 }
0x1d32   :  { %v6942_v24 = vadd.f32 %v6938_v38, %v9831_v25 }
0x1d33   :  { %v6941_v23 = vadd.f32 %v6933_v40, %v9827_v21  ;;  %v6990_v21 = vld [vmem:[#allocation19 + $0x20] sm:$0xff] }
0x1d34   :  { %v6950_v41 = vsel %vm354_vm2, %v6942_v24, 0.0  ;;  %v8368_v44 = vpack.c.bf16 %v6991_v50, %v6990_v21  ;;  %v7234_v21 = vld [vmem:[%s10100_s22 + $0x18] sm:$0xff] }
0x1d35   :  { %6951 = vadd.xlane.f32.xlu1 %v6950_v41  ;;  %v6947_v43 = vsel %vm354_vm2, %v6941_v23, 0.0 }
0x1d36   :  { %6948 = vadd.xlane.f32.xlu0 %v6947_v43  ;;  %8369 = vmatprep.subr.bf16.mxu1 %v8368_v44 }
0x1d37   :  { %8371 = vmatpush3.bf16.msra.mxu1 %v8368_v44 }
0x1d38   :  { %8373 = vmatprep.subr.bf16.mxu1 %v8372_v11 }
0x1d3b   :  { %8375 = vmatpush3.bf16.msra.mxu1 %v8372_v11 }
0x1dc2   :  { %v6952_v18 = vpop.xlane.xlu1 %6951 }
0x1dc3   :  { %v6954_v12 = vmul.f32 0.03125, %v6952_v18  ;;  %v6949_v45 = vpop.xlane.xlu0 %6948 }
0x1dc4   :  { %v6953_v46 = vmul.f32 0.03125, %v6949_v45 }
0x1dc5   :  { %v6956_v47 = vsub.f32 %v6942_v24, %v6954_v12 }
0x1dc6   :  { %v6955_v48 = vsub.f32 %v6941_v23, %v6953_v46 }
0x1dc7   :  { %v6958_v53 = vmul.f32 %v6956_v47, %v6956_v47 }
0x1dc8   :  { %v6957_v49 = vmul.f32 %v6955_v48, %v6955_v48 }
0x1dc9   :  { %v6962_v25 = vsel %vm354_vm2, %v6958_v53, 0.0 }
0x1dca   :  { %v6959_v42 = vsel %vm354_vm2, %v6957_v49, 0.0  ;;  %v7231_v49 = vld [vmem:[%s10100_s22] sm:$0xff] }
0x1dcb   :  { %6960 = vadd.xlane.f32.xlu0 %v6959_v42  ;;  %v7232_v42 = vld [vmem:[%s10100_s22 + $0x8] sm:$0xff] }
0x1dcc   :  { %v8392_v53 = vpack.c.bf16 %v7232_v42, %v7231_v49 }
0x1dce   :  { %8393 = vmatprep.subr.bf16.mxu1 %v8392_v53 }
0x1dcf   :  { %6963 = vadd.xlane.f32.xlu0 %v6962_v25  ;;  %v7233_v25 = vld [vmem:[%s10100_s22 + $0x10] sm:$0xff] }
0x1dd0   :  { %v8396_v50 = vpack.c.bf16 %v7234_v21, %v7233_v25 }
0x1e58   :  { %v6961_v57 = vpop.xlane.xlu0 %6960 }
0x1e59   :  { %v6965_v58 = vmul.f32 0.03125, %v6961_v57 }
0x1e5b   :  { %v6967_v59 = vadd.f32 1e-05, %v6965_v58 }
0x1e5c   :  { %v6964_v60 = vpop.xlane.xlu0 %6963 }
0x1e5d   :  { %8573 = vrsqrt.f32 %v6967_v59  ;;  %v6966_v61 = vmul.f32 0.03125, %v6964_v60  ;;  %v7521_v60 = vld [vmem:[#allocation2] ss:$0 sm:$0xff] }
0x1e5f   :  { %v6968_v19 = vadd.f32 1e-05, %v6966_v61 }
0x1e61   :  { %8575 = vrsqrt.f32 %v6968_v19 }
0x1e67   :  { %v8574_v62 = vpop.eup %8573 }
0x1e68   :  { %v6971_v0 = vmul.f32 %v8574_v62, %v6955_v48 }
0x1e6a   :  { %v6979_v2 = vmul.f32 %v7499_v63, %v6971_v0 }
0x1e6b   :  { %v8576_v3 = vpop.eup %8575 }
0x1e6c   :  { %v6972_v4 = vmul.f32 %v8576_v3, %v6956_v47  ;;  %v6987_v5 = vadd.f32 %v7500_v1, %v6979_v2 }
0x1e6e   :  { %v6980_v6 = vmul.f32 %v7499_v63, %v6972_v4  ;;  %8231 = vmatprep.mubr.msk.f32.mxu1 %vm354_vm2, %v6987_v5 }
0x1e70   :  { %v6988_v7 = vadd.f32 %v7500_v1, %v6980_v6 }
0x1e72   :  { %8232 = vmatmul.mubr.msk.f32.vlgmr.msra.gmra.mrb[84].mxu1 %vm354_vm2, %v6988_v7 }
0x1e73   :  { %8395 = vmatpush3.bf16.msra.mxu1 %v8392_v53 }
0x1e74   :  { %8397 = vmatprep.subr.bf16.mxu1 %v8396_v50 }
0x1e77   :  { %8399 = vmatpush3.bf16.msra.mxu1 %v8396_v50 }
0x1f45   :  { %v8233_v20 = vpop.f32.mrb[84].mxu1 }
0x1f46   :  { %v7080_v22 = vadd.f32 %v8233_v20, %v7502_v14  ;;  %v7074_v26 = vpop.f32.mrb[85].mxu1 }
0x1f47   :  { %v7075_v28 = vadd.f32 %v7502_v14, %v7074_v26 }
0x1f48   :  { %v7084_v31 = vmax.f32 %v7080_v22, 0.0 }
0x1f49   :  { %v7083_v30 = vmax.f32 %v7075_v28, 0.0 }
0x1f4b   :  { %8250 = vmatprep.mubr.msk.f32.mxu0 %vm3655_vm7, %v7083_v30 }
0x1f4c   :  { %8251 = vmatmul.mubr.msk.f32.vlgmr.msra.gmra.mrb[72].mxu0 %vm3655_vm7, %v7084_v31 }
0x201f   :  { %v8252_v33 = vpop.f32.mrb[72].mxu0 }
0x2020   :  { %v7180_v34 = vadd.f32 %v8252_v33, %v7514_v32  ;;  %v7174_v35 = vpop.f32.mrb[73].mxu0 }
0x2021   :  { %v7175_v36 = vadd.f32 %v7514_v32, %v7174_v35 }
0x2022   :  { %v7184_v37 = vadd.f32 %v7180_v34, %v6988_v7 }
0x2023   :  { %v7183_v38 = vadd.f32 %v7175_v36, %v6987_v5 }
0x2024   :  { %v7192_v39 = vsel %vm354_vm2, %v7184_v37, 0.0 }
0x2025   :  { %7193 = vadd.xlane.f32.xlu0 %v7192_v39  ;;  %v7189_v40 = vsel %vm354_vm2, %v7183_v38, 0.0 }
0x2026   :  { %7190 = vadd.xlane.f32.xlu1 %v7189_v40 }
0x20b2   :  { %v7194_v24 = vpop.xlane.xlu0 %7193 }
0x20b3   :  { %v7196_v23 = vmul.f32 0.03125, %v7194_v24  ;;  %v7191_v41 = vpop.xlane.xlu1 %7190 }
0x20b4   :  { %v7195_v43 = vmul.f32 0.03125, %v7191_v41 }
0x20b5   :  { %v7198_v18 = vsub.f32 %v7184_v37, %v7196_v23 }
0x20b6   :  { %v7197_v12 = vsub.f32 %v7183_v38, %v7195_v43 }
0x20b7   :  { %v7200_v45 = vmul.f32 %v7198_v18, %v7198_v18 }
0x20b8   :  { %v7199_v46 = vmul.f32 %v7197_v12, %v7197_v12 }
0x20b9   :  { %v7204_v47 = vsel %vm354_vm2, %v7200_v45, 0.0 }
0x20ba   :  { %7205 = vadd.xlane.f32.xlu0 %v7204_v47  ;;  %v7201_v48 = vsel %vm354_vm2, %v7199_v46, 0.0 }
0x20bb   :  { %7202 = vadd.xlane.f32.xlu1 %v7201_v48 }
0x2147   :  { %v7206_v44 = vpop.xlane.xlu0 %7205 }
0x2148   :  { %v7208_v17 = vmul.f32 0.03125, %v7206_v44  ;;  %v7203_v51 = vpop.xlane.xlu1 %7202 }
0x2149   :  { %v7207_v11 = vmul.f32 0.03125, %v7203_v51 }
0x214a   :  { %v7210_v13 = vadd.f32 1e-05, %v7208_v17 }
0x214b   :  { %v7209_v52 = vadd.f32 1e-05, %v7207_v11 }
0x214c   :  { %8577 = vrsqrt.f32 %v7210_v13 }
0x214d   :  { %8579 = vrsqrt.f32 %v7209_v52 }
0x2156   :  { %v8578_v54 = vpop.eup %8577 }
0x2157   :  { %v8580_v15 = vpop.eup %8579  ;;  %v7214_v16 = vmul.f32 %v8578_v54, %v7198_v18 }
0x2158   :  { %v7213_v56 = vmul.f32 %v8580_v15, %v7197_v12 }
0x2159   :  { %v7222_v27 = vmul.f32 %v7519_v55, %v7214_v16 }
0x215a   :  { %v7221_v57 = vmul.f32 %v7519_v55, %v7213_v56 }
0x215b   :  { %v7230_v59 = vadd.f32 %v7520_v29, %v7222_v27 }
0x215c   :  { %v7229_v58 = vadd.f32 %v7520_v29, %v7221_v57 }
0x215e   :  { %8261 = vmatprep.mubr.msk.f32.mxu1 %vm354_vm2, %v7229_v58 }
0x215f   :  { %8262 = vmatmul.mubr.msk.f32.vlgmr.msra.gmra.mrb[86].mxu1 %vm354_vm2, %v7230_v59 }
0x2232   :  { %v8263_v61 = vpop.f32.mrb[86].mxu1 }
0x2233   :  { %v7320_v19 = vadd.f32 %v8263_v61, %v7521_v60  ;;  %v7314_v62 = vpop.f32.mrb[87].mxu1 }
0x2234   :  { %v7315_v63 = vadd.f32 %v7521_v60, %v7314_v62 }
0x2235   :  { %7325 = vst.msk [vmem:[%s10101_s6 + $0x8] sm:$0xff] %vm7323_vm8, %v7320_v19 }
0x2236   :  { %7324 = vst.msk [vmem:[%s10101_s6] sm:$0xff] %vm7323_vm8, %v7315_v63 }
0x2237   :  { %7330 = vsyncpa [#allocation4], 1 }
0x2238   :  { %7331 = vsyncpa [#allocation6], 1 }
0x2239   :  { %7332 = vsyncpa [#allocation9], 1 }
0x223a   :  { %7333 = vsyncpa [#allocation12], 1 }
0x223b   :  { %7334 = vsyncpa [#allocation15], 1 }
0x223c   :  { %7335 = vsyncpa [#allocation18], 1 }

</bundles_post_ra>
